<compile_context>
chip_gen: v7x
topology: tpu7x:2x2x1
jax: 0.10.0
libtpu: 0.0.40
codegen_flags: <defaults>
</compile_context>

<pallas_src>
import math

import jax
import jax.numpy as jnp
from jax.experimental import pallas as pl
from jax.experimental.pallas import tpu as pltpu

BN_EPS = 1e-5


# ---------------------------------------------------------------------------
# Pallas kernels
# ---------------------------------------------------------------------------
def matmul_bn_relu_kernel(x_ref, w_ref, gamma_ref, beta_ref, o_ref):
    """conv-as-matmul (M,K)@(K,C) -> training-mode BN (fused affine) -> ReLU."""
    h = jnp.dot(x_ref[...], w_ref[...], preferred_element_type=jnp.float32)  # (M, C)
    inv_m = 1.0 / h.shape[0]
    # Independent single-pass sums: the two XLU sublane reductions can overlap.
    s1 = jnp.sum(h, axis=0, keepdims=True)        # (1, C)
    s2 = jnp.sum(h * h, axis=0, keepdims=True)    # (1, C)
    mean = s1 * inv_m
    var = s2 * inv_m - mean * mean
    scale = gamma_ref[...] * jax.lax.rsqrt(var + BN_EPS)   # (1, C)
    shift = beta_ref[...] - mean * scale                   # (1, C)
    o_ref[...] = jnp.maximum(h * scale + shift, 0.0).astype(o_ref.dtype)


def matmul_bn_add_relu_kernel(x_ref, w_ref, gamma_ref, beta_ref, res_ref, o_ref):
    """Final fused step: temporal conv matmul -> bn2 -> + residual -> output ReLU."""
    h = jnp.dot(x_ref[...], w_ref[...], preferred_element_type=jnp.float32)
    inv_m = 1.0 / h.shape[0]
    s1 = jnp.sum(h, axis=0, keepdims=True)
    s2 = jnp.sum(h * h, axis=0, keepdims=True)
    mean = s1 * inv_m
    var = s2 * inv_m - mean * mean
    scale = gamma_ref[...] * jax.lax.rsqrt(var + BN_EPS)
    shift = beta_ref[...] - mean * scale
    o_ref[...] = jnp.maximum(res_ref[...] + h * scale + shift, 0.0).astype(o_ref.dtype)


# ---------------------------------------------------------------------------
# pallas_call wrappers
# ---------------------------------------------------------------------------
def _full_spec(shape):
    # Whole array resident in VMEM (problem is small; BN stats need the full batch).
    return pl.BlockSpec(shape, lambda: (0,) * len(shape), memory_space=pltpu.VMEM)


def _cost(m, k, c):
    return pl.CostEstimate(
        flops=2 * m * k * c,
        transcendentals=c,
        bytes_accessed=4 * (m * k + k * c + m * c + 4 * c),
    )


_COMPILER_PARAMS = pltpu.CompilerParams(vmem_limit_bytes=32 * 1024 * 1024)


def fused_conv_bn_relu(patches, w_mm, gamma, beta):
    m, k = patches.shape
    c = w_mm.shape[1]
    return pl.pallas_call(
        matmul_bn_relu_kernel,
        out_shape=jax.ShapeDtypeStruct((m, c), jnp.float32),
        grid=(),
        in_specs=[_full_spec((m, k)), _full_spec((k, c)),
                  _full_spec((1, c)), _full_spec((1, c))],
        out_specs=_full_spec((m, c)),
        compiler_params=_COMPILER_PARAMS,
        cost_estimate=_cost(m, k, c),
    )(patches, w_mm, gamma.reshape(1, c), beta.reshape(1, c))


def fused_conv_bn_add_relu(patches, w_mm, gamma, beta, residual):
    m, k = patches.shape
    c = w_mm.shape[1]
    return pl.pallas_call(
        matmul_bn_add_relu_kernel,
        out_shape=jax.ShapeDtypeStruct((m, c), jnp.float32),
        grid=(),
        in_specs=[_full_spec((m, k)), _full_spec((k, c)),
                  _full_spec((1, c)), _full_spec((1, c)), _full_spec((m, c))],
        out_specs=_full_spec((m, c)),
        compiler_params=_COMPILER_PARAMS,
        cost_estimate=_cost(m, k, c),
    )(patches, w_mm, gamma.reshape(1, c), beta.reshape(1, c), residual)


# ---------------------------------------------------------------------------
# Layout plumbing (wrapper side): im2col + weight re-layout
# ---------------------------------------------------------------------------
def _im2col_spatial(x, k, stride, pad):
    # x: (N, T, H, W, C) channels-last
    n, t, h, w, c = x.shape
    ho = (h + 2 * pad - k) // stride + 1
    wo = (w + 2 * pad - k) // stride + 1
    xp = jnp.pad(x, ((0, 0), (0, 0), (pad, pad), (pad, pad), (0, 0)))
    taps = []
    for ky in range(k):
        for kx in range(k):
            taps.append(xp[:, :,
                           ky: ky + (ho - 1) * stride + 1: stride,
                           kx: kx + (wo - 1) * stride + 1: stride, :])
    patches = jnp.concatenate(taps, axis=-1)                  # (N,T,Ho,Wo,k*k*C)
    return patches.reshape(n * t * ho * wo, k * k * c), (n, t, ho, wo)


def _im2col_temporal(x, kt, stride, pad):
    # x: (N, T, H, W, C) channels-last
    n, t, h, w, c = x.shape
    to = (t + 2 * pad - kt) // stride + 1
    xp = jnp.pad(x, ((0, 0), (pad, pad), (0, 0), (0, 0), (0, 0)))
    taps = [xp[:, i: i + (to - 1) * stride + 1: stride] for i in range(kt)]
    patches = jnp.concatenate(taps, axis=-1)                  # (N,To,H,W,kt*C)
    return patches.reshape(n * to * h * w, kt * c), (n, to, h, w)


def _spatial_w_mm(w_sp):
    # PyTorch layout (mid, cin, 1, kh, kw) -> matmul layout (kh*kw*cin, mid),
    # matching the im2col feature order (ky, kx, cin).
    mid, cin, _, kh, kw = w_sp.shape
    return jnp.transpose(w_sp[:, :, 0], (2, 3, 1, 0)).reshape(kh * kw * cin, mid)


def _temporal_w_mm(w_t):
    # PyTorch layout (cout, mid, kt, 1, 1) -> (kt*mid, cout), matching (kt, mid) order.
    cout, mid, kt = w_t.shape[:3]
    return jnp.transpose(w_t[:, :, :, 0, 0], (2, 1, 0)).reshape(kt * mid, cout)


# ---------------------------------------------------------------------------
# SpatioTemporalResBlock forward (downsample=False), built from 4 pallas_calls
# ---------------------------------------------------------------------------
def st_res_block_forward(x_ncdhw, params, kernel_size):
    """x: (N, C, T, H, W) float32 (PyTorch layout). Returns same shape."""
    pad = kernel_size // 2
    x = jnp.transpose(x_ncdhw, (0, 2, 3, 4, 1))   # channels-last (N, T, H, W, C)

    # --- conv1.spatial_conv -> conv1.bn -> ReLU ----------------------------
    p1 = params['conv1']
    patches, (n, t, h, w) = _im2col_spatial(x, kernel_size, 1, pad)
    y = fused_conv_bn_relu(patches, _spatial_w_mm(p1['w_sp']), p1['g_sp'], p1['b_sp'])
    y = y.reshape(n, t, h, w, -1)

    # --- conv1.temporal_conv fused with block bn1 + relu1 ------------------
    patches, (n, t, h, w) = _im2col_temporal(y, kernel_size, 1, pad)
    y = fused_conv_bn_relu(patches, _temporal_w_mm(p1['w_t']),
                           params['bn1_g'], params['bn1_b'])
    y = y.reshape(n, t, h, w, -1)

    # --- conv2.spatial_conv -> conv2.bn -> ReLU ----------------------------
    p2 = params['conv2']
    patches, (n, t, h, w) = _im2col_spatial(y, kernel_size, 1, pad)
    y = fused_conv_bn_relu(patches, _spatial_w_mm(p2['w_sp']), p2['g_sp'], p2['b_sp'])
    y = y.reshape(n, t, h, w, -1)

    # --- conv2.temporal_conv fused with bn2 + residual add + output ReLU ---
    patches, (n, t, h, w) = _im2col_temporal(y, kernel_size, 1, pad)
    res = x.reshape(n * t * h * w, -1)            # identity branch (downsample=False)
    out = fused_conv_bn_add_relu(patches, _temporal_w_mm(p2['w_t']),
                                 params['bn2_g'], params['bn2_b'], res)
    out = out.reshape(n, t, h, w, -1)
    return jnp.transpose(out, (0, 4, 1, 2, 3))    # back to (N, C, T, H, W)


# ---------------------------------------------------------------------------
# Parameter construction (matches the PyTorch module's shapes / formulas)
# ---------------------------------------------------------------------------
def _intermed_channels(in_ch, out_ch, k):
    return int(math.floor(k * k * k * in_ch * out_ch /
                          (k * k * in_ch + k * out_ch)))


def init_st_conv_params(key, in_ch, out_ch, k):
    mid = _intermed_channels(in_ch, out_ch, k)
    k1, k2, k3, k4 = jax.random.split(key, 4)
    w_sp = jax.random.normal(k1, (mid, in_ch, 1, k, k), jnp.float32) * (2.0 / (in_ch * k * k)) ** 0.5
    w_t = jax.random.normal(k2, (out_ch, mid, k, 1, 1), jnp.float32) * (2.0 / (mid * k)) ** 0.5
    g_sp = 1.0 + 0.1 * jax.random.normal(k3, (mid,), jnp.float32)
    b_sp = 0.1 * jax.random.normal(k4, (mid,), jnp.float32)
    return {'w_sp': w_sp, 'w_t': w_t, 'g_sp': g_sp, 'b_sp': b_sp}


def init_block_params(key, in_ch, out_ch, k):
    kc1, kc2, kb = jax.random.split(key, 3)
    kb1, kb2, kb3, kb4 = jax.random.split(kb, 4)
    return {
        'conv1': init_st_conv_params(kc1, in_ch, out_ch, k),
        'conv2': init_st_conv_params(kc2, out_ch, out_ch, k),
        'bn1_g': 1.0 + 0.1 * jax.random.normal(kb1, (out_ch,), jnp.float32),
        'bn1_b': 0.1 * jax.random.normal(kb2, (out_ch,), jnp.float32),
        'bn2_g': 1.0 + 0.1 * jax.random.normal(kb3, (out_ch,), jnp.float32),
        'bn2_b': 0.1 * jax.random.normal(kb4, (out_ch,), jnp.float32),
    }


# ---------------------------------------------------------------------------
# Pure-JAX (XLA conv) reference for correctness checking
# ---------------------------------------------------------------------------
def _conv3d_ref(x, w, stride, padding):
    return jax.lax.conv_general_dilated(
        x, w, window_strides=stride,
        padding=tuple((p, p) for p in padding),
        dimension_numbers=('NCDHW', 'OIDHW', 'NCDHW'))


def _bn3d_ref(x, g, b):
    mean = jnp.mean(x, axis=(0, 2, 3, 4), keepdims=True)
    var = jnp.mean((x - mean) ** 2, axis=(0, 2, 3, 4), keepdims=True)
    xn = (x - mean) / jnp.sqrt(var + BN_EPS)
    return xn * g.reshape(1, -1, 1, 1, 1) + b.reshape(1, -1, 1, 1, 1)


def _st_conv_ref(x, p, k, pad):
    h = _conv3d_ref(x, p['w_sp'], (1, 1, 1), (0, pad, pad))
    h = jnp.maximum(_bn3d_ref(h, p['g_sp'], p['b_sp']), 0.0)
    return _conv3d_ref(h, p['w_t'], (1, 1, 1), (pad, 0, 0))


def st_res_block_ref(x, params, k):
    pad = k // 2
    res = jnp.maximum(_bn3d_ref(_st_conv_ref(x, params['conv1'], k, pad),
                                params['bn1_g'], params['bn1_b']), 0.0)
    res = _bn3d_ref(_st_conv_ref(res, params['conv2'], k, pad),
                    params['bn2_g'], params['bn2_b'])
    return jnp.maximum(x + res, 0.0)


# ---------------------------------------------------------------------------
if __name__ == "__main__":
    # Small shapes: batch=2, channels=16 (in == out, required by the identity add
    # when downsample=False), T=4, H=W=8, kernel_size=3.
    N, C, T, H, W = 2, 16, 4, 8, 8
    K = 3

    key = jax.random.PRNGKey(0)
    kx, kp = jax.random.split(key)
    x = jax.random.normal(kx, (N, C, T, H, W), jnp.float32)
    params = init_block_params(kp, C, C, K)

    forward = jax.jit(st_res_block_forward, static_argnums=2)
    out = forward(x, params, K)
    out = jax.block_until_ready(out)

    ref = st_res_block_ref(x, params, K)
    assert out.shape == (N, C, T, H, W), out.shape
    err = jnp.max(jnp.abs(out - ref))
    assert jnp.allclose(out, ref, atol=2e-3, rtol=2e-3), f"mismatch vs reference, max abs err {err}"

    print("KERNEL_OK")
</pallas_src>

<mosaic_0001>
module attributes {stable_mosaic.version = 11 : i64} {
  func.func @matmul_bn_relu_kernel(%arg0: memref<512x144xf32, #tpu.memory_space<vmem>>, %arg1: memref<144x36xf32, #tpu.memory_space<vmem>>, %arg2: memref<1x36xf32, #tpu.memory_space<vmem>>, %arg3: memref<1x36xf32, #tpu.memory_space<vmem>>, %arg4: memref<512x36xf32, #tpu.memory_space<vmem>>) attributes {dimension_semantics = [], scalar_prefetch = 0 : i64, scratch_operands = 0 : i64, tpu.core_type = #tpu.core_type<tc>} {
    %c0 = arith.constant 0 : index
    %c0_0 = arith.constant 0 : index
    %0 = vector.load %arg0[%c0, %c0_0] : memref<512x144xf32, #tpu.memory_space<vmem>>, vector<512x144xf32>
    %c0_1 = arith.constant 0 : index
    %c0_2 = arith.constant 0 : index
    %1 = vector.load %arg1[%c0_1, %c0_2] : memref<144x36xf32, #tpu.memory_space<vmem>>, vector<144x36xf32>
    %cst = arith.constant dense<0.000000e+00> : vector<512x36xf32>
    %2 = tpu.matmul %0, %1, %cst {dimension_numbers = #tpu.dot_dimension_numbers<[1], [0], [0], [1], [0, 0, 1, 1], [], []>} : vector<512x144xf32>, vector<144x36xf32>, vector<512x36xf32> -> vector<512x36xf32>
    %cst_3 = arith.constant dense<0.000000e+00> : vector<36xf32>
    %3 = vector.multi_reduction <add>, %2, %cst_3 [0] : vector<512x36xf32> to vector<36xf32>
    %4 = vector.shape_cast %3 : vector<36xf32> to vector<1x36xf32>
    %5 = arith.mulf %2, %2 : vector<512x36xf32>
    %cst_4 = arith.constant dense<0.000000e+00> : vector<36xf32>
    %6 = vector.multi_reduction <add>, %5, %cst_4 [0] : vector<512x36xf32> to vector<36xf32>
    %7 = vector.shape_cast %6 : vector<36xf32> to vector<1x36xf32>
    %cst_5 = arith.constant 0.001953125 : f32
    %8 = vector.broadcast %cst_5 : f32 to vector<1x36xf32>
    %9 = arith.mulf %4, %8 : vector<1x36xf32>
    %cst_6 = arith.constant 0.001953125 : f32
    %10 = vector.broadcast %cst_6 : f32 to vector<1x36xf32>
    %11 = arith.mulf %7, %10 : vector<1x36xf32>
    %12 = arith.mulf %9, %9 : vector<1x36xf32>
    %13 = arith.subf %11, %12 : vector<1x36xf32>
    %c0_7 = arith.constant 0 : index
    %c0_8 = arith.constant 0 : index
    %14 = vector.load %arg2[%c0_7, %c0_8] : memref<1x36xf32, #tpu.memory_space<vmem>>, vector<1x36xf32>
    %cst_9 = arith.constant 9.99999974E-6 : f32
    %15 = vector.broadcast %cst_9 : f32 to vector<1x36xf32>
    %16 = arith.addf %13, %15 : vector<1x36xf32>
    %17 = math.rsqrt %16 : vector<1x36xf32>
    %18 = arith.mulf %14, %17 : vector<1x36xf32>
    %c0_10 = arith.constant 0 : index
    %c0_11 = arith.constant 0 : index
    %19 = vector.load %arg3[%c0_10, %c0_11] : memref<1x36xf32, #tpu.memory_space<vmem>>, vector<1x36xf32>
    %20 = arith.mulf %9, %18 : vector<1x36xf32>
    %21 = arith.subf %19, %20 : vector<1x36xf32>
    %22 = vector.broadcast %18 : vector<1x36xf32> to vector<512x36xf32>
    %23 = arith.mulf %2, %22 : vector<512x36xf32>
    %24 = vector.broadcast %21 : vector<1x36xf32> to vector<512x36xf32>
    %25 = arith.addf %23, %24 : vector<512x36xf32>
    %cst_12 = arith.constant 0.000000e+00 : f32
    %26 = vector.broadcast %cst_12 : f32 to vector<512x36xf32>
    %27 = arith.maximumf %25, %26 : vector<512x36xf32>
    %c0_13 = arith.constant 0 : index
    %c0_14 = arith.constant 0 : index
    %28 = vector.load %arg4[%c0_13, %c0_14] : memref<512x36xf32, #tpu.memory_space<vmem>>, vector<512x36xf32>
    tpu.vector_store %arg4[%c0_13, %c0_14], %27 {strides = array<i32>} : memref<512x36xf32, #tpu.memory_space<vmem>>, vector<512x36xf32>,
    return
  }
}

module attributes {stable_mosaic.version = 11 : i64} {
  func.func @matmul_bn_relu_kernel(%arg0: memref<512x108xf32, #tpu.memory_space<vmem>>, %arg1: memref<108x16xf32, #tpu.memory_space<vmem>>, %arg2: memref<1x16xf32, #tpu.memory_space<vmem>>, %arg3: memref<1x16xf32, #tpu.memory_space<vmem>>, %arg4: memref<512x16xf32, #tpu.memory_space<vmem>>) attributes {dimension_semantics = [], scalar_prefetch = 0 : i64, scratch_operands = 0 : i64, tpu.core_type = #tpu.core_type<tc>} {
    %c0 = arith.constant 0 : index
    %c0_0 = arith.constant 0 : index
    %0 = vector.load %arg0[%c0, %c0_0] : memref<512x108xf32, #tpu.memory_space<vmem>>, vector<512x108xf32>
    %c0_1 = arith.constant 0 : index
    %c0_2 = arith.constant 0 : index
    %1 = vector.load %arg1[%c0_1, %c0_2] : memref<108x16xf32, #tpu.memory_space<vmem>>, vector<108x16xf32>
    %cst = arith.constant dense<0.000000e+00> : vector<512x16xf32>
    %2 = tpu.matmul %0, %1, %cst {dimension_numbers = #tpu.dot_dimension_numbers<[1], [0], [0], [1], [0, 0, 1, 1], [], []>} : vector<512x108xf32>, vector<108x16xf32>, vector<512x16xf32> -> vector<512x16xf32>
    %cst_3 = arith.constant dense<0.000000e+00> : vector<16xf32>
    %3 = vector.multi_reduction <add>, %2, %cst_3 [0] : vector<512x16xf32> to vector<16xf32>
    %4 = vector.shape_cast %3 : vector<16xf32> to vector<1x16xf32>
    %5 = arith.mulf %2, %2 : vector<512x16xf32>
    %cst_4 = arith.constant dense<0.000000e+00> : vector<16xf32>
    %6 = vector.multi_reduction <add>, %5, %cst_4 [0] : vector<512x16xf32> to vector<16xf32>
    %7 = vector.shape_cast %6 : vector<16xf32> to vector<1x16xf32>
    %cst_5 = arith.constant 0.001953125 : f32
    %8 = vector.broadcast %cst_5 : f32 to vector<1x16xf32>
    %9 = arith.mulf %4, %8 : vector<1x16xf32>
    %cst_6 = arith.constant 0.001953125 : f32
    %10 = vector.broadcast %cst_6 : f32 to vector<1x16xf32>
    %11 = arith.mulf %7, %10 : vector<1x16xf32>
    %12 = arith.mulf %9, %9 : vector<1x16xf32>
    %13 = arith.subf %11, %12 : vector<1x16xf32>
    %c0_7 = arith.constant 0 : index
    %c0_8 = arith.constant 0 : index
    %14 = vector.load %arg2[%c0_7, %c0_8] : memref<1x16xf32, #tpu.memory_space<vmem>>, vector<1x16xf32>
    %cst_9 = arith.constant 9.99999974E-6 : f32
    %15 = vector.broadcast %cst_9 : f32 to vector<1x16xf32>
    %16 = arith.addf %13, %15 : vector<1x16xf32>
    %17 = math.rsqrt %16 : vector<1x16xf32>
    %18 = arith.mulf %14, %17 : vector<1x16xf32>
    %c0_10 = arith.constant 0 : index
    %c0_11 = arith.constant 0 : index
    %19 = vector.load %arg3[%c0_10, %c0_11] : memref<1x16xf32, #tpu.memory_space<vmem>>, vector<1x16xf32>
    %20 = arith.mulf %9, %18 : vector<1x16xf32>
    %21 = arith.subf %19, %20 : vector<1x16xf32>
    %22 = vector.broadcast %18 : vector<1x16xf32> to vector<512x16xf32>
    %23 = arith.mulf %2, %22 : vector<512x16xf32>
    %24 = vector.broadcast %21 : vector<1x16xf32> to vector<512x16xf32>
    %25 = arith.addf %23, %24 : vector<512x16xf32>
    %cst_12 = arith.constant 0.000000e+00 : f32
    %26 = vector.broadcast %cst_12 : f32 to vector<512x16xf32>
    %27 = arith.maximumf %25, %26 : vector<512x16xf32>
    %c0_13 = arith.constant 0 : index
    %c0_14 = arith.constant 0 : index
    %28 = vector.load %arg4[%c0_13, %c0_14] : memref<512x16xf32, #tpu.memory_space<vmem>>, vector<512x16xf32>
    tpu.vector_store %arg4[%c0_13, %c0_14], %27 {strides = array<i32>} : memref<512x16xf32, #tpu.memory_space<vmem>>, vector<512x16xf32>,
    return
  }
}

module attributes {stable_mosaic.version = 11 : i64} {
  func.func @matmul_bn_add_relu_kernel(%arg0: memref<512x108xf32, #tpu.memory_space<vmem>>, %arg1: memref<108x16xf32, #tpu.memory_space<vmem>>, %arg2: memref<1x16xf32, #tpu.memory_space<vmem>>, %arg3: memref<1x16xf32, #tpu.memory_space<vmem>>, %arg4: memref<512x16xf32, #tpu.memory_space<vmem>>, %arg5: memref<512x16xf32, #tpu.memory_space<vmem>>) attributes {dimension_semantics = [], scalar_prefetch = 0 : i64, scratch_operands = 0 : i64, tpu.core_type = #tpu.core_type<tc>} {
    %c0 = arith.constant 0 : index
    %c0_0 = arith.constant 0 : index
    %0 = vector.load %arg0[%c0, %c0_0] : memref<512x108xf32, #tpu.memory_space<vmem>>, vector<512x108xf32>
    %c0_1 = arith.constant 0 : index
    %c0_2 = arith.constant 0 : index
    %1 = vector.load %arg1[%c0_1, %c0_2] : memref<108x16xf32, #tpu.memory_space<vmem>>, vector<108x16xf32>
    %cst = arith.constant dense<0.000000e+00> : vector<512x16xf32>
    %2 = tpu.matmul %0, %1, %cst {dimension_numbers = #tpu.dot_dimension_numbers<[1], [0], [0], [1], [0, 0, 1, 1], [], []>} : vector<512x108xf32>, vector<108x16xf32>, vector<512x16xf32> -> vector<512x16xf32>
    %cst_3 = arith.constant dense<0.000000e+00> : vector<16xf32>
    %3 = vector.multi_reduction <add>, %2, %cst_3 [0] : vector<512x16xf32> to vector<16xf32>
    %4 = vector.shape_cast %3 : vector<16xf32> to vector<1x16xf32>
    %5 = arith.mulf %2, %2 : vector<512x16xf32>
    %cst_4 = arith.constant dense<0.000000e+00> : vector<16xf32>
    %6 = vector.multi_reduction <add>, %5, %cst_4 [0] : vector<512x16xf32> to vector<16xf32>
    %7 = vector.shape_cast %6 : vector<16xf32> to vector<1x16xf32>
    %cst_5 = arith.constant 0.001953125 : f32
    %8 = vector.broadcast %cst_5 : f32 to vector<1x16xf32>
    %9 = arith.mulf %4, %8 : vector<1x16xf32>
    %cst_6 = arith.constant 0.001953125 : f32
    %10 = vector.broadcast %cst_6 : f32 to vector<1x16xf32>
    %11 = arith.mulf %7, %10 : vector<1x16xf32>
    %12 = arith.mulf %9, %9 : vector<1x16xf32>
    %13 = arith.subf %11, %12 : vector<1x16xf32>
    %c0_7 = arith.constant 0 : index
    %c0_8 = arith.constant 0 : index
    %14 = vector.load %arg2[%c0_7, %c0_8] : memref<1x16xf32, #tpu.memory_space<vmem>>, vector<1x16xf32>
    %cst_9 = arith.constant 9.99999974E-6 : f32
    %15 = vector.broadcast %cst_9 : f32 to vector<1x16xf32>
    %16 = arith.addf %13, %15 : vector<1x16xf32>
    %17 = math.rsqrt %16 : vector<1x16xf32>
    %18 = arith.mulf %14, %17 : vector<1x16xf32>
    %c0_10 = arith.constant 0 : index
    %c0_11 = arith.constant 0 : index
    %19 = vector.load %arg3[%c0_10, %c0_11] : memref<1x16xf32, #tpu.memory_space<vmem>>, vector<1x16xf32>
    %20 = arith.mulf %9, %18 : vector<1x16xf32>
    %21 = arith.subf %19, %20 : vector<1x16xf32>
    %c0_12 = arith.constant 0 : index
    %c0_13 = arith.constant 0 : index
    %22 = vector.load %arg4[%c0_12, %c0_13] : memref<512x16xf32, #tpu.memory_space<vmem>>, vector<512x16xf32>
    %23 = vector.broadcast %18 : vector<1x16xf32> to vector<512x16xf32>
    %24 = arith.mulf %2, %23 : vector<512x16xf32>
    %25 = arith.addf %22, %24 : vector<512x16xf32>
    %26 = vector.broadcast %21 : vector<1x16xf32> to vector<512x16xf32>
    %27 = arith.addf %25, %26 : vector<512x16xf32>
    %cst_14 = arith.constant 0.000000e+00 : f32
    %28 = vector.broadcast %cst_14 : f32 to vector<512x16xf32>
    %29 = arith.maximumf %27, %28 : vector<512x16xf32>
    %c0_15 = arith.constant 0 : index
    %c0_16 = arith.constant 0 : index
    %30 = vector.load %arg5[%c0_15, %c0_16] : memref<512x16xf32, #tpu.memory_space<vmem>>, vector<512x16xf32>
    tpu.vector_store %arg5[%c0_15, %c0_16], %29 {strides = array<i32>} : memref<512x16xf32, #tpu.memory_space<vmem>>, vector<512x16xf32>,
    return
  }
}

</mosaic_0001>

<bundles_post_ra>
// kernel: st_res_block_forward.4
= control target key start
LH: loop header
LB: loop body
LE: loop exit
PB: predicated region body
PF: predicated region fallthrough
CT: control target
= control target key end

     0   :  { %v1467_v0 = vmov 0.0|0.0   ;;  %vm163_vm0 = vcmask 130048   ;;  %vm741_vm1 = vcmask 293888   ;;  %s3319_s1 = inlined_call_operand.vmem [shape: f32[144,36], index: 1, kind: input, shape index: {}]   ;;  %s3320_s0 = inlined_call_operand.vmem [shape: f32[512,144], index: 0, kind: input, shape index: {}]   ;;  %s3321_s2 = inlined_call_operand.vmem [shape: f32[1,36], index: 2, kind: input, shape index: {}]   ;;  %s3322_s3 = inlined_call_operand.vmem [shape: f32[1,36], index: 3, kind: input, shape index: {}]   ;;  %s3323_s4 = inlined_call_operand.vmem [shape: f32[512,36], index: 4, kind: output, shape index: {}]  }
   0x1   :  { %1419 = vmatprep.subr.bf16.mxu0 %v1467_v0  ;;  %v145_v1 = vld [vmem:[%s3319_s1] sm:$0xff]  ;;  %v146_v2 = vld [vmem:[%s3319_s1 + $0x8] sm:$0xff]  ;;  %v147_v3 = vld [vmem:[%s3319_s1 + $0x10] sm:$0xff]  ;;  %1446 = vmatprep.subr.bf16.mxu1 %v1467_v0 }
   0x2   :  { %v1420_v4 = vpack.c.bf16 %v146_v2, %v145_v1  ;;  %v148_v5 = vld [vmem:[%s3319_s1 + $0x18] sm:$0xff]  ;;  %v149_v7 = vld [vmem:[%s3319_s1 + $0x20] sm:$0xff]  ;;  %v150_v8 = vld [vmem:[%s3319_s1 + $0x28] sm:$0xff] }
   0x3   :  { %v1423_v6 = vpack.c.bf16 %v148_v5, %v147_v3  ;;  %v18_v9 = vld [vmem:[%s3320_s0 + $0x8] sm:$0xff]  ;;  %v1426_v10 = vpack.c.bf16 %v150_v8, %v149_v7  ;;  %v151_v11 = vld [vmem:[%s3319_s1 + $0x30] sm:$0xff]  ;;  %v152_v12 = vld [vmem:[%s3319_s1 + $0x38] sm:$0xff] }
   0x4   :  { %1421 = vmatpush1.bf16.msra.mxu0 %v1420_v4  ;;  %1455 = vmatpush1.bf16.msra.mxu1 %v1420_v4  ;;  %v1429_v13 = vpack.c.bf16 %v152_v12, %v151_v11  ;;  %v153_v14 = vld [vmem:[%s3319_s1 + $0x40] sm:$0xff]  ;;  %v154_v15 = vld [vmem:[%s3319_s1 + $0x48] sm:$0xff]  ;;  %v155_v17 = vld [vmem:[%s3319_s1 + $0x50] sm:$0xff] }
   0x5   :  { %1422 = vmatprep.subr.bf16.mxu0 %v1467_v0  ;;  %1447 = vmatprep.subr.bf16.mxu1 %v1467_v0  ;;  %v1432_v16 = vpack.c.bf16 %v154_v15, %v153_v14  ;;  %v156_v18 = vld [vmem:[%s3319_s1 + $0x58] sm:$0xff]  ;;  %v82_v19 = vld [vmem:[%s3320_s0 + $0x208] sm:$0xff]  ;;  %v157_v21 = vld [vmem:[%s3319_s1 + $0x60] sm:$0xff] }
   0x6   :  { %1355 = vmatprep.mubr.msk.f32.mxu0 %vm163_vm0, %v18_v9  ;;  %1387 = vmatprep.mubr.msk.f32.mxu1 %vm163_vm0, %v82_v19  ;;  %v1435_v20 = vpack.c.bf16 %v156_v18, %v155_v17  ;;  %v158_v22 = vld [vmem:[%s3319_s1 + $0x68] sm:$0xff]  ;;  %v159_v24 = vld [vmem:[%s3319_s1 + $0x70] sm:$0xff]  ;;  %v160_v25 = vld [vmem:[%s3319_s1 + $0x78] sm:$0xff] }
   0x7   :  { %v1438_v23 = vpack.c.bf16 %v158_v22, %v157_v21  ;;  %v1441_v26 = vpack.c.bf16 %v160_v25, %v159_v24  ;;  %v161_v27 = vld [vmem:[%s3319_s1 + $0x80] sm:$0xff]  ;;  %v162_v28 = vld [vmem:[%s3319_s1 + $0x88] sm:$0xff]  ;;  %v20_v31 = vld [vmem:[%s3320_s0 + $0x18] sm:$0xff] }
   0x8   :  { %1424 = vmatpush1.bf16.msra.mxu0 %v1423_v6  ;;  %1456 = vmatpush1.bf16.msra.mxu1 %v1423_v6  ;;  %v1444_v29 = vpack.c.bf16 %v162_v28, %v161_v27  ;;  %v17_v30 = vld [vmem:[%s3320_s0] sm:$0xff]  ;;  %v84_v33 = vld [vmem:[%s3320_s0 + $0x218] sm:$0xff]  ;;  %v19_v34 = vld [vmem:[%s3320_s0 + $0x10] sm:$0xff] }
   0x9   :  { %1425 = vmatprep.subr.bf16.mxu0 %v1467_v0  ;;  %1448 = vmatprep.subr.bf16.mxu1 %v1467_v0  ;;  %v81_v32 = vld [vmem:[%s3320_s0 + $0x200] sm:$0xff]  ;;  %v22_v35 = vld [vmem:[%s3320_s0 + $0x28] sm:$0xff]  ;;  %v83_v36 = vld [vmem:[%s3320_s0 + $0x210] sm:$0xff] }
   0xa   :  { %v86_v37 = vld [vmem:[%s3320_s0 + $0x228] sm:$0xff]  ;;  %v21_v38 = vld [vmem:[%s3320_s0 + $0x20] sm:$0xff]  ;;  %v24_v39 = vld [vmem:[%s3320_s0 + $0x38] sm:$0xff] }
   0xb   :  { %v85_v40 = vld [vmem:[%s3320_s0 + $0x220] sm:$0xff]  ;;  %v88_v41 = vld [vmem:[%s3320_s0 + $0x238] sm:$0xff]  ;;  %v23_v42 = vld [vmem:[%s3320_s0 + $0x30] sm:$0xff] }
   0xc   :  { %1427 = vmatpush1.bf16.msra.mxu0 %v1426_v10  ;;  %1457 = vmatpush1.bf16.msra.mxu1 %v1426_v10  ;;  %v26_v43 = vld [vmem:[%s3320_s0 + $0x48] sm:$0xff]  ;;  %v87_v44 = vld [vmem:[%s3320_s0 + $0x230] sm:$0xff]  ;;  %v25_v46 = vld [vmem:[%s3320_s0 + $0x40] sm:$0xff] }
   0xd   :  { %1428 = vmatprep.subr.bf16.mxu0 %v1467_v0  ;;  %1449 = vmatprep.subr.bf16.mxu1 %v1467_v0  ;;  %v90_v45 = vld [vmem:[%s3320_s0 + $0x248] sm:$0xff]  ;;  %v28_v47 = vld [vmem:[%s3320_s0 + $0x58] sm:$0xff]  ;;  %v89_v48 = vld [vmem:[%s3320_s0 + $0x240] sm:$0xff] }
   0xe   :  { %v92_v49 = vld [vmem:[%s3320_s0 + $0x258] sm:$0xff]  ;;  %v27_v50 = vld [vmem:[%s3320_s0 + $0x50] sm:$0xff]  ;;  %v30_v51 = vld [vmem:[%s3320_s0 + $0x68] sm:$0xff] }
   0xf   :  { %v91_v52 = vld [vmem:[%s3320_s0 + $0x250] sm:$0xff]  ;;  %v94_v53 = vld [vmem:[%s3320_s0 + $0x268] sm:$0xff]  ;;  %v29_v54 = vld [vmem:[%s3320_s0 + $0x60] sm:$0xff] }
  0x10   :  { %1430 = vmatpush1.bf16.msra.mxu0 %v1429_v13  ;;  %1458 = vmatpush1.bf16.msra.mxu1 %v1429_v13  ;;  %v32_v55 = vld [vmem:[%s3320_s0 + $0x78] sm:$0xff]  ;;  %v93_v56 = vld [vmem:[%s3320_s0 + $0x260] sm:$0xff]  ;;  %v31_v58 = vld [vmem:[%s3320_s0 + $0x70] sm:$0xff] }
  0x11   :  { %1431 = vmatprep.subr.bf16.mxu0 %v1467_v0  ;;  %1450 = vmatprep.subr.bf16.mxu1 %v1467_v0  ;;  %v96_v57 = vld [vmem:[%s3320_s0 + $0x278] sm:$0xff]  ;;  %v34_v59 = vld [vmem:[%s3320_s0 + $0x88] sm:$0xff]  ;;  %v95_v60 = vld [vmem:[%s3320_s0 + $0x270] sm:$0xff] }
  0x12   :  { %v98_v61 = vld [vmem:[%s3320_s0 + $0x288] sm:$0xff]  ;;  %v33_v62 = vld [vmem:[%s3320_s0 + $0x80] sm:$0xff]  ;;  %v36_v63 = vld [vmem:[%s3320_s0 + $0x98] sm:$0xff] }
  0x13   :  { %v100_v1 = vld [vmem:[%s3320_s0 + $0x298] sm:$0xff]  ;;  %v35_v2 = vld [vmem:[%s3320_s0 + $0x90] sm:$0xff]  ;;  %v38_v3 = vld [vmem:[%s3320_s0 + $0xa8] sm:$0xff] }
  0x14   :  { %1433 = vmatpush1.bf16.msra.mxu0 %v1432_v16  ;;  %1459 = vmatpush1.bf16.msra.mxu1 %v1432_v16  ;;  %v99_v4 = vld [vmem:[%s3320_s0 + $0x290] sm:$0xff]  ;;  %v102_v5 = vld [vmem:[%s3320_s0 + $0x2a8] sm:$0xff]  ;;  %v37_v6 = vld [vmem:[%s3320_s0 + $0xa0] sm:$0xff] }
  0x15   :  { %1434 = vmatprep.subr.bf16.mxu0 %v1467_v0  ;;  %1451 = vmatprep.subr.bf16.mxu1 %v1467_v0  ;;  %v40_v7 = vld [vmem:[%s3320_s0 + $0xb8] sm:$0xff]  ;;  %v101_v8 = vld [vmem:[%s3320_s0 + $0x2a0] sm:$0xff]  ;;  %v39_v10 = vld [vmem:[%s3320_s0 + $0xb0] sm:$0xff] }
  0x16   :  { %v104_v9 = vld [vmem:[%s3320_s0 + $0x2b8] sm:$0xff]  ;;  %v42_v11 = vld [vmem:[%s3320_s0 + $0xc8] sm:$0xff]  ;;  %v103_v12 = vld [vmem:[%s3320_s0 + $0x2b0] sm:$0xff] }
  0x17   :  { %v106_v13 = vld [vmem:[%s3320_s0 + $0x2c8] sm:$0xff]  ;;  %v41_v14 = vld [vmem:[%s3320_s0 + $0xc0] sm:$0xff]  ;;  %v44_v15 = vld [vmem:[%s3320_s0 + $0xd8] sm:$0xff] }
  0x18   :  { %1436 = vmatpush1.bf16.msra.mxu0 %v1435_v20  ;;  %1460 = vmatpush1.bf16.msra.mxu1 %v1435_v20  ;;  %v105_v16 = vld [vmem:[%s3320_s0 + $0x2c0] sm:$0xff]  ;;  %v108_v17 = vld [vmem:[%s3320_s0 + $0x2d8] sm:$0xff]  ;;  %v43_v18 = vld [vmem:[%s3320_s0 + $0xd0] sm:$0xff] }
  0x19   :  { %1437 = vmatprep.subr.bf16.mxu0 %v1467_v0  ;;  %1452 = vmatprep.subr.bf16.mxu1 %v1467_v0  ;;  %v46_v19 = vld [vmem:[%s3320_s0 + $0xe8] sm:$0xff]  ;;  %v107_v20 = vld [vmem:[%s3320_s0 + $0x2d0] sm:$0xff]  ;;  %v45_v22 = vld [vmem:[%s3320_s0 + $0xe0] sm:$0xff] }
  0x1a   :  { %v110_v21 = vld [vmem:[%s3320_s0 + $0x2e8] sm:$0xff]  ;;  %v109_v24 = vld [vmem:[%s3320_s0 + $0x2e0] sm:$0xff]  ;;  %v112_v25 = vld [vmem:[%s3320_s0 + $0x2f8] sm:$0xff] }
  0x1b   :  { %v50_v27 = vld [vmem:[%s3320_s0 + $0x108] sm:$0xff]  ;;  %v111_v28 = vld [vmem:[%s3320_s0 + $0x2f0] sm:$0xff] }
  0x1c   :  { %1439 = vmatpush1.bf16.msra.mxu0 %v1438_v23  ;;  %1461 = vmatpush1.bf16.msra.mxu1 %v1438_v23  ;;  %v48_v23 = vld [vmem:[%s3320_s0 + $0xf8] sm:$0xff] }
  0x1d   :  { %1440 = vmatprep.subr.bf16.mxu0 %v1467_v0  ;;  %1453 = vmatprep.subr.bf16.mxu1 %v1467_v0 }
  0x20   :  { %1442 = vmatpush1.bf16.msra.mxu0 %v1441_v26  ;;  %1462 = vmatpush1.bf16.msra.mxu1 %v1441_v26  ;;  %v47_v26 = vld [vmem:[%s3320_s0 + $0xf0] sm:$0xff] }
  0x21   :  { %1443 = vmatprep.subr.bf16.mxu0 %v1467_v0  ;;  %1454 = vmatprep.subr.bf16.mxu1 %v1467_v0  ;;  %v97_v0 = vld [vmem:[%s3320_s0 + $0x280] sm:$0xff] }
  0x24   :  { %1445 = vmatpush1.bf16.msra.mxu0 %v1444_v29  ;;  %1463 = vmatpush1.bf16.msra.mxu1 %v1444_v29  ;;  %v114_v29 = vld [vmem:[%s3320_s0 + $0x308] sm:$0xff] }
  0x27   :  { %421 = vmatmul.mubr.f32.vlgmr.msra.gmra.mrb[0].mxu0 %v17_v30  ;;  %581 = vmatmul.mubr.f32.vlgmr.msra.gmra.mrb[0].mxu1 %v81_v32  ;;  %v49_v30 = vld [vmem:[%s3320_s0 + $0x100] sm:$0xff] }
  0x28   :  { %1356 = vmatprep.mubr.msk.f32.mxu0 %vm163_vm0, %v20_v31  ;;  %1388 = vmatprep.mubr.msk.f32.mxu1 %vm163_vm0, %v84_v33  ;;  %v52_v31 = vld [vmem:[%s3320_s0 + $0x118] sm:$0xff]  ;;  %v113_v32 = vld [vmem:[%s3320_s0 + $0x300] sm:$0xff] }
  0x29   :  { %v116_v33 = vld [vmem:[%s3320_s0 + $0x318] sm:$0xff] }
  0x2b   :  { %426 = vmatmul.mubr.f32.gmra.mrb[2].mxu0 %v19_v34  ;;  %586 = vmatmul.mubr.f32.gmra.mrb[2].mxu1 %v83_v36  ;;  %v51_v34 = vld [vmem:[%s3320_s0 + $0x110] sm:$0xff] }
  0x2c   :  { %1357 = vmatprep.mubr.msk.f32.mxu0 %vm163_vm0, %v22_v35  ;;  %1389 = vmatprep.mubr.msk.f32.mxu1 %vm163_vm0, %v86_v37  ;;  %v54_v35 = vld [vmem:[%s3320_s0 + $0x128] sm:$0xff]  ;;  %v115_v36 = vld [vmem:[%s3320_s0 + $0x310] sm:$0xff] }
  0x2d   :  { %v118_v37 = vld [vmem:[%s3320_s0 + $0x328] sm:$0xff] }
  0x2f   :  { %431 = vmatmul.mubr.f32.gmra.mrb[4].mxu0 %v21_v38  ;;  %591 = vmatmul.mubr.f32.gmra.mrb[4].mxu1 %v85_v40  ;;  %v53_v38 = vld [vmem:[%s3320_s0 + $0x120] sm:$0xff] }
  0x30   :  { %1358 = vmatprep.mubr.msk.f32.mxu0 %vm163_vm0, %v24_v39  ;;  %1390 = vmatprep.mubr.msk.f32.mxu1 %vm163_vm0, %v88_v41  ;;  %v56_v39 = vld [vmem:[%s3320_s0 + $0x138] sm:$0xff]  ;;  %v117_v40 = vld [vmem:[%s3320_s0 + $0x320] sm:$0xff] }
  0x31   :  { %v120_v41 = vld [vmem:[%s3320_s0 + $0x338] sm:$0xff] }
  0x33   :  { %436 = vmatmul.mubr.f32.gmra.mrb[6].mxu0 %v23_v42  ;;  %596 = vmatmul.mubr.f32.gmra.mrb[6].mxu1 %v87_v44  ;;  %v55_v42 = vld [vmem:[%s3320_s0 + $0x130] sm:$0xff] }
  0x34   :  { %1359 = vmatprep.mubr.msk.f32.mxu0 %vm163_vm0, %v26_v43  ;;  %1391 = vmatprep.mubr.msk.f32.mxu1 %vm163_vm0, %v90_v45  ;;  %v58_v43 = vld [vmem:[%s3320_s0 + $0x148] sm:$0xff]  ;;  %v119_v44 = vld [vmem:[%s3320_s0 + $0x330] sm:$0xff] }
  0x35   :  { %v122_v45 = vld [vmem:[%s3320_s0 + $0x348] sm:$0xff] }
  0x37   :  { %441 = vmatmul.mubr.f32.gmra.mrb[8].mxu0 %v25_v46  ;;  %601 = vmatmul.mubr.f32.gmra.mrb[8].mxu1 %v89_v48  ;;  %v57_v46 = vld [vmem:[%s3320_s0 + $0x140] sm:$0xff] }
  0x38   :  { %1360 = vmatprep.mubr.msk.f32.mxu0 %vm163_vm0, %v28_v47  ;;  %1392 = vmatprep.mubr.msk.f32.mxu1 %vm163_vm0, %v92_v49  ;;  %v60_v47 = vld [vmem:[%s3320_s0 + $0x158] sm:$0xff]  ;;  %v121_v48 = vld [vmem:[%s3320_s0 + $0x340] sm:$0xff] }
  0x39   :  { %v124_v49 = vld [vmem:[%s3320_s0 + $0x358] sm:$0xff] }
  0x3b   :  { %446 = vmatmul.mubr.f32.gmra.mrb[10].mxu0 %v27_v50  ;;  %606 = vmatmul.mubr.f32.gmra.mrb[10].mxu1 %v91_v52  ;;  %v59_v50 = vld [vmem:[%s3320_s0 + $0x150] sm:$0xff] }
  0x3c   :  { %1361 = vmatprep.mubr.msk.f32.mxu0 %vm163_vm0, %v30_v51  ;;  %1393 = vmatprep.mubr.msk.f32.mxu1 %vm163_vm0, %v94_v53  ;;  %v62_v51 = vld [vmem:[%s3320_s0 + $0x168] sm:$0xff]  ;;  %v123_v52 = vld [vmem:[%s3320_s0 + $0x350] sm:$0xff] }
  0x3d   :  { %v126_v53 = vld [vmem:[%s3320_s0 + $0x368] sm:$0xff] }
  0x3f   :  { %451 = vmatmul.mubr.f32.gmra.mrb[12].mxu0 %v29_v54  ;;  %611 = vmatmul.mubr.f32.gmra.mrb[12].mxu1 %v93_v56  ;;  %v61_v54 = vld [vmem:[%s3320_s0 + $0x160] sm:$0xff] }
  0x40   :  { %1362 = vmatprep.mubr.msk.f32.mxu0 %vm163_vm0, %v32_v55  ;;  %1394 = vmatprep.mubr.msk.f32.mxu1 %vm163_vm0, %v96_v57  ;;  %v64_v55 = vld [vmem:[%s3320_s0 + $0x178] sm:$0xff]  ;;  %v125_v56 = vld [vmem:[%s3320_s0 + $0x360] sm:$0xff] }
  0x41   :  { %v128_v57 = vld [vmem:[%s3320_s0 + $0x378] sm:$0xff] }
  0x43   :  { %456 = vmatmul.mubr.f32.gmra.mrb[14].mxu0 %v31_v58  ;;  %616 = vmatmul.mubr.f32.gmra.mrb[14].mxu1 %v95_v60  ;;  %v63_v58 = vld [vmem:[%s3320_s0 + $0x170] sm:$0xff] }
  0x44   :  { %1363 = vmatprep.mubr.msk.f32.mxu0 %vm163_vm0, %v34_v59  ;;  %1395 = vmatprep.mubr.msk.f32.mxu1 %vm163_vm0, %v98_v61  ;;  %v66_v59 = vld [vmem:[%s3320_s0 + $0x188] sm:$0xff]  ;;  %v127_v60 = vld [vmem:[%s3320_s0 + $0x370] sm:$0xff] }
  0x45   :  { %v130_v61 = vld [vmem:[%s3320_s0 + $0x388] sm:$0xff] }
  0x47   :  { %461 = vmatmul.mubr.f32.gmra.mrb[16].mxu0 %v33_v62  ;;  %621 = vmatmul.mubr.f32.gmra.mrb[16].mxu1 %v97_v0  ;;  %v65_v62 = vld [vmem:[%s3320_s0 + $0x180] sm:$0xff] }
  0x48   :  { %1364 = vmatprep.mubr.msk.f32.mxu0 %vm163_vm0, %v36_v63  ;;  %1396 = vmatprep.mubr.msk.f32.mxu1 %vm163_vm0, %v100_v1  ;;  %v68_v63 = vld [vmem:[%s3320_s0 + $0x198] sm:$0xff]  ;;  %v129_v0 = vld [vmem:[%s3320_s0 + $0x380] sm:$0xff] }
  0x49   :  { %v132_v1 = vld [vmem:[%s3320_s0 + $0x398] sm:$0xff] }
  0x4b   :  { %466 = vmatmul.mubr.f32.gmra.mrb[18].mxu0 %v35_v2  ;;  %626 = vmatmul.mubr.f32.gmra.mrb[18].mxu1 %v99_v4  ;;  %v67_v2 = vld [vmem:[%s3320_s0 + $0x190] sm:$0xff] }
  0x4c   :  { %1365 = vmatprep.mubr.msk.f32.mxu0 %vm163_vm0, %v38_v3  ;;  %1397 = vmatprep.mubr.msk.f32.mxu1 %vm163_vm0, %v102_v5  ;;  %v70_v3 = vld [vmem:[%s3320_s0 + $0x1a8] sm:$0xff]  ;;  %v131_v4 = vld [vmem:[%s3320_s0 + $0x390] sm:$0xff] }
  0x4d   :  { %v134_v5 = vld [vmem:[%s3320_s0 + $0x3a8] sm:$0xff] }
  0x4f   :  { %471 = vmatmul.mubr.f32.gmra.mrb[20].mxu0 %v37_v6  ;;  %631 = vmatmul.mubr.f32.gmra.mrb[20].mxu1 %v101_v8  ;;  %v69_v6 = vld [vmem:[%s3320_s0 + $0x1a0] sm:$0xff] }
  0x50   :  { %1366 = vmatprep.mubr.msk.f32.mxu0 %vm163_vm0, %v40_v7  ;;  %1398 = vmatprep.mubr.msk.f32.mxu1 %vm163_vm0, %v104_v9  ;;  %v72_v7 = vld [vmem:[%s3320_s0 + $0x1b8] sm:$0xff]  ;;  %v133_v8 = vld [vmem:[%s3320_s0 + $0x3a0] sm:$0xff] }
  0x51   :  { %v136_v9 = vld [vmem:[%s3320_s0 + $0x3b8] sm:$0xff] }
  0x53   :  { %476 = vmatmul.mubr.f32.gmra.mrb[22].mxu0 %v39_v10  ;;  %636 = vmatmul.mubr.f32.gmra.mrb[22].mxu1 %v103_v12  ;;  %v71_v10 = vld [vmem:[%s3320_s0 + $0x1b0] sm:$0xff] }
  0x54   :  { %1367 = vmatprep.mubr.msk.f32.mxu0 %vm163_vm0, %v42_v11  ;;  %1399 = vmatprep.mubr.msk.f32.mxu1 %vm163_vm0, %v106_v13  ;;  %v74_v11 = vld [vmem:[%s3320_s0 + $0x1c8] sm:$0xff]  ;;  %v135_v12 = vld [vmem:[%s3320_s0 + $0x3b0] sm:$0xff] }
  0x55   :  { %v138_v13 = vld [vmem:[%s3320_s0 + $0x3c8] sm:$0xff] }
  0x57   :  { %481 = vmatmul.mubr.f32.gmra.mrb[24].mxu0 %v41_v14  ;;  %641 = vmatmul.mubr.f32.gmra.mrb[24].mxu1 %v105_v16  ;;  %v73_v14 = vld [vmem:[%s3320_s0 + $0x1c0] sm:$0xff] }
  0x58   :  { %1368 = vmatprep.mubr.msk.f32.mxu0 %vm163_vm0, %v44_v15  ;;  %1400 = vmatprep.mubr.msk.f32.mxu1 %vm163_vm0, %v108_v17  ;;  %v76_v15 = vld [vmem:[%s3320_s0 + $0x1d8] sm:$0xff]  ;;  %v137_v16 = vld [vmem:[%s3320_s0 + $0x3c0] sm:$0xff] }
  0x59   :  { %v140_v17 = vld [vmem:[%s3320_s0 + $0x3d8] sm:$0xff] }
  0x5b   :  { %486 = vmatmul.mubr.f32.gmra.mrb[26].mxu0 %v43_v18  ;;  %646 = vmatmul.mubr.f32.gmra.mrb[26].mxu1 %v107_v20  ;;  %v75_v18 = vld [vmem:[%s3320_s0 + $0x1d0] sm:$0xff] }
  0x5c   :  { %1369 = vmatprep.mubr.msk.f32.mxu0 %vm163_vm0, %v46_v19  ;;  %1401 = vmatprep.mubr.msk.f32.mxu1 %vm163_vm0, %v110_v21  ;;  %v78_v19 = vld [vmem:[%s3320_s0 + $0x1e8] sm:$0xff]  ;;  %v139_v20 = vld [vmem:[%s3320_s0 + $0x3d0] sm:$0xff] }
  0x5d   :  { %v142_v21 = vld [vmem:[%s3320_s0 + $0x3e8] sm:$0xff] }
  0x5f   :  { %491 = vmatmul.mubr.f32.gmra.mrb[28].mxu0 %v45_v22  ;;  %651 = vmatmul.mubr.f32.gmra.mrb[28].mxu1 %v109_v24  ;;  %v77_v22 = vld [vmem:[%s3320_s0 + $0x1e0] sm:$0xff] }
  0x60   :  { %1370 = vmatprep.mubr.msk.f32.mxu0 %vm163_vm0, %v48_v23  ;;  %1402 = vmatprep.mubr.msk.f32.mxu1 %vm163_vm0, %v112_v25  ;;  %v80_v23 = vld [vmem:[%s3320_s0 + $0x1f8] sm:$0xff]  ;;  %v141_v24 = vld [vmem:[%s3320_s0 + $0x3e0] sm:$0xff] }
  0x61   :  { %v144_v25 = vld [vmem:[%s3320_s0 + $0x3f8] sm:$0xff] }
  0x63   :  { %496 = vmatmul.mubr.f32.gmra.mrb[30].mxu0 %v47_v26  ;;  %656 = vmatmul.mubr.f32.gmra.mrb[30].mxu1 %v111_v28  ;;  %v79_v26 = vld [vmem:[%s3320_s0 + $0x1f0] sm:$0xff] }
  0x64   :  { %1371 = vmatprep.mubr.msk.f32.mxu0 %vm163_vm0, %v50_v27  ;;  %1403 = vmatprep.mubr.msk.f32.mxu1 %vm163_vm0, %v114_v29  ;;  %v143_v27 = vld [vmem:[%s3320_s0 + $0x3f0] sm:$0xff] }
  0x67   :  { %501 = vmatmul.mubr.f32.gmra.mrb[32].mxu0 %v49_v30  ;;  %661 = vmatmul.mubr.f32.gmra.mrb[32].mxu1 %v113_v32 }
  0x68   :  { %1372 = vmatprep.mubr.msk.f32.mxu0 %vm163_vm0, %v52_v31  ;;  %1404 = vmatprep.mubr.msk.f32.mxu1 %vm163_vm0, %v116_v33 }
  0x6b   :  { %506 = vmatmul.mubr.f32.gmra.mrb[34].mxu0 %v51_v34  ;;  %666 = vmatmul.mubr.f32.gmra.mrb[34].mxu1 %v115_v36 }
  0x6c   :  { %1373 = vmatprep.mubr.msk.f32.mxu0 %vm163_vm0, %v54_v35  ;;  %1405 = vmatprep.mubr.msk.f32.mxu1 %vm163_vm0, %v118_v37 }
  0x6f   :  { %511 = vmatmul.mubr.f32.gmra.mrb[36].mxu0 %v53_v38  ;;  %671 = vmatmul.mubr.f32.gmra.mrb[36].mxu1 %v117_v40 }
  0x70   :  { %1374 = vmatprep.mubr.msk.f32.mxu0 %vm163_vm0, %v56_v39  ;;  %1406 = vmatprep.mubr.msk.f32.mxu1 %vm163_vm0, %v120_v41 }
  0x73   :  { %516 = vmatmul.mubr.f32.gmra.mrb[38].mxu0 %v55_v42  ;;  %676 = vmatmul.mubr.f32.gmra.mrb[38].mxu1 %v119_v44 }
  0x74   :  { %1375 = vmatprep.mubr.msk.f32.mxu0 %vm163_vm0, %v58_v43  ;;  %1407 = vmatprep.mubr.msk.f32.mxu1 %vm163_vm0, %v122_v45 }
  0x77   :  { %521 = vmatmul.mubr.f32.gmra.mrb[40].mxu0 %v57_v46  ;;  %681 = vmatmul.mubr.f32.gmra.mrb[40].mxu1 %v121_v48 }
  0x78   :  { %1376 = vmatprep.mubr.msk.f32.mxu0 %vm163_vm0, %v60_v47  ;;  %1408 = vmatprep.mubr.msk.f32.mxu1 %vm163_vm0, %v124_v49 }
  0x7b   :  { %526 = vmatmul.mubr.f32.gmra.mrb[42].mxu0 %v59_v50  ;;  %686 = vmatmul.mubr.f32.gmra.mrb[42].mxu1 %v123_v52 }
  0x7c   :  { %1377 = vmatprep.mubr.msk.f32.mxu0 %vm163_vm0, %v62_v51  ;;  %1409 = vmatprep.mubr.msk.f32.mxu1 %vm163_vm0, %v126_v53 }
  0x7f   :  { %531 = vmatmul.mubr.f32.gmra.mrb[44].mxu0 %v61_v54  ;;  %691 = vmatmul.mubr.f32.gmra.mrb[44].mxu1 %v125_v56 }
  0x80   :  { %1378 = vmatprep.mubr.msk.f32.mxu0 %vm163_vm0, %v64_v55  ;;  %1410 = vmatprep.mubr.msk.f32.mxu1 %vm163_vm0, %v128_v57 }
  0x83   :  { %536 = vmatmul.mubr.f32.gmra.mrb[46].mxu0 %v63_v58  ;;  %696 = vmatmul.mubr.f32.gmra.mrb[46].mxu1 %v127_v60 }
  0x84   :  { %1379 = vmatprep.mubr.msk.f32.mxu0 %vm163_vm0, %v66_v59  ;;  %1411 = vmatprep.mubr.msk.f32.mxu1 %vm163_vm0, %v130_v61 }
  0x87   :  { %541 = vmatmul.mubr.f32.gmra.mrb[48].mxu0 %v65_v62  ;;  %701 = vmatmul.mubr.f32.gmra.mrb[48].mxu1 %v129_v0 }
  0x88   :  { %1380 = vmatprep.mubr.msk.f32.mxu0 %vm163_vm0, %v68_v63  ;;  %1412 = vmatprep.mubr.msk.f32.mxu1 %vm163_vm0, %v132_v1 }
  0x8b   :  { %546 = vmatmul.mubr.f32.gmra.mrb[50].mxu0 %v67_v2  ;;  %706 = vmatmul.mubr.f32.gmra.mrb[50].mxu1 %v131_v4 }
  0x8c   :  { %1381 = vmatprep.mubr.msk.f32.mxu0 %vm163_vm0, %v70_v3  ;;  %1413 = vmatprep.mubr.msk.f32.mxu1 %vm163_vm0, %v134_v5 }
  0x8f   :  { %551 = vmatmul.mubr.f32.gmra.mrb[52].mxu0 %v69_v6  ;;  %711 = vmatmul.mubr.f32.gmra.mrb[52].mxu1 %v133_v8 }
  0x90   :  { %1382 = vmatprep.mubr.msk.f32.mxu0 %vm163_vm0, %v72_v7  ;;  %1414 = vmatprep.mubr.msk.f32.mxu1 %vm163_vm0, %v136_v9 }
  0x93   :  { %556 = vmatmul.mubr.f32.gmra.mrb[54].mxu0 %v71_v10  ;;  %716 = vmatmul.mubr.f32.gmra.mrb[54].mxu1 %v135_v12 }
  0x94   :  { %1383 = vmatprep.mubr.msk.f32.mxu0 %vm163_vm0, %v74_v11  ;;  %1415 = vmatprep.mubr.msk.f32.mxu1 %vm163_vm0, %v138_v13 }
  0x97   :  { %561 = vmatmul.mubr.f32.gmra.mrb[56].mxu0 %v73_v14  ;;  %721 = vmatmul.mubr.f32.gmra.mrb[56].mxu1 %v137_v16 }
  0x98   :  { %1384 = vmatprep.mubr.msk.f32.mxu0 %vm163_vm0, %v76_v15  ;;  %1416 = vmatprep.mubr.msk.f32.mxu1 %vm163_vm0, %v140_v17 }
  0x9b   :  { %566 = vmatmul.mubr.f32.gmra.mrb[58].mxu0 %v75_v18  ;;  %726 = vmatmul.mubr.f32.gmra.mrb[58].mxu1 %v139_v20 }
  0x9c   :  { %1385 = vmatprep.mubr.msk.f32.mxu0 %vm163_vm0, %v78_v19  ;;  %1417 = vmatprep.mubr.msk.f32.mxu1 %vm163_vm0, %v142_v21 }
  0x9f   :  { %571 = vmatmul.mubr.f32.gmra.mrb[60].mxu0 %v77_v22  ;;  %731 = vmatmul.mubr.f32.gmra.mrb[60].mxu1 %v141_v24 }
  0xa0   :  { %1386 = vmatprep.mubr.msk.f32.mxu0 %vm163_vm0, %v80_v23  ;;  %1418 = vmatprep.mubr.msk.f32.mxu1 %vm163_vm0, %v144_v25 }
  0xa3   :  { %576 = vmatmul.mubr.f32.gmra.mrb[62].mxu0 %v79_v26  ;;  %736 = vmatmul.mubr.f32.gmra.mrb[62].mxu1 %v143_v27 }
  0xfa   :  { %v2013_v28 = vpop.f32.mrb[0].mxu0  ;;  %v2015_v30 = vpop.f32.mrb[0].mxu1 }
  0xfb   :  { %v424_v29 = vpop.f32.mrb[1].mxu0  ;;  %3350 = vst [vmem:[#allocation2_spill] sm:$0xff] %v2015_v30  ;;  %v584_v31 = vpop.f32.mrb[1].mxu1  ;;  %v875_v32 = vmul.f32 %v2013_v28, %v2013_v28  ;;  %v742_v34 = vsel %vm741_vm1, %v2013_v28, 0.0 }
  0xfd   :  { %v939_v41 = vsel %vm741_vm1, %v875_v32, 0.0 }
  0xfe   :  { %v2019_v33 = vpop.f32.mrb[2].mxu0  ;;  %v2027_v38 = vpop.f32.mrb[2].mxu1 }
  0xff   :  { %v743_v35 = vsel %vm741_vm1, %v2019_v33, 0.0  ;;  %v876_v36 = vmul.f32 %v2019_v33, %v2019_v33  ;;  %v429_v37 = vpop.f32.mrb[3].mxu0  ;;  %v589_v40 = vpop.f32.mrb[3].mxu1 }
 0x100   :  { %v744_v39 = vadd.f32 %v743_v35, %v742_v34 }
 0x101   :  { %v940_v42 = vsel %vm741_vm1, %v876_v36, 0.0 }
 0x102   :  { %v941_v43 = vadd.f32 %v940_v42, %v939_v41  ;;  %v2031_v44 = vpop.f32.mrb[4].mxu0  ;;  %v2037_v48 = vpop.f32.mrb[4].mxu1 }
 0x103   :  { %v745_v45 = vsel %vm741_vm1, %v2031_v44, 0.0  ;;  %v877_v46 = vmul.f32 %v2031_v44, %v2031_v44  ;;  %v434_v47 = vpop.f32.mrb[5].mxu0  ;;  %v594_v50 = vpop.f32.mrb[5].mxu1 }
 0x104   :  { %v746_v49 = vadd.f32 %v745_v45, %v744_v39 }
 0x105   :  { %v942_v51 = vsel %vm741_vm1, %v877_v46, 0.0 }
 0x106   :  { %v943_v52 = vadd.f32 %v942_v51, %v941_v43  ;;  %v2040_v53 = vpop.f32.mrb[6].mxu0  ;;  %v2046_v57 = vpop.f32.mrb[6].mxu1 }
 0x107   :  { %v747_v54 = vsel %vm741_vm1, %v2040_v53, 0.0  ;;  %v878_v55 = vmul.f32 %v2040_v53, %v2040_v53  ;;  %v439_v56 = vpop.f32.mrb[7].mxu0  ;;  %v599_v59 = vpop.f32.mrb[7].mxu1 }
 0x108   :  { %v748_v58 = vadd.f32 %v747_v54, %v746_v49 }
 0x109   :  { %v944_v60 = vsel %vm741_vm1, %v878_v55, 0.0 }
 0x10a   :  { %v945_v61 = vadd.f32 %v944_v60, %v943_v52  ;;  %v2049_v62 = vpop.f32.mrb[8].mxu0  ;;  %v2055_v2 = vpop.f32.mrb[8].mxu1 }
 0x10b   :  { %v749_v63 = vsel %vm741_vm1, %v2049_v62, 0.0  ;;  %v879_v0 = vmul.f32 %v2049_v62, %v2049_v62  ;;  %v444_v1 = vpop.f32.mrb[9].mxu0  ;;  %v604_v4 = vpop.f32.mrb[9].mxu1 }
 0x10c   :  { %v750_v3 = vadd.f32 %v749_v63, %v748_v58 }
 0x10d   :  { %v946_v5 = vsel %vm741_vm1, %v879_v0, 0.0 }
 0x10e   :  { %v947_v6 = vadd.f32 %v946_v5, %v945_v61  ;;  %v2058_v7 = vpop.f32.mrb[10].mxu0  ;;  %v2064_v11 = vpop.f32.mrb[10].mxu1 }
 0x10f   :  { %v751_v8 = vsel %vm741_vm1, %v2058_v7, 0.0  ;;  %v880_v9 = vmul.f32 %v2058_v7, %v2058_v7  ;;  %v449_v10 = vpop.f32.mrb[11].mxu0  ;;  %v609_v13 = vpop.f32.mrb[11].mxu1 }
 0x110   :  { %v752_v12 = vadd.f32 %v751_v8, %v750_v3 }
 0x111   :  { %v948_v14 = vsel %vm741_vm1, %v880_v9, 0.0 }
 0x112   :  { %v949_v15 = vadd.f32 %v948_v14, %v947_v6  ;;  %v2067_v16 = vpop.f32.mrb[12].mxu0  ;;  %v2073_v20 = vpop.f32.mrb[12].mxu1 }
 0x113   :  { %v753_v17 = vsel %vm741_vm1, %v2067_v16, 0.0  ;;  %v881_v18 = vmul.f32 %v2067_v16, %v2067_v16  ;;  %v454_v19 = vpop.f32.mrb[13].mxu0  ;;  %v614_v22 = vpop.f32.mrb[13].mxu1 }
 0x114   :  { %v754_v21 = vadd.f32 %v753_v17, %v752_v12 }
 0x115   :  { %v950_v23 = vsel %vm741_vm1, %v881_v18, 0.0 }
 0x116   :  { %v951_v24 = vadd.f32 %v950_v23, %v949_v15  ;;  %v2076_v25 = vpop.f32.mrb[14].mxu0  ;;  %v2082_v31 = vpop.f32.mrb[14].mxu1 }
 0x117   :  { %v755_v26 = vsel %vm741_vm1, %v2076_v25, 0.0  ;;  %v882_v27 = vmul.f32 %v2076_v25, %v2076_v25  ;;  %v459_v29 = vpop.f32.mrb[15].mxu0  ;;  %v619_v34 = vpop.f32.mrb[15].mxu1 }
 0x118   :  { %v756_v32 = vadd.f32 %v755_v26, %v754_v21 }
 0x119   :  { %v952_v35 = vsel %vm741_vm1, %v882_v27, 0.0 }
 0x11a   :  { %v953_v36 = vadd.f32 %v952_v35, %v951_v24  ;;  %v2085_v37 = vpop.f32.mrb[16].mxu0  ;;  %v2091_v42 = vpop.f32.mrb[16].mxu1 }
 0x11b   :  { %v757_v39 = vsel %vm741_vm1, %v2085_v37, 0.0  ;;  %v883_v40 = vmul.f32 %v2085_v37, %v2085_v37  ;;  %v464_v41 = vpop.f32.mrb[17].mxu0  ;;  %v624_v45 = vpop.f32.mrb[17].mxu1 }
 0x11c   :  { %v758_v43 = vadd.f32 %v757_v39, %v756_v32 }
 0x11d   :  { %v954_v46 = vsel %vm741_vm1, %v883_v40, 0.0 }
 0x11e   :  { %v955_v47 = vadd.f32 %v954_v46, %v953_v36  ;;  %v2094_v49 = vpop.f32.mrb[18].mxu0  ;;  %v2100_v54 = vpop.f32.mrb[18].mxu1 }
 0x11f   :  { %v759_v50 = vsel %vm741_vm1, %v2094_v49, 0.0  ;;  %v884_v51 = vmul.f32 %v2094_v49, %v2094_v49  ;;  %v469_v52 = vpop.f32.mrb[19].mxu0  ;;  %v629_v56 = vpop.f32.mrb[19].mxu1 }
 0x120   :  { %v760_v55 = vadd.f32 %v759_v50, %v758_v43 }
 0x121   :  { %v956_v58 = vsel %vm741_vm1, %v884_v51, 0.0 }
 0x122   :  { %v957_v59 = vadd.f32 %v956_v58, %v955_v47  ;;  %v2103_v60 = vpop.f32.mrb[20].mxu0  ;;  %v2109_v1 = vpop.f32.mrb[20].mxu1 }
 0x123   :  { %v761_v61 = vsel %vm741_vm1, %v2103_v60, 0.0  ;;  %v885_v63 = vmul.f32 %v2103_v60, %v2103_v60  ;;  %v474_v0 = vpop.f32.mrb[21].mxu0  ;;  %v634_v4 = vpop.f32.mrb[21].mxu1 }
 0x124   :  { %v762_v3 = vadd.f32 %v761_v61, %v760_v55 }
 0x125   :  { %v958_v5 = vsel %vm741_vm1, %v885_v63, 0.0 }
 0x126   :  { %v959_v6 = vadd.f32 %v958_v5, %v957_v59  ;;  %v2112_v8 = vpop.f32.mrb[22].mxu0  ;;  %v2118_v13 = vpop.f32.mrb[22].mxu1 }
 0x127   :  { %v763_v9 = vsel %vm741_vm1, %v2112_v8, 0.0  ;;  %v886_v10 = vmul.f32 %v2112_v8, %v2112_v8  ;;  %v479_v12 = vpop.f32.mrb[23].mxu0  ;;  %v639_v15 = vpop.f32.mrb[23].mxu1 }
 0x128   :  { %v764_v14 = vadd.f32 %v763_v9, %v762_v3 }
 0x129   :  { %v960_v17 = vsel %vm741_vm1, %v886_v10, 0.0 }
 0x12a   :  { %v961_v18 = vadd.f32 %v960_v17, %v959_v6  ;;  %v2121_v19 = vpop.f32.mrb[24].mxu0  ;;  %v2127_v24 = vpop.f32.mrb[24].mxu1 }
 0x12b   :  { %v765_v21 = vsel %vm741_vm1, %v2121_v19, 0.0  ;;  %v887_v22 = vmul.f32 %v2121_v19, %v2121_v19  ;;  %v484_v23 = vpop.f32.mrb[25].mxu0  ;;  %v644_v27 = vpop.f32.mrb[25].mxu1 }
 0x12c   :  { %v766_v26 = vadd.f32 %v765_v21, %v764_v14 }
 0x12d   :  { %v962_v29 = vsel %vm741_vm1, %v887_v22, 0.0 }
 0x12e   :  { %v963_v32 = vadd.f32 %v962_v29, %v961_v18  ;;  %v2130_v34 = vpop.f32.mrb[26].mxu0  ;;  %v2136_v40 = vpop.f32.mrb[26].mxu1 }
 0x12f   :  { %v767_v35 = vsel %vm741_vm1, %v2130_v34, 0.0  ;;  %v888_v36 = vmul.f32 %v2130_v34, %v2130_v34  ;;  %v489_v39 = vpop.f32.mrb[27].mxu0  ;;  %v649_v43 = vpop.f32.mrb[27].mxu1 }
 0x130   :  { %v768_v41 = vadd.f32 %v767_v35, %v766_v26 }
 0x131   :  { %v964_v45 = vsel %vm741_vm1, %v888_v36, 0.0 }
 0x132   :  { %v965_v46 = vadd.f32 %v964_v45, %v963_v32  ;;  %v2139_v47 = vpop.f32.mrb[28].mxu0  ;;  %v2145_v55 = vpop.f32.mrb[28].mxu1 }
 0x133   :  { %v769_v50 = vsel %vm741_vm1, %v2139_v47, 0.0  ;;  %v889_v51 = vmul.f32 %v2139_v47, %v2139_v47  ;;  %v494_v52 = vpop.f32.mrb[29].mxu0  ;;  %v654_v58 = vpop.f32.mrb[29].mxu1 }
 0x134   :  { %v770_v56 = vadd.f32 %v769_v50, %v768_v41 }
 0x135   :  { %v966_v59 = vsel %vm741_vm1, %v889_v51, 0.0 }
 0x136   :  { %v967_v61 = vadd.f32 %v966_v59, %v965_v46  ;;  %v2148_v63 = vpop.f32.mrb[30].mxu0  ;;  %v2154_v5 = vpop.f32.mrb[30].mxu1 }
 0x137   :  { %v771_v0 = vsel %vm741_vm1, %v2148_v63, 0.0  ;;  %v890_v3 = vmul.f32 %v2148_v63, %v2148_v63  ;;  %v499_v4 = vpop.f32.mrb[31].mxu0  ;;  %v659_v9 = vpop.f32.mrb[31].mxu1 }
 0x138   :  { %v772_v6 = vadd.f32 %v771_v0, %v770_v56 }
 0x139   :  { %v968_v10 = vsel %vm741_vm1, %v890_v3, 0.0 }
 0x13a   :  { %v969_v12 = vadd.f32 %v968_v10, %v967_v61  ;;  %v2157_v14 = vpop.f32.mrb[32].mxu0  ;;  %v2163_v21 = vpop.f32.mrb[32].mxu1 }
 0x13b   :  { %v773_v15 = vsel %vm741_vm1, %v2157_v14, 0.0  ;;  %v891_v17 = vmul.f32 %v2157_v14, %v2157_v14  ;;  %v504_v18 = vpop.f32.mrb[33].mxu0  ;;  %v664_v23 = vpop.f32.mrb[33].mxu1 }
 0x13c   :  { %v774_v22 = vadd.f32 %v773_v15, %v772_v6 }
 0x13d   :  { %v970_v26 = vsel %vm741_vm1, %v891_v17, 0.0 }
 0x13e   :  { %v971_v27 = vadd.f32 %v970_v26, %v969_v12  ;;  %v2166_v29 = vpop.f32.mrb[34].mxu0  ;;  %v2172_v39 = vpop.f32.mrb[34].mxu1 }
 0x13f   :  { %3351 = vst [vmem:[#allocation3_spill] sm:$0xff] %v2166_v29  ;;  %v775_v32 = vsel %vm741_vm1, %v2166_v29, 0.0  ;;  %v892_v35 = vmul.f32 %v2166_v29, %v2166_v29  ;;  %v509_v36 = vpop.f32.mrb[35].mxu0  ;;  %v669_v43 = vpop.f32.mrb[35].mxu1 }
 0x140   :  { %v776_v41 = vadd.f32 %v775_v32, %v774_v22 }
 0x141   :  { %v972_v45 = vsel %vm741_vm1, %v892_v35, 0.0 }
 0x142   :  { %v973_v46 = vadd.f32 %v972_v45, %v971_v27  ;;  %v2175_v50 = vpop.f32.mrb[36].mxu0  ;;  %v2181_v58 = vpop.f32.mrb[36].mxu1 }
 0x143   :  { %3352 = vst [vmem:[#allocation4_spill] sm:$0xff] %v2175_v50  ;;  %v777_v51 = vsel %vm741_vm1, %v2175_v50, 0.0  ;;  %v893_v52 = vmul.f32 %v2175_v50, %v2175_v50  ;;  %v514_v56 = vpop.f32.mrb[37].mxu0  ;;  %v674_v61 = vpop.f32.mrb[37].mxu1 }
 0x144   :  { %v778_v59 = vadd.f32 %v777_v51, %v776_v41 }
 0x145   :  { %v974_v0 = vsel %vm741_vm1, %v893_v52, 0.0 }
 0x146   :  { %v975_v3 = vadd.f32 %v974_v0, %v973_v46  ;;  %v2184_v4 = vpop.f32.mrb[38].mxu0  ;;  %v2190_v12 = vpop.f32.mrb[38].mxu1 }
 0x147   :  { %3353 = vst [vmem:[#allocation5_spill] sm:$0xff] %v2184_v4  ;;  %v779_v6 = vsel %vm741_vm1, %v2184_v4, 0.0  ;;  %v894_v9 = vmul.f32 %v2184_v4, %v2184_v4  ;;  %v519_v10 = vpop.f32.mrb[39].mxu0  ;;  %v679_v17 = vpop.f32.mrb[39].mxu1 }
 0x148   :  { %v780_v15 = vadd.f32 %v779_v6, %v778_v59 }
 0x149   :  { %v976_v18 = vsel %vm741_vm1, %v894_v9, 0.0 }
 0x14a   :  { %v977_v22 = vadd.f32 %v976_v18, %v975_v3  ;;  %v2193_v23 = vpop.f32.mrb[40].mxu0  ;;  %v2199_v35 = vpop.f32.mrb[40].mxu1 }
 0x14b   :  { %3354 = vst [vmem:[#allocation6_spill] sm:$0xff] %v2193_v23  ;;  %v781_v26 = vsel %vm741_vm1, %v2193_v23, 0.0  ;;  %v895_v27 = vmul.f32 %v2193_v23, %v2193_v23  ;;  %v524_v32 = vpop.f32.mrb[41].mxu0  ;;  %v684_v41 = vpop.f32.mrb[41].mxu1 }
 0x14c   :  { %v782_v36 = vadd.f32 %v781_v26, %v780_v15 }
 0x14d   :  { %v978_v43 = vsel %vm741_vm1, %v895_v27, 0.0 }
 0x14e   :  { %v979_v45 = vadd.f32 %v978_v43, %v977_v22  ;;  %v2202_v46 = vpop.f32.mrb[42].mxu0  ;;  %v2208_v59 = vpop.f32.mrb[42].mxu1 }
 0x14f   :  { %3355 = vst [vmem:[#allocation7_spill] sm:$0xff] %v2202_v46  ;;  %v783_v51 = vsel %vm741_vm1, %v2202_v46, 0.0  ;;  %v896_v52 = vmul.f32 %v2202_v46, %v2202_v46  ;;  %v529_v56 = vpop.f32.mrb[43].mxu0  ;;  %v689_v0 = vpop.f32.mrb[43].mxu1 }
 0x150   :  { %v784_v61 = vadd.f32 %v783_v51, %v782_v36 }
 0x151   :  { %v980_v3 = vsel %vm741_vm1, %v896_v52, 0.0 }
 0x152   :  { %v981_v6 = vadd.f32 %v980_v3, %v979_v45  ;;  %v2211_v9 = vpop.f32.mrb[44].mxu0  ;;  %v2217_v18 = vpop.f32.mrb[44].mxu1 }
 0x153   :  { %3356 = vst [vmem:[#allocation8_spill] sm:$0xff] %v2211_v9  ;;  %v785_v10 = vsel %vm741_vm1, %v2211_v9, 0.0  ;;  %v897_v15 = vmul.f32 %v2211_v9, %v2211_v9  ;;  %v534_v17 = vpop.f32.mrb[45].mxu0  ;;  %v694_v26 = vpop.f32.mrb[45].mxu1 }
 0x154   :  { %v786_v22 = vadd.f32 %v785_v10, %v784_v61 }
 0x155   :  { %v982_v27 = vsel %vm741_vm1, %v897_v15, 0.0 }
 0x156   :  { %v983_v32 = vadd.f32 %v982_v27, %v981_v6  ;;  %v2220_v36 = vpop.f32.mrb[46].mxu0  ;;  %v2226_v51 = vpop.f32.mrb[46].mxu1 }
 0x157   :  { %3357 = vst [vmem:[#allocation9_spill] sm:$0xff] %v2220_v36  ;;  %v787_v41 = vsel %vm741_vm1, %v2220_v36, 0.0  ;;  %v898_v43 = vmul.f32 %v2220_v36, %v2220_v36  ;;  %v539_v45 = vpop.f32.mrb[47].mxu0  ;;  %3358 = vst [vmem:[#allocation10_spill] sm:$0xff] %v2226_v51  ;;  %v699_v56 = vpop.f32.mrb[47].mxu1 }
 0x158   :  { %v788_v52 = vadd.f32 %v787_v41, %v786_v22 }
 0x159   :  { %v984_v0 = vsel %vm741_vm1, %v898_v43, 0.0 }
 0x15a   :  { %v985_v61 = vadd.f32 %v984_v0, %v983_v32  ;;  %v2229_v3 = vpop.f32.mrb[48].mxu0  ;;  %v2235_v17 = vpop.f32.mrb[48].mxu1 }
 0x15b   :  { %3359 = vst [vmem:[#allocation11_spill] sm:$0xff] %v2229_v3  ;;  %v789_v6 = vsel %vm741_vm1, %v2229_v3, 0.0  ;;  %v899_v10 = vmul.f32 %v2229_v3, %v2229_v3  ;;  %v544_v15 = vpop.f32.mrb[49].mxu0  ;;  %3360 = vst [vmem:[#allocation12_spill] sm:$0xff] %v2235_v17  ;;  %v704_v27 = vpop.f32.mrb[49].mxu1 }
 0x15c   :  { %v790_v26 = vadd.f32 %v789_v6, %v788_v52 }
 0x15d   :  { %v986_v45 = vsel %vm741_vm1, %v899_v10, 0.0 }
 0x15e   :  { %v987_v22 = vadd.f32 %v986_v45, %v985_v61  ;;  %v2238_v41 = vpop.f32.mrb[50].mxu0  ;;  %v2244_v0 = vpop.f32.mrb[50].mxu1 }
 0x15f   :  { %3361 = vst [vmem:[#allocation13_spill] sm:$0xff] %v2238_v41  ;;  %v791_v32 = vsel %vm741_vm1, %v2238_v41, 0.0  ;;  %v900_v43 = vmul.f32 %v2238_v41, %v2238_v41  ;;  %v549_v56 = vpop.f32.mrb[51].mxu0  ;;  %3362 = vst [vmem:[#allocation14_spill] sm:$0xff] %v2244_v0  ;;  %v709_v15 = vpop.f32.mrb[51].mxu1 }
 0x160   :  { %v792_v3 = vadd.f32 %v791_v32, %v790_v26 }
 0x161   :  { %v988_v36 = vsel %vm741_vm1, %v900_v43, 0.0 }
 0x162   :  { %v989_v52 = vadd.f32 %v988_v36, %v987_v22  ;;  %v2247_v6 = vpop.f32.mrb[52].mxu0  ;;  %v2253_v45 = vpop.f32.mrb[52].mxu1 }
 0x163   :  { %3363 = vst [vmem:[#allocation15_spill] sm:$0xff] %v2247_v6  ;;  %v793_v61 = vsel %vm741_vm1, %v2247_v6, 0.0  ;;  %v901_v10 = vmul.f32 %v2247_v6, %v2247_v6  ;;  %v554_v27 = vpop.f32.mrb[53].mxu0  ;;  %3364 = vst [vmem:[#allocation16_spill] sm:$0xff] %v2253_v45  ;;  %v714_v56 = vpop.f32.mrb[53].mxu1 }
 0x164   :  { %v794_v41 = vadd.f32 %v793_v61, %v792_v3 }
 0x165   :  { %v990_v9 = vsel %vm741_vm1, %v901_v10, 0.0 }
 0x166   :  { %v991_v26 = vadd.f32 %v990_v9, %v989_v52  ;;  %v2256_v32 = vpop.f32.mrb[54].mxu0  ;;  %v2262_v15 = vpop.f32.mrb[54].mxu1 }
 0x167   :  { %3365 = vst [vmem:[#allocation17_spill] sm:$0xff] %v2256_v32  ;;  %v795_v36 = vsel %vm741_vm1, %v2256_v32, 0.0  ;;  %v902_v22 = vmul.f32 %v2256_v32, %v2256_v32  ;;  %v559_v43 = vpop.f32.mrb[55].mxu0  ;;  %3366 = vst [vmem:[#allocation18_spill] sm:$0xff] %v2262_v15  ;;  %v719_v27 = vpop.f32.mrb[55].mxu1 }
 0x168   :  { %v796_v6 = vadd.f32 %v795_v36, %v794_v41 }
 0x169   :  { %v992_v46 = vsel %vm741_vm1, %v902_v22, 0.0 }
 0x16a   :  { %v993_v3 = vadd.f32 %v992_v46, %v991_v26  ;;  %v2265_v61 = vpop.f32.mrb[56].mxu0  ;;  %v2271_v56 = vpop.f32.mrb[56].mxu1 }
 0x16b   :  { %3367 = vst [vmem:[#allocation19_spill] sm:$0xff] %v2265_v61  ;;  %v797_v9 = vsel %vm741_vm1, %v2265_v61, 0.0  ;;  %v903_v52 = vmul.f32 %v2265_v61, %v2265_v61  ;;  %v564_v10 = vpop.f32.mrb[57].mxu0  ;;  %3368 = vst [vmem:[#allocation20_spill] sm:$0xff] %v2271_v56  ;;  %v724_v43 = vpop.f32.mrb[57].mxu1 }
 0x16c   :  { %v798_v32 = vadd.f32 %v797_v9, %v796_v6 }
 0x16d   :  { %v994_v23 = vsel %vm741_vm1, %v903_v52, 0.0 }
 0x16e   :  { %v995_v41 = vadd.f32 %v994_v23, %v993_v3  ;;  %v2274_v36 = vpop.f32.mrb[58].mxu0  ;;  %v2280_v27 = vpop.f32.mrb[58].mxu1 }
 0x16f   :  { %3369 = vst [vmem:[#allocation21_spill] sm:$0xff] %v2274_v36  ;;  %v799_v46 = vsel %vm741_vm1, %v2274_v36, 0.0  ;;  %v904_v26 = vmul.f32 %v2274_v36, %v2274_v36  ;;  %v569_v22 = vpop.f32.mrb[59].mxu0  ;;  %3370 = vst [vmem:[#allocation22_spill] sm:$0xff] %v2280_v27  ;;  %v729_v10 = vpop.f32.mrb[59].mxu1 }
 0x170   :  { %v800_v61 = vadd.f32 %v799_v46, %v798_v32 }
 0x171   :  { %v996_v4 = vsel %vm741_vm1, %v904_v26, 0.0 }
 0x172   :  { %v997_v6 = vadd.f32 %v996_v4, %v995_v41  ;;  %v2283_v9 = vpop.f32.mrb[60].mxu0  ;;  %v2289_v43 = vpop.f32.mrb[60].mxu1  ;;  %v907_v4 = vmul.f32 %v2015_v30, %v2015_v30 }
 0x173   :  { %3371 = vst [vmem:[#allocation23_spill] sm:$0xff] %v2283_v9  ;;  %v801_v23 = vsel %vm741_vm1, %v2283_v9, 0.0  ;;  %v905_v3 = vmul.f32 %v2283_v9, %v2283_v9  ;;  %v574_v52 = vpop.f32.mrb[61].mxu0  ;;  %3372 = vst [vmem:[#allocation24_spill] sm:$0xff] %v2289_v43  ;;  %v734_v22 = vpop.f32.mrb[61].mxu1 }
 0x174   :  { %v802_v36 = vadd.f32 %v801_v23, %v800_v61  ;;  %v805_v23 = vsel %vm741_vm1, %v2015_v30, 0.0  ;;  %v1002_v29 = vsel %vm741_vm1, %v907_v4, 0.0  ;;  %v809_v30 = vsel %vm741_vm1, %v2037_v48, 0.0 }
 0x175   :  { %v998_v50 = vsel %vm741_vm1, %v905_v3, 0.0 }
 0x176   :  { %v999_v32 = vadd.f32 %v998_v50, %v997_v6  ;;  %v2292_v46 = vpop.f32.mrb[62].mxu0  ;;  %v2300_v52 = vpop.f32.mrb[62].mxu1  ;;  %v908_v50 = vmul.f32 %v2027_v38, %v2027_v38 }
 0x177   :  { %3373 = vst [vmem:[#allocation25_spill] sm:$0xff] %v2292_v46  ;;  %v803_v41 = vsel %vm741_vm1, %v2292_v46, 0.0  ;;  %v906_v26 = vmul.f32 %v2292_v46, %v2292_v46  ;;  %v579_v10 = vpop.f32.mrb[63].mxu0  ;;  %3374 = vst [vmem:[#allocation26_spill] sm:$0xff] %v2300_v52  ;;  %v739_v61 = vpop.f32.mrb[63].mxu1  ;;  %v807_v46 = vsel %vm741_vm1, %v2027_v38, 0.0 }
 0x178   :  { %v804_v9 = vadd.f32 %v803_v41, %v802_v36  ;;  %v909_v10 = vmul.f32 %v2037_v48, %v2037_v48  ;;  %v1004_v61 = vsel %vm741_vm1, %v908_v50, 0.0 }
 0x179   :  { %v1000_v6 = vsel %vm741_vm1, %v906_v26, 0.0  ;;  %v910_v26 = vmul.f32 %v2046_v57, %v2046_v57 }
 0x17a   :  { %v806_v3 = vadd.f32 %v805_v23, %v804_v9  ;;  %v1001_v22 = vadd.f32 %v1000_v6, %v999_v32  ;;  %v1006_v4 = vsel %vm741_vm1, %v909_v10, 0.0  ;;  %v811_v23 = vsel %vm741_vm1, %v2046_v57, 0.0 }
 0x17b   :  { %v911_v6 = vmul.f32 %v2055_v2, %v2055_v2  ;;  %v1008_v50 = vsel %vm741_vm1, %v910_v26, 0.0 }
 0x17c   :  { %v808_v36 = vadd.f32 %v807_v46, %v806_v3  ;;  %v1003_v41 = vadd.f32 %v1002_v29, %v1001_v22  ;;  %v813_v3 = vsel %vm741_vm1, %v2055_v2, 0.0  ;;  %v912_v22 = vmul.f32 %v2064_v11, %v2064_v11 }
 0x17d   :  { %v1010_v10 = vsel %vm741_vm1, %v911_v6, 0.0 }
 0x17e   :  { %v810_v9 = vadd.f32 %v809_v30, %v808_v36  ;;  %v1005_v32 = vadd.f32 %v1004_v61, %v1003_v41  ;;  %v815_v41 = vsel %vm741_vm1, %v2064_v11, 0.0  ;;  %v913_v61 = vmul.f32 %v2073_v20, %v2073_v20 }
 0x17f   :  { %v1012_v26 = vsel %vm741_vm1, %v912_v22, 0.0 }
 0x180   :  { %v812_v46 = vadd.f32 %v811_v23, %v810_v9  ;;  %v1007_v29 = vadd.f32 %v1006_v4, %v1005_v32  ;;  %v817_v4 = vsel %vm741_vm1, %v2073_v20, 0.0  ;;  %v914_v23 = vmul.f32 %v2082_v31, %v2082_v31 }
 0x181   :  { %v1014_v6 = vsel %vm741_vm1, %v913_v61, 0.0 }
 0x182   :  { %v814_v30 = vadd.f32 %v813_v3, %v812_v46  ;;  %v1009_v36 = vadd.f32 %v1008_v50, %v1007_v29  ;;  %v819_v50 = vsel %vm741_vm1, %v2082_v31, 0.0  ;;  %v915_v3 = vmul.f32 %v2091_v42, %v2091_v42 }
 0x183   :  { %v1016_v22 = vsel %vm741_vm1, %v914_v23, 0.0 }
 0x184   :  { %v816_v9 = vadd.f32 %v815_v41, %v814_v30  ;;  %v1011_v32 = vadd.f32 %v1010_v10, %v1009_v36  ;;  %v821_v10 = vsel %vm741_vm1, %v2091_v42, 0.0  ;;  %v916_v41 = vmul.f32 %v2100_v54, %v2100_v54 }
 0x185   :  { %v1018_v61 = vsel %vm741_vm1, %v915_v3, 0.0 }
 0x186   :  { %v818_v46 = vadd.f32 %v817_v4, %v816_v9  ;;  %v1013_v29 = vadd.f32 %v1012_v26, %v1011_v32  ;;  %v823_v26 = vsel %vm741_vm1, %v2100_v54, 0.0  ;;  %v917_v4 = vmul.f32 %v2109_v1, %v2109_v1 }
 0x187   :  { %v1020_v23 = vsel %vm741_vm1, %v916_v41, 0.0 }
 0x188   :  { %v820_v30 = vadd.f32 %v819_v50, %v818_v46  ;;  %v1015_v36 = vadd.f32 %v1014_v6, %v1013_v29  ;;  %v825_v6 = vsel %vm741_vm1, %v2109_v1, 0.0  ;;  %v918_v50 = vmul.f32 %v2118_v13, %v2118_v13 }
 0x189   :  { %v1022_v3 = vsel %vm741_vm1, %v917_v4, 0.0 }
 0x18a   :  { %v1017_v9 = vadd.f32 %v1016_v22, %v1015_v36  ;;  %v822_v32 = vadd.f32 %v821_v10, %v820_v30  ;;  %v827_v22 = vsel %vm741_vm1, %v2118_v13, 0.0  ;;  %v919_v10 = vmul.f32 %v2127_v24, %v2127_v24 }
 0x18b   :  { %v1024_v41 = vsel %vm741_vm1, %v918_v50, 0.0 }
 0x18c   :  { %v824_v46 = vadd.f32 %v823_v26, %v822_v32  ;;  %v1019_v29 = vadd.f32 %v1018_v61, %v1017_v9  ;;  %v829_v61 = vsel %vm741_vm1, %v2127_v24, 0.0  ;;  %v920_v26 = vmul.f32 %v2136_v40, %v2136_v40 }
 0x18d   :  { %v1026_v4 = vsel %vm741_vm1, %v919_v10, 0.0 }
 0x18e   :  { %v826_v36 = vadd.f32 %v825_v6, %v824_v46  ;;  %v1021_v30 = vadd.f32 %v1020_v23, %v1019_v29  ;;  %v831_v23 = vsel %vm741_vm1, %v2136_v40, 0.0  ;;  %v921_v6 = vmul.f32 %v2145_v55, %v2145_v55 }
 0x18f   :  { %v1028_v50 = vsel %vm741_vm1, %v920_v26, 0.0 }
 0x190   :  { %v828_v32 = vadd.f32 %v827_v22, %v826_v36  ;;  %v1023_v9 = vadd.f32 %v1022_v3, %v1021_v30  ;;  %v833_v3 = vsel %vm741_vm1, %v2145_v55, 0.0  ;;  %v922_v22 = vmul.f32 %v2154_v5, %v2154_v5 }
 0x191   :  { %v1030_v10 = vsel %vm741_vm1, %v921_v6, 0.0 }
 0x192   :  { %v830_v46 = vadd.f32 %v829_v61, %v828_v32  ;;  %v1025_v29 = vadd.f32 %v1024_v41, %v1023_v9  ;;  %v835_v41 = vsel %vm741_vm1, %v2154_v5, 0.0  ;;  %v923_v61 = vmul.f32 %v2163_v21, %v2163_v21 }
 0x193   :  { %v1032_v26 = vsel %vm741_vm1, %v922_v22, 0.0 }
 0x194   :  { %v832_v36 = vadd.f32 %v831_v23, %v830_v46  ;;  %v1027_v30 = vadd.f32 %v1026_v4, %v1025_v29  ;;  %v837_v4 = vsel %vm741_vm1, %v2163_v21, 0.0  ;;  %v924_v23 = vmul.f32 %v2172_v39, %v2172_v39 }
 0x195   :  { %v1034_v6 = vsel %vm741_vm1, %v923_v61, 0.0 }
 0x196   :  { %v834_v32 = vadd.f32 %v833_v3, %v832_v36  ;;  %v1029_v9 = vadd.f32 %v1028_v50, %v1027_v30  ;;  %v839_v50 = vsel %vm741_vm1, %v2172_v39, 0.0  ;;  %v925_v3 = vmul.f32 %v2181_v58, %v2181_v58 }
 0x197   :  { %v1036_v22 = vsel %vm741_vm1, %v924_v23, 0.0 }
 0x198   :  { %v836_v46 = vadd.f32 %v835_v41, %v834_v32  ;;  %v1031_v29 = vadd.f32 %v1030_v10, %v1029_v9  ;;  %v841_v10 = vsel %vm741_vm1, %v2181_v58, 0.0  ;;  %v926_v41 = vmul.f32 %v2190_v12, %v2190_v12 }
 0x199   :  { %v1038_v61 = vsel %vm741_vm1, %v925_v3, 0.0 }
 0x19a   :  { %v838_v36 = vadd.f32 %v837_v4, %v836_v46  ;;  %v1033_v30 = vadd.f32 %v1032_v26, %v1031_v29  ;;  %v843_v26 = vsel %vm741_vm1, %v2190_v12, 0.0  ;;  %v927_v4 = vmul.f32 %v2199_v35, %v2199_v35 }
 0x19b   :  { %v1040_v23 = vsel %vm741_vm1, %v926_v41, 0.0 }
 0x19c   :  { %v1035_v32 = vadd.f32 %v1034_v6, %v1033_v30  ;;  %v840_v9 = vadd.f32 %v839_v50, %v838_v36  ;;  %v845_v6 = vsel %vm741_vm1, %v2199_v35, 0.0  ;;  %v928_v50 = vmul.f32 %v2208_v59, %v2208_v59 }
 0x19d   :  { %v1042_v3 = vsel %vm741_vm1, %v927_v4, 0.0 }
 0x19e   :  { %v1037_v46 = vadd.f32 %v1036_v22, %v1035_v32  ;;  %v842_v29 = vadd.f32 %v841_v10, %v840_v9  ;;  %v847_v22 = vsel %vm741_vm1, %v2208_v59, 0.0  ;;  %v929_v10 = vmul.f32 %v2217_v18, %v2217_v18 }
 0x19f   :  { %v1044_v41 = vsel %vm741_vm1, %v928_v50, 0.0 }
 0x1a0   :  { %v1039_v30 = vadd.f32 %v1038_v61, %v1037_v46  ;;  %v844_v36 = vadd.f32 %v843_v26, %v842_v29  ;;  %v849_v61 = vsel %vm741_vm1, %v2217_v18, 0.0  ;;  %v930_v26 = vmul.f32 %v2226_v51, %v2226_v51 }
 0x1a1   :  { %v1046_v4 = vsel %vm741_vm1, %v929_v10, 0.0 }
 0x1a2   :  { %v1041_v32 = vadd.f32 %v1040_v23, %v1039_v30  ;;  %v846_v9 = vadd.f32 %v845_v6, %v844_v36  ;;  %v851_v23 = vsel %vm741_vm1, %v2226_v51, 0.0  ;;  %v931_v6 = vmul.f32 %v2235_v17, %v2235_v17 }
 0x1a3   :  { %v1048_v50 = vsel %vm741_vm1, %v930_v26, 0.0 }
 0x1a4   :  { %v1043_v46 = vadd.f32 %v1042_v3, %v1041_v32  ;;  %v848_v29 = vadd.f32 %v847_v22, %v846_v9  ;;  %v853_v3 = vsel %vm741_vm1, %v2235_v17, 0.0  ;;  %v932_v22 = vmul.f32 %v2244_v0, %v2244_v0 }
 0x1a5   :  { %v1050_v10 = vsel %vm741_vm1, %v931_v6, 0.0 }
 0x1a6   :  { %v1045_v30 = vadd.f32 %v1044_v41, %v1043_v46  ;;  %v850_v36 = vadd.f32 %v849_v61, %v848_v29  ;;  %v855_v41 = vsel %vm741_vm1, %v2244_v0, 0.0  ;;  %v933_v61 = vmul.f32 %v2253_v45, %v2253_v45 }
 0x1a7   :  { %v1052_v26 = vsel %vm741_vm1, %v932_v22, 0.0 }
 0x1a8   :  { %v1047_v32 = vadd.f32 %v1046_v4, %v1045_v30  ;;  %v852_v9 = vadd.f32 %v851_v23, %v850_v36  ;;  %v857_v4 = vsel %vm741_vm1, %v2253_v45, 0.0  ;;  %v934_v23 = vmul.f32 %v2262_v15, %v2262_v15 }
 0x1a9   :  { %v1054_v6 = vsel %vm741_vm1, %v933_v61, 0.0 }
 0x1aa   :  { %v1049_v46 = vadd.f32 %v1048_v50, %v1047_v32  ;;  %v854_v29 = vadd.f32 %v853_v3, %v852_v9  ;;  %v859_v50 = vsel %vm741_vm1, %v2262_v15, 0.0  ;;  %v935_v3 = vmul.f32 %v2271_v56, %v2271_v56 }
 0x1ab   :  { %v1056_v22 = vsel %vm741_vm1, %v934_v23, 0.0 }
 0x1ac   :  { %v1051_v30 = vadd.f32 %v1050_v10, %v1049_v46  ;;  %v856_v36 = vadd.f32 %v855_v41, %v854_v29  ;;  %v861_v10 = vsel %vm741_vm1, %v2271_v56, 0.0  ;;  %v936_v41 = vmul.f32 %v2280_v27, %v2280_v27 }
 0x1ad   :  { %v1058_v61 = vsel %vm741_vm1, %v935_v3, 0.0 }
 0x1ae   :  { %v1053_v32 = vadd.f32 %v1052_v26, %v1051_v30  ;;  %v858_v9 = vadd.f32 %v857_v4, %v856_v36  ;;  %v863_v26 = vsel %vm741_vm1, %v2280_v27, 0.0  ;;  %v937_v4 = vmul.f32 %v2289_v43, %v2289_v43 }
 0x1b0   :  { %v1055_v46 = vadd.f32 %v1054_v6, %v1053_v32  ;;  %v860_v29 = vadd.f32 %v859_v50, %v858_v9  ;;  %v938_v32 = vmul.f32 %v2300_v52, %v2300_v52  ;;  %v1060_v6 = vsel %vm741_vm1, %v936_v41, 0.0 }
 0x1b1   :  { %v865_v50 = vsel %vm741_vm1, %v2289_v43, 0.0 }
 0x1b2   :  { %v1057_v30 = vadd.f32 %v1056_v22, %v1055_v46  ;;  %v862_v36 = vadd.f32 %v861_v10, %v860_v29  ;;  %v867_v46 = vsel %vm741_vm1, %v2300_v52, 0.0  ;;  %v1062_v22 = vsel %vm741_vm1, %v937_v4, 0.0 }
 0x1b3   :  { %v1064_v10 = vsel %vm741_vm1, %v938_v32, 0.0 }
 0x1b4   :  { %v1059_v23 = vadd.f32 %v1058_v61, %v1057_v30  ;;  %v864_v9 = vadd.f32 %v863_v26, %v862_v36 }
 0x1b6   :  { %v1061_v3 = vadd.f32 %v1060_v6, %v1059_v23  ;;  %v866_v29 = vadd.f32 %v865_v50, %v864_v9 }
 0x1b8   :  { %v1063_v27 = vadd.f32 %v1062_v22, %v1061_v3  ;;  %v868_v56 = vadd.f32 %v867_v46, %v866_v29  ;;  %v1084_v46 = vlaneseq }
 0x1ba   :  { %v869_v15 = vrot.slane %v868_v56, 4  ;;  %v1065_v45 = vadd.f32 %v1064_v10, %v1063_v27  ;;  %v2461_v3 = vshrl.u32 %v1084_v46, 7 }
 0x1bc   :  { %v870_v30 = vadd.f32 %v869_v15, %v868_v56  ;;  %v1066_v36 = vrot.slane %v1065_v45, 4  ;;  %v3349_v15 = vsub.s32 0, %v2461_v3 }
 0x1be   :  { %v871_v61 = vrot.slane %v870_v30, 2  ;;  %v1067_v41 = vadd.f32 %v1066_v36, %v1065_v45  ;;  %v1076_v45 = vld [vmem:[%s3321_s2] sm:$0x1]  ;;  %v3375_v36 = vld [vmem:[#allocation3_spill] sm:$0xff] }
 0x1c0   :  { %v872_v26 = vadd.f32 %v871_v61, %v870_v30  ;;  %v1068_v0 = vrot.slane %v1067_v41, 2  ;;  %v3376_v61 = vld [vmem:[#allocation4_spill] sm:$0xff] }
 0x1c2   :  { %v873_v43 = vrot.slane %v872_v26, 1  ;;  %v1069_v17 = vadd.f32 %v1068_v0, %v1067_v41  ;;  %v3377_v41 = vld [vmem:[#allocation5_spill] sm:$0xff] }
 0x1c4   :  { %v874_v51 = vadd.f32 %v873_v43, %v872_v26  ;;  %v1070_v52 = vrot.slane %v1069_v17, 1  ;;  %v3378_v26 = vld [vmem:[#allocation6_spill] sm:$0xff]  ;;  %v3389_v43 = vld [vmem:[#allocation25_spill] sm:$0xff] }
 0x1c6   :  { %v1071_v23 = vadd.f32 %v1070_v52, %v1069_v17  ;;  %v1072_v9 = vmul.f32 0.001953125, %v874_v51  ;;  %v2470_v51 = vld [vmem:[%s3322_s3] sm:$0x1] }
 0x1c8   :  { %v1073_v6 = vmul.f32 0.001953125, %v1071_v23  ;;  %v1074_v4 = vmul.f32 %v1072_v9, %v1072_v9  ;;  %v3379_v23 = vld [vmem:[#allocation7_spill] sm:$0xff] }
 0x1ca   :  { %v1075_v50 = vsub.f32 %v1073_v6, %v1074_v4  ;;  %v3381_v4 = vld [vmem:[#allocation9_spill] sm:$0xff] }
 0x1cc   :  { %v1077_v32 = vadd.f32 1e-05, %v1075_v50 }
 0x1ce   :  { %1465 = vrsqrt.f32 %v1077_v32  ;;  %v3382_v32 = vld [vmem:[#allocation11_spill] sm:$0xff] }
 0x1d8   :  { %v1466_v56 = vpop.eup %1465 }
 0x1d9   :  { %v1079_v0 = vmul.f32 %v1466_v56, %v1076_v45  ;;  %v3383_v45 = vld [vmem:[#allocation13_spill] sm:$0xff] }
 0x1db   :  { %v2472_v17 = vmul.f32 %v1079_v0, %v1072_v9  ;;  %v2476_v27 = vrot.slane %v1079_v0, %v3349_v15  ;;  %v3380_v9 = vld [vmem:[#allocation8_spill] sm:$0xff]  ;;  %v3384_v0 = vld [vmem:[#allocation15_spill] sm:$0xff]  ;;  %v3390_v15 = vld [vmem:[#allocation2_spill] sm:$0xff] }
 0x1dd   :  { %v2482_v52 = vmul.f32 %v2476_v27, %v2013_v28  ;;  %v2486_v29 = vmul.f32 %v2476_v27, %v2019_v33  ;;  %v2490_v22 = vmul.f32 %v2476_v27, %v2031_v44  ;;  %v2494_v10 = vmul.f32 %v2476_v27, %v2040_v53 }
 0x1de   :  { %v2498_v30 = vmul.f32 %v2476_v27, %v2049_v62  ;;  %v2502_v28 = vmul.f32 %v2476_v27, %v2058_v7  ;;  %v2506_v33 = vmul.f32 %v2476_v27, %v2067_v16  ;;  %v2510_v44 = vmul.f32 %v2476_v27, %v2076_v25 }
 0x1df   :  { %v2514_v53 = vmul.f32 %v2476_v27, %v2085_v37  ;;  %v2518_v62 = vmul.f32 %v2476_v27, %v2094_v49  ;;  %v2522_v7 = vmul.f32 %v2476_v27, %v2103_v60  ;;  %v2526_v16 = vmul.f32 %v2476_v27, %v2112_v8 }
 0x1e0   :  { %v2530_v25 = vmul.f32 %v2476_v27, %v2121_v19  ;;  %v2534_v37 = vmul.f32 %v2476_v27, %v2130_v34  ;;  %v2538_v49 = vmul.f32 %v2476_v27, %v2139_v47  ;;  %v2542_v60 = vmul.f32 %v2476_v27, %v2148_v63 }
 0x1e1   :  { %v2546_v8 = vmul.f32 %v2476_v27, %v2157_v14  ;;  %v2550_v19 = vmul.f32 %v2476_v27, %v3375_v36  ;;  %v2554_v34 = vmul.f32 %v2476_v27, %v3376_v61  ;;  %v2558_v47 = vmul.f32 %v2476_v27, %v3377_v41  ;;  %v3385_v61 = vld [vmem:[#allocation17_spill] sm:$0xff] }
 0x1e2   :  { %v2562_v63 = vmul.f32 %v2476_v27, %v3378_v26  ;;  %v2566_v14 = vmul.f32 %v2476_v27, %v3379_v23  ;;  %v2570_v6 = vmul.f32 %v2476_v27, %v3380_v9  ;;  %v2574_v50 = vmul.f32 %v2476_v27, %v3381_v4  ;;  %v3386_v26 = vld [vmem:[#allocation19_spill] sm:$0xff]  ;;  %v3387_v9 = vld [vmem:[#allocation21_spill] sm:$0xff] }
 0x1e3   :  { %v2578_v46 = vmul.f32 %v2476_v27, %v3382_v32  ;;  %v2582_v56 = vmul.f32 %v2476_v27, %v3383_v45  ;;  %v2586_v36 = vmul.f32 %v2476_v27, %v3384_v0  ;;  %v2590_v41 = vmul.f32 %v2476_v27, %v3385_v61  ;;  %v3388_v32 = vld [vmem:[#allocation23_spill] sm:$0xff] }
 0x1e4   :  { %v2594_v23 = vmul.f32 %v2476_v27, %v3386_v26  ;;  %v2598_v4 = vmul.f32 %v2476_v27, %v3387_v9  ;;  %v2602_v45 = vmul.f32 %v2476_v27, %v3388_v32  ;;  %v2606_v0 = vmul.f32 %v2476_v27, %v3389_v43 }
 0x1e5   :  { %v2610_v61 = vmul.f32 %v2476_v27, %v3390_v15  ;;  %v2614_v26 = vmul.f32 %v2476_v27, %v2027_v38  ;;  %v2618_v9 = vmul.f32 %v2476_v27, %v2037_v48  ;;  %v2622_v32 = vmul.f32 %v2476_v27, %v2046_v57 }
 0x1e6   :  { %v2626_v43 = vmul.f32 %v2476_v27, %v2055_v2  ;;  %v2630_v15 = vmul.f32 %v2476_v27, %v2064_v11  ;;  %v2634_v38 = vmul.f32 %v2476_v27, %v2073_v20  ;;  %v2638_v48 = vmul.f32 %v2476_v27, %v2082_v31 }
 0x1e7   :  { %v2642_v57 = vmul.f32 %v2476_v27, %v2091_v42  ;;  %v2646_v2 = vmul.f32 %v2476_v27, %v2100_v54  ;;  %v2650_v11 = vmul.f32 %v2476_v27, %v2109_v1  ;;  %v2654_v20 = vmul.f32 %v2476_v27, %v2118_v13 }
 0x1e8   :  { %v2658_v31 = vmul.f32 %v2476_v27, %v2127_v24  ;;  %v2662_v42 = vmul.f32 %v2476_v27, %v2136_v40  ;;  %v2666_v54 = vmul.f32 %v2476_v27, %v2145_v55  ;;  %v2670_v1 = vmul.f32 %v2476_v27, %v2154_v5 }
 0x1e9   :  { %v2674_v13 = vmul.f32 %v2476_v27, %v2163_v21  ;;  %v2678_v24 = vmul.f32 %v2476_v27, %v2172_v39  ;;  %v2682_v40 = vmul.f32 %v2476_v27, %v2181_v58  ;;  %v2686_v55 = vmul.f32 %v2476_v27, %v2190_v12 }
 0x1ea   :  { %v2690_v5 = vmul.f32 %v2476_v27, %v2199_v35  ;;  %v2694_v21 = vmul.f32 %v2476_v27, %v2208_v59  ;;  %v2698_v39 = vmul.f32 %v2476_v27, %v2217_v18 }
 0x1eb   :  { %3391 = vst [vmem:[#allocation3_spill] sm:$0xff] %v2678_v24  ;;  %3392 = vst [vmem:[#allocation4_spill] sm:$0xff] %v2682_v40  ;;  %v3397_v24 = vld [vmem:[#allocation10_spill] sm:$0xff]  ;;  %v3399_v40 = vld [vmem:[#allocation12_spill] sm:$0xff] }
 0x1ec   :  { %3393 = vst [vmem:[#allocation5_spill] sm:$0xff] %v2686_v55  ;;  %3394 = vst [vmem:[#allocation6_spill] sm:$0xff] %v2690_v5  ;;  %v2702_v58 = vmul.f32 %v2476_v27, %v3397_v24  ;;  %v2706_v12 = vmul.f32 %v2476_v27, %v3399_v40  ;;  %v3401_v55 = vld [vmem:[#allocation14_spill] sm:$0xff]  ;;  %v3403_v5 = vld [vmem:[#allocation16_spill] sm:$0xff] }
 0x1ed   :  { %3395 = vst [vmem:[#allocation7_spill] sm:$0xff] %v2694_v21  ;;  %3396 = vst [vmem:[#allocation8_spill] sm:$0xff] %v2698_v39  ;;  %v2710_v35 = vmul.f32 %v2476_v27, %v3401_v55  ;;  %v2714_v59 = vmul.f32 %v2476_v27, %v3403_v5  ;;  %v3405_v21 = vld [vmem:[#allocation18_spill] sm:$0xff]  ;;  %v3407_v39 = vld [vmem:[#allocation20_spill] sm:$0xff] }
 0x1ee   :  { %3398 = vst [vmem:[#allocation9_spill] sm:$0xff] %v2702_v58  ;;  %3400 = vst [vmem:[#allocation11_spill] sm:$0xff] %v2706_v12  ;;  %v2718_v18 = vmul.f32 %v2476_v27, %v3405_v21  ;;  %v2722_v24 = vmul.f32 %v2476_v27, %v3407_v39  ;;  %v3408_v58 = vld [vmem:[#allocation22_spill] sm:$0xff]  ;;  %v3409_v12 = vld [vmem:[#allocation24_spill] sm:$0xff]  ;;  %v3412_v21 = vsub.f32 %v2470_v51, %v2472_v17 }
 0x1ef   :  { %3402 = vst [vmem:[#allocation13_spill] sm:$0xff] %v2710_v35  ;;  %3404 = vst [vmem:[#allocation15_spill] sm:$0xff] %v2714_v59  ;;  %v2726_v40 = vmul.f32 %v2476_v27, %v3408_v58  ;;  %v2730_v55 = vmul.f32 %v2476_v27, %v3409_v12  ;;  %v3410_v35 = vld [vmem:[#allocation26_spill] sm:$0xff]  ;;  %v3411_v59 = vsub.s32 0, %v2461_v3 }
 0x1f0   :  { %3406 = vst [vmem:[#allocation17_spill] sm:$0xff] %v2718_v18  ;;  %v2734_v5 = vmul.f32 %v2476_v27, %v3410_v35 }
 0x1f1   :  { %v2741_v18 = vrot.slane %v3412_v21, %v3411_v59 }
 0x1f3   :  { %v2745_v39 = vadd.f32 %v2741_v18, %v2482_v52  ;;  %v2749_v58 = vadd.f32 %v2741_v18, %v2486_v29  ;;  %v2753_v12 = vadd.f32 %v2741_v18, %v2490_v22  ;;  %v2757_v3 = vadd.f32 %v2741_v18, %v2494_v10  ;;  %v3418_v35 = vld [vmem:[#allocation5_spill] sm:$0xff]  ;;  %v3420_v59 = vld [vmem:[#allocation6_spill] sm:$0xff] }
 0x1f4   :  { %v2761_v51 = vadd.f32 %v2741_v18, %v2498_v30  ;;  %v2765_v17 = vadd.f32 %v2741_v18, %v2502_v28  ;;  %v2769_v27 = vadd.f32 %v2741_v18, %v2506_v33  ;;  %v2773_v52 = vadd.f32 %v2741_v18, %v2510_v44  ;;  %v3422_v21 = vld [vmem:[#allocation7_spill] sm:$0xff] }
 0x1f5   :  { %v2777_v29 = vadd.f32 %v2741_v18, %v2514_v53  ;;  %v2781_v22 = vadd.f32 %v2741_v18, %v2518_v62  ;;  %v2785_v10 = vadd.f32 %v2741_v18, %v2522_v7  ;;  %v2789_v30 = vadd.f32 %v2741_v18, %v2526_v16 }
 0x1f6   :  { %v2793_v28 = vadd.f32 %v2741_v18, %v2530_v25  ;;  %v2797_v33 = vadd.f32 %v2741_v18, %v2534_v37  ;;  %v2801_v44 = vadd.f32 %v2741_v18, %v2538_v49  ;;  %v2805_v53 = vadd.f32 %v2741_v18, %v2542_v60 }
 0x1f7   :  { %v2809_v62 = vadd.f32 %v2741_v18, %v2546_v8  ;;  %v2813_v7 = vadd.f32 %v2741_v18, %v2550_v19  ;;  %v2817_v16 = vadd.f32 %v2741_v18, %v2554_v34  ;;  %v2821_v25 = vadd.f32 %v2741_v18, %v2558_v47 }
 0x1f8   :  { %v2825_v37 = vadd.f32 %v2741_v18, %v2562_v63  ;;  %v2829_v49 = vadd.f32 %v2741_v18, %v2566_v14  ;;  %v2833_v60 = vadd.f32 %v2741_v18, %v2570_v6  ;;  %v2837_v8 = vadd.f32 %v2741_v18, %v2574_v50 }
 0x1f9   :  { %v2841_v19 = vadd.f32 %v2741_v18, %v2578_v46  ;;  %v2845_v34 = vadd.f32 %v2741_v18, %v2582_v56  ;;  %v2849_v47 = vadd.f32 %v2741_v18, %v2586_v36  ;;  %v2853_v63 = vadd.f32 %v2741_v18, %v2590_v41 }
 0x1fa   :  { %v2857_v14 = vadd.f32 %v2741_v18, %v2594_v23  ;;  %v2861_v6 = vadd.f32 %v2741_v18, %v2598_v4  ;;  %v2865_v50 = vadd.f32 %v2741_v18, %v2602_v45  ;;  %v2869_v46 = vadd.f32 %v2741_v18, %v2606_v0 }
 0x1fb   :  { %v2873_v56 = vadd.f32 %v2741_v18, %v2610_v61  ;;  %v2877_v36 = vadd.f32 %v2741_v18, %v2614_v26  ;;  %v2881_v41 = vadd.f32 %v2741_v18, %v2618_v9  ;;  %v2885_v23 = vadd.f32 %v2741_v18, %v2622_v32 }
 0x1fc   :  { %v2889_v4 = vadd.f32 %v2741_v18, %v2626_v43  ;;  %v2893_v45 = vadd.f32 %v2741_v18, %v2630_v15  ;;  %v2897_v0 = vadd.f32 %v2741_v18, %v2634_v38  ;;  %v2901_v61 = vadd.f32 %v2741_v18, %v2638_v48 }
 0x1fd   :  { %v2905_v26 = vadd.f32 %v2741_v18, %v2642_v57  ;;  %v2909_v9 = vadd.f32 %v2741_v18, %v2646_v2  ;;  %v2913_v32 = vadd.f32 %v2741_v18, %v2650_v11  ;;  %v2917_v43 = vadd.f32 %v2741_v18, %v2654_v20  ;;  %v3414_v11 = vld [vmem:[#allocation3_spill] sm:$0xff] }
 0x1fe   :  { %v2921_v15 = vadd.f32 %v2741_v18, %v2658_v31  ;;  %v2925_v38 = vadd.f32 %v2741_v18, %v2662_v42  ;;  %v2929_v48 = vadd.f32 %v2741_v18, %v2666_v54  ;;  %v2933_v57 = vadd.f32 %v2741_v18, %v2670_v1  ;;  %v3416_v31 = vld [vmem:[#allocation4_spill] sm:$0xff] }
 0x1ff   :  { %v2937_v2 = vadd.f32 %v2741_v18, %v2674_v13  ;;  %v2941_v20 = vadd.f32 %v2741_v18, %v3414_v11  ;;  %v2945_v42 = vadd.f32 %v2741_v18, %v3416_v31  ;;  %v2949_v54 = vadd.f32 %v2741_v18, %v3418_v35 }
 0x200   :  { %v2953_v1 = vadd.f32 %v2741_v18, %v3420_v59  ;;  %v2957_v13 = vadd.f32 %v2741_v18, %v3422_v21 }
 0x201   :  { %3413 = vst [vmem:[#allocation19_spill] sm:$0xff] %v2937_v2  ;;  %3415 = vst [vmem:[#allocation21_spill] sm:$0xff] %v2941_v20  ;;  %v3424_v2 = vld [vmem:[#allocation8_spill] sm:$0xff]  ;;  %v3425_v20 = vld [vmem:[#allocation9_spill] sm:$0xff] }
 0x202   :  { %3417 = vst [vmem:[#allocation23_spill] sm:$0xff] %v2945_v42  ;;  %3419 = vst [vmem:[#allocation25_spill] sm:$0xff] %v2949_v54  ;;  %v2961_v11 = vadd.f32 %v2741_v18, %v3424_v2  ;;  %v2965_v31 = vadd.f32 %v2741_v18, %v3425_v20  ;;  %v3426_v42 = vld [vmem:[#allocation11_spill] sm:$0xff]  ;;  %v3427_v54 = vld [vmem:[#allocation13_spill] sm:$0xff]  ;;  %v2985_v20 = vadd.f32 %v2741_v18, %v2722_v24  ;;  %v1226_v24 = vmax.f32 %v2757_v3, 0.0 }
 0x203   :  { %3421 = vst [vmem:[#allocation2_spill] sm:$0xff] %v2953_v1  ;;  %3423 = vst [vmem:[#allocation10_spill] sm:$0xff] %v2957_v13  ;;  %v2969_v35 = vadd.f32 %v2741_v18, %v3426_v42  ;;  %v2973_v59 = vadd.f32 %v2741_v18, %v3427_v54  ;;  %v3428_v1 = vld [vmem:[#allocation15_spill] sm:$0xff]  ;;  %v3430_v13 = vld [vmem:[#allocation17_spill] sm:$0xff]  ;;  %v2989_v42 = vadd.f32 %v2741_v18, %v2726_v40  ;;  %v1228_v40 = vmax.f32 %v2765_v17, 0.0 }
 0x204   :  { %v2977_v21 = vadd.f32 %v2741_v18, %v3428_v1  ;;  %v2981_v2 = vadd.f32 %v2741_v18, %v3430_v13  ;;  %3432 = vst [vmem:[#allocation16_spill] sm:$0xff] %v2985_v20  ;;  %v2993_v54 = vadd.f32 %v2741_v18, %v2730_v55  ;;  %v2997_v1 = vadd.f32 %v2741_v18, %v2734_v5 }
 0x205   :  { %3433 = vst [vmem:[#allocation18_spill] sm:$0xff] %v2989_v42  ;;  %v1224_v13 = vmax.f32 %v2749_v58, 0.0  ;;  %v1227_v20 = vmax.f32 %v2761_v51, 0.0  ;;  %v1229_v42 = vmax.f32 %v2769_v27, 0.0  ;;  %v1230_v55 = vmax.f32 %v2773_v52, 0.0  ;;  %1290 = vst.msk [vmem:[%s3323_s4 + $0x18] sm:$0xff] %vm741_vm1, %v1226_v24 }
 0x206   :  { %3429 = vst [vmem:[#allocation12_spill] sm:$0xff] %v2977_v21  ;;  %3431 = vst [vmem:[#allocation14_spill] sm:$0xff] %v2981_v2  ;;  %v1223_v21 = vmax.f32 %v2745_v39, 0.0  ;;  %v1225_v2 = vmax.f32 %v2753_v12, 0.0  ;;  %v1232_v18 = vmax.f32 %v2781_v22, 0.0  ;;  %v1233_v5 = vmax.f32 %v2785_v10, 0.0 }
 0x207   :  { %3434 = vst [vmem:[#allocation20_spill] sm:$0xff] %v2993_v54  ;;  %v1231_v54 = vmax.f32 %v2777_v29, 0.0  ;;  %v1234_v39 = vmax.f32 %v2789_v30, 0.0  ;;  %1288 = vst.msk [vmem:[%s3323_s4 + $0x8] sm:$0xff] %vm741_vm1, %v1224_v13  ;;  %v1235_v58 = vmax.f32 %v2793_v28, 0.0  ;;  %v1236_v12 = vmax.f32 %v2797_v33, 0.0 }
 0x208   :  { %1287 = vst.msk [vmem:[%s3323_s4] sm:$0xff] %vm741_vm1, %v1223_v21  ;;  %1289 = vst.msk [vmem:[%s3323_s4 + $0x10] sm:$0xff] %vm741_vm1, %v1225_v2  ;;  %v1237_v3 = vmax.f32 %v2801_v44, 0.0  ;;  %v1238_v51 = vmax.f32 %v2805_v53, 0.0  ;;  %v1239_v17 = vmax.f32 %v2809_v62, 0.0  ;;  %v1240_v27 = vmax.f32 %v2813_v7, 0.0 }
 0x209   :  { %1291 = vst.msk [vmem:[%s3323_s4 + $0x20] sm:$0xff] %vm741_vm1, %v1227_v20  ;;  %1292 = vst.msk [vmem:[%s3323_s4 + $0x28] sm:$0xff] %vm741_vm1, %v1228_v40  ;;  %v1241_v52 = vmax.f32 %v2817_v16, 0.0  ;;  %v1242_v29 = vmax.f32 %v2821_v25, 0.0  ;;  %v1243_v22 = vmax.f32 %v2825_v37, 0.0  ;;  %v1244_v10 = vmax.f32 %v2829_v49, 0.0 }
 0x20a   :  { %1293 = vst.msk [vmem:[%s3323_s4 + $0x30] sm:$0xff] %vm741_vm1, %v1229_v42  ;;  %1294 = vst.msk [vmem:[%s3323_s4 + $0x38] sm:$0xff] %vm741_vm1, %v1230_v55  ;;  %v1245_v30 = vmax.f32 %v2833_v60, 0.0  ;;  %v1246_v28 = vmax.f32 %v2837_v8, 0.0  ;;  %v1247_v33 = vmax.f32 %v2841_v19, 0.0  ;;  %v1248_v44 = vmax.f32 %v2845_v34, 0.0 }
 0x20b   :  { %1295 = vst.msk [vmem:[%s3323_s4 + $0x40] sm:$0xff] %vm741_vm1, %v1231_v54  ;;  %1296 = vst.msk [vmem:[%s3323_s4 + $0x48] sm:$0xff] %vm741_vm1, %v1232_v18  ;;  %v1249_v53 = vmax.f32 %v2849_v47, 0.0  ;;  %v1250_v62 = vmax.f32 %v2853_v63, 0.0  ;;  %v1251_v7 = vmax.f32 %v2857_v14, 0.0  ;;  %v1252_v16 = vmax.f32 %v2861_v6, 0.0 }
 0x20c   :  { %1297 = vst.msk [vmem:[%s3323_s4 + $0x50] sm:$0xff] %vm741_vm1, %v1233_v5  ;;  %1298 = vst.msk [vmem:[%s3323_s4 + $0x58] sm:$0xff] %vm741_vm1, %v1234_v39  ;;  %v1253_v25 = vmax.f32 %v2865_v50, 0.0  ;;  %v1254_v37 = vmax.f32 %v2869_v46, 0.0  ;;  %v1255_v49 = vmax.f32 %v2873_v56, 0.0  ;;  %v1256_v60 = vmax.f32 %v2877_v36, 0.0 }
 0x20d   :  { %1299 = vst.msk [vmem:[%s3323_s4 + $0x60] sm:$0xff] %vm741_vm1, %v1235_v58  ;;  %1300 = vst.msk [vmem:[%s3323_s4 + $0x68] sm:$0xff] %vm741_vm1, %v1236_v12  ;;  %v1257_v8 = vmax.f32 %v2881_v41, 0.0  ;;  %v1258_v19 = vmax.f32 %v2885_v23, 0.0  ;;  %v1259_v34 = vmax.f32 %v2889_v4, 0.0  ;;  %v1260_v47 = vmax.f32 %v2893_v45, 0.0 }
 0x20e   :  { %1301 = vst.msk [vmem:[%s3323_s4 + $0x70] sm:$0xff] %vm741_vm1, %v1237_v3  ;;  %1302 = vst.msk [vmem:[%s3323_s4 + $0x78] sm:$0xff] %vm741_vm1, %v1238_v51  ;;  %v1261_v63 = vmax.f32 %v2897_v0, 0.0  ;;  %v1262_v14 = vmax.f32 %v2901_v61, 0.0  ;;  %v1263_v6 = vmax.f32 %v2905_v26, 0.0  ;;  %v1264_v50 = vmax.f32 %v2909_v9, 0.0 }
 0x20f   :  { %1303 = vst.msk [vmem:[%s3323_s4 + $0x80] sm:$0xff] %vm741_vm1, %v1239_v17  ;;  %1304 = vst.msk [vmem:[%s3323_s4 + $0x88] sm:$0xff] %vm741_vm1, %v1240_v27  ;;  %v1265_v46 = vmax.f32 %v2913_v32, 0.0  ;;  %v1266_v56 = vmax.f32 %v2917_v43, 0.0  ;;  %v1267_v36 = vmax.f32 %v2921_v15, 0.0  ;;  %v1268_v41 = vmax.f32 %v2925_v38, 0.0 }
 0x210   :  { %1305 = vst.msk [vmem:[%s3323_s4 + $0x90] sm:$0xff] %vm741_vm1, %v1241_v52  ;;  %1306 = vst.msk [vmem:[%s3323_s4 + $0x98] sm:$0xff] %vm741_vm1, %v1242_v29  ;;  %v1269_v23 = vmax.f32 %v2929_v48, 0.0  ;;  %v1270_v4 = vmax.f32 %v2933_v57, 0.0  ;;  %v3435_v45 = vld [vmem:[#allocation19_spill] sm:$0xff]  ;;  %v3436_v61 = vld [vmem:[#allocation21_spill] sm:$0xff] }
 0x211   :  { %1307 = vst.msk [vmem:[%s3323_s4 + $0xa0] sm:$0xff] %vm741_vm1, %v1243_v22  ;;  %1308 = vst.msk [vmem:[%s3323_s4 + $0xa8] sm:$0xff] %vm741_vm1, %v1244_v10  ;;  %v1271_v0 = vmax.f32 %v3435_v45, 0.0  ;;  %v1272_v26 = vmax.f32 %v3436_v61, 0.0  ;;  %v3437_v9 = vld [vmem:[#allocation23_spill] sm:$0xff]  ;;  %v3438_v43 = vld [vmem:[#allocation25_spill] sm:$0xff] }
 0x212   :  { %1309 = vst.msk [vmem:[%s3323_s4 + $0xb0] sm:$0xff] %vm741_vm1, %v1245_v30  ;;  %1310 = vst.msk [vmem:[%s3323_s4 + $0xb8] sm:$0xff] %vm741_vm1, %v1246_v28  ;;  %v1273_v32 = vmax.f32 %v3437_v9, 0.0  ;;  %v1274_v15 = vmax.f32 %v3438_v43, 0.0  ;;  %v3439_v38 = vld [vmem:[#allocation2_spill] sm:$0xff]  ;;  %v1277_v2 = vmax.f32 %v2961_v11, 0.0 }
 0x213   :  { %1311 = vst.msk [vmem:[%s3323_s4 + $0xc0] sm:$0xff] %vm741_vm1, %v1247_v33  ;;  %1312 = vst.msk [vmem:[%s3323_s4 + $0xc8] sm:$0xff] %vm741_vm1, %v1248_v44  ;;  %v1275_v48 = vmax.f32 %v3439_v38, 0.0  ;;  %v3440_v57 = vld [vmem:[#allocation10_spill] sm:$0xff]  ;;  %v1278_v20 = vmax.f32 %v2965_v31, 0.0  ;;  %v1279_v11 = vmax.f32 %v2969_v35, 0.0 }
 0x214   :  { %1313 = vst.msk [vmem:[%s3323_s4 + $0xd0] sm:$0xff] %vm741_vm1, %v1249_v53  ;;  %1314 = vst.msk [vmem:[%s3323_s4 + $0xd8] sm:$0xff] %vm741_vm1, %v1250_v62  ;;  %v1276_v21 = vmax.f32 %v3440_v57, 0.0  ;;  %v1280_v31 = vmax.f32 %v2973_v59, 0.0  ;;  %v3441_v42 = vld [vmem:[#allocation12_spill] sm:$0xff]  ;;  %v3442_v13 = vld [vmem:[#allocation14_spill] sm:$0xff] }
 0x215   :  { %1315 = vst.msk [vmem:[%s3323_s4 + $0xe0] sm:$0xff] %vm741_vm1, %v1251_v7  ;;  %1316 = vst.msk [vmem:[%s3323_s4 + $0xe8] sm:$0xff] %vm741_vm1, %v1252_v16  ;;  %v1281_v54 = vmax.f32 %v3441_v42, 0.0  ;;  %v1282_v24 = vmax.f32 %v3442_v13, 0.0  ;;  %v3443_v35 = vld [vmem:[#allocation16_spill] sm:$0xff]  ;;  %v3444_v40 = vld [vmem:[#allocation18_spill] sm:$0xff] }
 0x216   :  { %1317 = vst.msk [vmem:[%s3323_s4 + $0xf0] sm:$0xff] %vm741_vm1, %v1253_v25  ;;  %1318 = vst.msk [vmem:[%s3323_s4 + $0xf8] sm:$0xff] %vm741_vm1, %v1254_v37  ;;  %v1283_v59 = vmax.f32 %v3443_v35, 0.0  ;;  %v1284_v55 = vmax.f32 %v3444_v40, 0.0  ;;  %v3445_v18 = vld [vmem:[#allocation20_spill] sm:$0xff]  ;;  %v1286_v39 = vmax.f32 %v2997_v1, 0.0 }
 0x217   :  { %1319 = vst.msk [vmem:[%s3323_s4 + $0x100] sm:$0xff] %vm741_vm1, %v1255_v49  ;;  %1320 = vst.msk [vmem:[%s3323_s4 + $0x108] sm:$0xff] %vm741_vm1, %v1256_v60  ;;  %v1285_v5 = vmax.f32 %v3445_v18, 0.0 }
 0x218   :  { %1321 = vst.msk [vmem:[%s3323_s4 + $0x110] sm:$0xff] %vm741_vm1, %v1257_v8  ;;  %1322 = vst.msk [vmem:[%s3323_s4 + $0x118] sm:$0xff] %vm741_vm1, %v1258_v19 }
 0x219   :  { %1323 = vst.msk [vmem:[%s3323_s4 + $0x120] sm:$0xff] %vm741_vm1, %v1259_v34  ;;  %1324 = vst.msk [vmem:[%s3323_s4 + $0x128] sm:$0xff] %vm741_vm1, %v1260_v47 }
 0x21a   :  { %1325 = vst.msk [vmem:[%s3323_s4 + $0x130] sm:$0xff] %vm741_vm1, %v1261_v63  ;;  %1326 = vst.msk [vmem:[%s3323_s4 + $0x138] sm:$0xff] %vm741_vm1, %v1262_v14 }
 0x21b   :  { %1327 = vst.msk [vmem:[%s3323_s4 + $0x140] sm:$0xff] %vm741_vm1, %v1263_v6  ;;  %1328 = vst.msk [vmem:[%s3323_s4 + $0x148] sm:$0xff] %vm741_vm1, %v1264_v50 }
 0x21c   :  { %1329 = vst.msk [vmem:[%s3323_s4 + $0x150] sm:$0xff] %vm741_vm1, %v1265_v46  ;;  %1330 = vst.msk [vmem:[%s3323_s4 + $0x158] sm:$0xff] %vm741_vm1, %v1266_v56 }
 0x21d   :  { %1331 = vst.msk [vmem:[%s3323_s4 + $0x160] sm:$0xff] %vm741_vm1, %v1267_v36  ;;  %1332 = vst.msk [vmem:[%s3323_s4 + $0x168] sm:$0xff] %vm741_vm1, %v1268_v41 }
 0x21e   :  { %1333 = vst.msk [vmem:[%s3323_s4 + $0x170] sm:$0xff] %vm741_vm1, %v1269_v23  ;;  %1334 = vst.msk [vmem:[%s3323_s4 + $0x178] sm:$0xff] %vm741_vm1, %v1270_v4 }
 0x21f   :  { %1335 = vst.msk [vmem:[%s3323_s4 + $0x180] sm:$0xff] %vm741_vm1, %v1271_v0  ;;  %1336 = vst.msk [vmem:[%s3323_s4 + $0x188] sm:$0xff] %vm741_vm1, %v1272_v26 }
 0x220   :  { %1337 = vst.msk [vmem:[%s3323_s4 + $0x190] sm:$0xff] %vm741_vm1, %v1273_v32  ;;  %1338 = vst.msk [vmem:[%s3323_s4 + $0x198] sm:$0xff] %vm741_vm1, %v1274_v15 }
 0x221   :  { %1339 = vst.msk [vmem:[%s3323_s4 + $0x1a0] sm:$0xff] %vm741_vm1, %v1275_v48  ;;  %1340 = vst.msk [vmem:[%s3323_s4 + $0x1a8] sm:$0xff] %vm741_vm1, %v1276_v21 }
 0x222   :  { %1341 = vst.msk [vmem:[%s3323_s4 + $0x1b0] sm:$0xff] %vm741_vm1, %v1277_v2  ;;  %1342 = vst.msk [vmem:[%s3323_s4 + $0x1b8] sm:$0xff] %vm741_vm1, %v1278_v20 }
 0x223   :  { %1343 = vst.msk [vmem:[%s3323_s4 + $0x1c0] sm:$0xff] %vm741_vm1, %v1279_v11  ;;  %1344 = vst.msk [vmem:[%s3323_s4 + $0x1c8] sm:$0xff] %vm741_vm1, %v1280_v31 }
 0x224   :  { %1345 = vst.msk [vmem:[%s3323_s4 + $0x1d0] sm:$0xff] %vm741_vm1, %v1281_v54  ;;  %1346 = vst.msk [vmem:[%s3323_s4 + $0x1d8] sm:$0xff] %vm741_vm1, %v1282_v24 }
 0x225   :  { %1347 = vst.msk [vmem:[%s3323_s4 + $0x1e0] sm:$0xff] %vm741_vm1, %v1283_v59  ;;  %1348 = vst.msk [vmem:[%s3323_s4 + $0x1e8] sm:$0xff] %vm741_vm1, %v1284_v55 }
 0x226   :  { %1349 = vst.msk [vmem:[%s3323_s4 + $0x1f0] sm:$0xff] %vm741_vm1, %v1285_v5  ;;  %1350 = vst.msk [vmem:[%s3323_s4 + $0x1f8] sm:$0xff] %vm741_vm1, %v1286_v39 }

// kernel: st_res_block_forward.5
= control target key start
LH: loop header
LB: loop body
LE: loop exit
PB: predicated region body
PF: predicated region fallthrough
CT: control target
= control target key end

     0   :  { %vm95_vm0 = vcmask 883712   ;;  %vm288_vm1 = vcmask 1043456   ;;  %vm1605_vm2 = vmmov 1   ;;  %vm677_vm4 = vcmask 130048   ;;  %s3235_s1 = inlined_call_operand.vmem [shape: f32[108,16], index: 1, kind: input, shape index: {}]   ;;  %s3236_s0 = inlined_call_operand.vmem [shape: f32[512,108], index: 0, kind: input, shape index: {}]   ;;  %s3237_s2 = inlined_call_operand.vmem [shape: f32[1,16], index: 2, kind: input, shape index: {}]   ;;  %s3238_s3 = inlined_call_operand.vmem [shape: f32[1,16], index: 3, kind: input, shape index: {}]   ;;  %s3239_s4 = inlined_call_operand.vmem [shape: f32[512,16], index: 4, kind: output, shape index: {}]  }
   0x1   :  { %v81_v0 = vld [vmem:[%s3235_s1] sm:$0xff]  ;;  %v82_v1 = vld [vmem:[%s3235_s1 + $0x8] sm:$0xff]  ;;  %v83_v2 = vld [vmem:[%s3235_s1 + $0x10] sm:$0xff] }
   0x2   :  { %v1558_v3 = vpack.c.bf16 %v82_v1, %v81_v0  ;;  %v84_v4 = vld [vmem:[%s3235_s1 + $0x18] sm:$0xff]  ;;  %v85_v6 = vld [vmem:[%s3235_s1 + $0x20] sm:$0xff]  ;;  %v86_v7 = vld [vmem:[%s3235_s1 + $0x28] sm:$0xff] }
   0x3   :  { %v1562_v5 = vpack.c.bf16 %v84_v4, %v83_v2  ;;  %v1566_v8 = vpack.c.bf16 %v86_v7, %v85_v6  ;;  %v17_v9 = vld [vmem:[%s3236_s0] sm:$0xff]  ;;  %v87_v10 = vld [vmem:[%s3235_s1 + $0x30] sm:$0xff]  ;;  %v88_v11 = vld [vmem:[%s3235_s1 + $0x38] sm:$0xff] }
   0x4   :  { %1559 = vmatprep.subr.bf16.mxu0 %v1558_v3  ;;  %1588 = vmatprep.subr.bf16.mxu1 %v1558_v3  ;;  %v1570_v12 = vpack.c.bf16 %v88_v11, %v87_v10  ;;  %v89_v13 = vld [vmem:[%s3235_s1 + $0x40] sm:$0xff]  ;;  %v90_v14 = vld [vmem:[%s3235_s1 + $0x48] sm:$0xff]  ;;  %v91_v16 = vld [vmem:[%s3235_s1 + $0x50] sm:$0xff] }
   0x5   :  { %1561 = vmatpush3.bf16.msra.mxu0 %v1558_v3  ;;  %1595 = vmatpush3.bf16.msra.mxu1 %v1558_v3  ;;  %v1574_v15 = vpack.c.bf16 %v90_v14, %v89_v13  ;;  %v92_v17 = vld [vmem:[%s3235_s1 + $0x58] sm:$0xff]  ;;  %v49_v18 = vld [vmem:[%s3236_s0 + $0x100] sm:$0xff]  ;;  %v94_v21 = vld [vmem:[%s3235_s1 + $0x68] sm:$0xf] }
   0x6   :  { %1563 = vmatprep.subr.bf16.mxu0 %v1562_v5  ;;  %1589 = vmatprep.subr.bf16.mxu1 %v1562_v5  ;;  %v1578_v19 = vpack.c.bf16 %v92_v17, %v91_v16  ;;  %v93_v20 = vld [vmem:[%s3235_s1 + $0x60] sm:$0xff]  ;;  %vm1583_vm3 = vmpackc.low %vm288_vm1, %vm1605_vm2  ;;  %v18_v23 = vld [vmem:[%s3236_s0 + $0x8] sm:$0xff] }
   0x7   :  { %1462 = vmatprep.mubr.msk.f32.mxu0 %vm95_vm0, %v17_v9  ;;  %1510 = vmatprep.mubr.msk.f32.mxu1 %vm95_vm0, %v49_v18  ;;  %v1582_v22 = vpack.c.bf16 %v94_v21, %v93_v20  ;;  %v50_v24 = vld [vmem:[%s3236_s0 + $0x108] sm:$0xff]  ;;  %v19_v25 = vld [vmem:[%s3236_s0 + $0x10] sm:$0xff]  ;;  %v20_v27 = vld [vmem:[%s3236_s0 + $0x18] sm:$0xff] }
   0x8   :  { %v51_v26 = vld [vmem:[%s3236_s0 + $0x110] sm:$0xff]  ;;  %v52_v28 = vld [vmem:[%s3236_s0 + $0x118] sm:$0xff]  ;;  %v21_v29 = vld [vmem:[%s3236_s0 + $0x20] sm:$0xff] }
   0x9   :  { %1565 = vmatpush3.bf16.msra.mxu0 %v1562_v5  ;;  %1596 = vmatpush3.bf16.msra.mxu1 %v1562_v5  ;;  %v53_v30 = vld [vmem:[%s3236_s0 + $0x120] sm:$0xff]  ;;  %v22_v31 = vld [vmem:[%s3236_s0 + $0x28] sm:$0xff]  ;;  %v23_v33 = vld [vmem:[%s3236_s0 + $0x30] sm:$0xff] }
   0xa   :  { %1567 = vmatprep.subr.bf16.mxu0 %v1566_v8  ;;  %1590 = vmatprep.subr.bf16.mxu1 %v1566_v8  ;;  %v54_v32 = vld [vmem:[%s3236_s0 + $0x128] sm:$0xff]  ;;  %v55_v34 = vld [vmem:[%s3236_s0 + $0x130] sm:$0xff]  ;;  %v24_v35 = vld [vmem:[%s3236_s0 + $0x38] sm:$0xff] }
   0xb   :  { %v56_v36 = vld [vmem:[%s3236_s0 + $0x138] sm:$0xff]  ;;  %v25_v37 = vld [vmem:[%s3236_s0 + $0x40] sm:$0xff]  ;;  %v26_v39 = vld [vmem:[%s3236_s0 + $0x48] sm:$0xff] }
   0xc   :  { %v57_v38 = vld [vmem:[%s3236_s0 + $0x140] sm:$0xff]  ;;  %v58_v40 = vld [vmem:[%s3236_s0 + $0x148] sm:$0xff]  ;;  %v27_v41 = vld [vmem:[%s3236_s0 + $0x50] sm:$0xff] }
   0xd   :  { %1569 = vmatpush3.bf16.msra.mxu0 %v1566_v8  ;;  %1597 = vmatpush3.bf16.msra.mxu1 %v1566_v8  ;;  %v59_v42 = vld [vmem:[%s3236_s0 + $0x150] sm:$0xff]  ;;  %v28_v43 = vld [vmem:[%s3236_s0 + $0x58] sm:$0xff]  ;;  %v29_v45 = vld [vmem:[%s3236_s0 + $0x60] sm:$0xff] }
   0xe   :  { %1571 = vmatprep.subr.bf16.mxu0 %v1570_v12  ;;  %1591 = vmatprep.subr.bf16.mxu1 %v1570_v12  ;;  %v60_v44 = vld [vmem:[%s3236_s0 + $0x158] sm:$0xff]  ;;  %v61_v46 = vld [vmem:[%s3236_s0 + $0x160] sm:$0xff]  ;;  %v30_v47 = vld [vmem:[%s3236_s0 + $0x68] sm:$0xff] }
   0xf   :  { %v62_v48 = vld [vmem:[%s3236_s0 + $0x168] sm:$0xff]  ;;  %v31_v49 = vld [vmem:[%s3236_s0 + $0x70] sm:$0xff]  ;;  %v32_v51 = vld [vmem:[%s3236_s0 + $0x78] sm:$0xff] }
  0x10   :  { %v63_v50 = vld [vmem:[%s3236_s0 + $0x170] sm:$0xff]  ;;  %v64_v52 = vld [vmem:[%s3236_s0 + $0x178] sm:$0xff]  ;;  %v33_v53 = vld [vmem:[%s3236_s0 + $0x80] sm:$0xff] }
  0x11   :  { %1573 = vmatpush3.bf16.msra.mxu0 %v1570_v12  ;;  %1598 = vmatpush3.bf16.msra.mxu1 %v1570_v12  ;;  %v65_v54 = vld [vmem:[%s3236_s0 + $0x180] sm:$0xff]  ;;  %v34_v55 = vld [vmem:[%s3236_s0 + $0x88] sm:$0xff]  ;;  %v35_v57 = vld [vmem:[%s3236_s0 + $0x90] sm:$0xff] }
  0x12   :  { %1575 = vmatprep.subr.bf16.mxu0 %v1574_v15  ;;  %1592 = vmatprep.subr.bf16.mxu1 %v1574_v15  ;;  %v66_v56 = vld [vmem:[%s3236_s0 + $0x188] sm:$0xff]  ;;  %v67_v58 = vld [vmem:[%s3236_s0 + $0x190] sm:$0xff]  ;;  %v36_v59 = vld [vmem:[%s3236_s0 + $0x98] sm:$0xff] }
  0x13   :  { %v68_v60 = vld [vmem:[%s3236_s0 + $0x198] sm:$0xff]  ;;  %v37_v61 = vld [vmem:[%s3236_s0 + $0xa0] sm:$0xff]  ;;  %v38_v63 = vld [vmem:[%s3236_s0 + $0xa8] sm:$0xff] }
  0x14   :  { %v69_v62 = vld [vmem:[%s3236_s0 + $0x1a0] sm:$0xff]  ;;  %v70_v0 = vld [vmem:[%s3236_s0 + $0x1a8] sm:$0xff]  ;;  %v39_v1 = vld [vmem:[%s3236_s0 + $0xb0] sm:$0xff] }
  0x15   :  { %1577 = vmatpush3.bf16.msra.mxu0 %v1574_v15  ;;  %1599 = vmatpush3.bf16.msra.mxu1 %v1574_v15  ;;  %v71_v2 = vld [vmem:[%s3236_s0 + $0x1b0] sm:$0xff]  ;;  %v40_v3 = vld [vmem:[%s3236_s0 + $0xb8] sm:$0xff]  ;;  %v41_v5 = vld [vmem:[%s3236_s0 + $0xc0] sm:$0xff] }
  0x16   :  { %1579 = vmatprep.subr.bf16.mxu0 %v1578_v19  ;;  %1593 = vmatprep.subr.bf16.mxu1 %v1578_v19  ;;  %v72_v4 = vld [vmem:[%s3236_s0 + $0x1b8] sm:$0xff]  ;;  %v73_v6 = vld [vmem:[%s3236_s0 + $0x1c0] sm:$0xff]  ;;  %v42_v7 = vld [vmem:[%s3236_s0 + $0xc8] sm:$0xff] }
  0x17   :  { %v74_v8 = vld [vmem:[%s3236_s0 + $0x1c8] sm:$0xff]  ;;  %v43_v9 = vld [vmem:[%s3236_s0 + $0xd0] sm:$0xff]  ;;  %v44_v11 = vld [vmem:[%s3236_s0 + $0xd8] sm:$0xff] }
  0x18   :  { %v75_v10 = vld [vmem:[%s3236_s0 + $0x1d0] sm:$0xff]  ;;  %v76_v12 = vld [vmem:[%s3236_s0 + $0x1d8] sm:$0xff]  ;;  %v45_v13 = vld [vmem:[%s3236_s0 + $0xe0] sm:$0xff] }
  0x19   :  { %1581 = vmatpush3.bf16.msra.mxu0 %v1578_v19  ;;  %1600 = vmatpush3.bf16.msra.mxu1 %v1578_v19  ;;  %v77_v14 = vld [vmem:[%s3236_s0 + $0x1e0] sm:$0xff]  ;;  %v46_v15 = vld [vmem:[%s3236_s0 + $0xe8] sm:$0xff]  ;;  %v47_v17 = vld [vmem:[%s3236_s0 + $0xf0] sm:$0xff] }
  0x1a   :  { %1584 = vmatprep.subr.msk.bf16.mxu0 %vm1583_vm3, %v1582_v22  ;;  %1594 = vmatprep.subr.msk.bf16.mxu1 %vm1583_vm3, %v1582_v22  ;;  %v78_v16 = vld [vmem:[%s3236_s0 + $0x1e8] sm:$0xff]  ;;  %v79_v18 = vld [vmem:[%s3236_s0 + $0x1f0] sm:$0xff]  ;;  %v48_v19 = vld [vmem:[%s3236_s0 + $0xf8] sm:$0xff] }
  0x1b   :  { %v80_v20 = vld [vmem:[%s3236_s0 + $0x1f8] sm:$0xff] }
  0x1d   :  { %1587 = vmatpush3.bf16.msk.msra.mxu0 %vm1583_vm3, %v1582_v22  ;;  %1601 = vmatpush3.bf16.msk.msra.mxu1 %vm1583_vm3, %v1582_v22 }
  0x20   :  { %1463 = vmatmul.mubr.msk.f32.vlgmr.msra.gmra.mrb[0].mxu0 %vm95_vm0, %v18_v23  ;;  %1511 = vmatmul.mubr.msk.f32.vlgmr.msra.gmra.mrb[0].mxu1 %vm95_vm0, %v50_v24 }
  0x21   :  { %1465 = vmatprep.mubr.msk.f32.mxu0 %vm95_vm0, %v19_v25  ;;  %1513 = vmatprep.mubr.msk.f32.mxu1 %vm95_vm0, %v51_v26 }
  0x24   :  { %1466 = vmatmul.mubr.msk.f32.gmra.mrb[2].mxu0 %vm95_vm0, %v20_v27  ;;  %1514 = vmatmul.mubr.msk.f32.gmra.mrb[2].mxu1 %vm95_vm0, %v52_v28 }
  0x25   :  { %1468 = vmatprep.mubr.msk.f32.mxu0 %vm95_vm0, %v21_v29  ;;  %1516 = vmatprep.mubr.msk.f32.mxu1 %vm95_vm0, %v53_v30 }
  0x28   :  { %1469 = vmatmul.mubr.msk.f32.gmra.mrb[4].mxu0 %vm95_vm0, %v22_v31  ;;  %1517 = vmatmul.mubr.msk.f32.gmra.mrb[4].mxu1 %vm95_vm0, %v54_v32 }
  0x29   :  { %1471 = vmatprep.mubr.msk.f32.mxu0 %vm95_vm0, %v23_v33  ;;  %1519 = vmatprep.mubr.msk.f32.mxu1 %vm95_vm0, %v55_v34 }
  0x2c   :  { %1472 = vmatmul.mubr.msk.f32.gmra.mrb[6].mxu0 %vm95_vm0, %v24_v35  ;;  %1520 = vmatmul.mubr.msk.f32.gmra.mrb[6].mxu1 %vm95_vm0, %v56_v36 }
  0x2d   :  { %1474 = vmatprep.mubr.msk.f32.mxu0 %vm95_vm0, %v25_v37  ;;  %1522 = vmatprep.mubr.msk.f32.mxu1 %vm95_vm0, %v57_v38 }
  0x30   :  { %1475 = vmatmul.mubr.msk.f32.gmra.mrb[8].mxu0 %vm95_vm0, %v26_v39  ;;  %1523 = vmatmul.mubr.msk.f32.gmra.mrb[8].mxu1 %vm95_vm0, %v58_v40 }
  0x31   :  { %1477 = vmatprep.mubr.msk.f32.mxu0 %vm95_vm0, %v27_v41  ;;  %1525 = vmatprep.mubr.msk.f32.mxu1 %vm95_vm0, %v59_v42 }
  0x34   :  { %1478 = vmatmul.mubr.msk.f32.gmra.mrb[10].mxu0 %vm95_vm0, %v28_v43  ;;  %1526 = vmatmul.mubr.msk.f32.gmra.mrb[10].mxu1 %vm95_vm0, %v60_v44 }
  0x35   :  { %1480 = vmatprep.mubr.msk.f32.mxu0 %vm95_vm0, %v29_v45  ;;  %1528 = vmatprep.mubr.msk.f32.mxu1 %vm95_vm0, %v61_v46 }
  0x38   :  { %1481 = vmatmul.mubr.msk.f32.gmra.mrb[12].mxu0 %vm95_vm0, %v30_v47  ;;  %1529 = vmatmul.mubr.msk.f32.gmra.mrb[12].mxu1 %vm95_vm0, %v62_v48 }
  0x39   :  { %1483 = vmatprep.mubr.msk.f32.mxu0 %vm95_vm0, %v31_v49  ;;  %1531 = vmatprep.mubr.msk.f32.mxu1 %vm95_vm0, %v63_v50 }
  0x3c   :  { %1484 = vmatmul.mubr.msk.f32.gmra.mrb[14].mxu0 %vm95_vm0, %v32_v51  ;;  %1532 = vmatmul.mubr.msk.f32.gmra.mrb[14].mxu1 %vm95_vm0, %v64_v52 }
  0x3d   :  { %1486 = vmatprep.mubr.msk.f32.mxu0 %vm95_vm0, %v33_v53  ;;  %1534 = vmatprep.mubr.msk.f32.mxu1 %vm95_vm0, %v65_v54 }
  0x40   :  { %1487 = vmatmul.mubr.msk.f32.gmra.mrb[16].mxu0 %vm95_vm0, %v34_v55  ;;  %1535 = vmatmul.mubr.msk.f32.gmra.mrb[16].mxu1 %vm95_vm0, %v66_v56 }
  0x41   :  { %1489 = vmatprep.mubr.msk.f32.mxu0 %vm95_vm0, %v35_v57  ;;  %1537 = vmatprep.mubr.msk.f32.mxu1 %vm95_vm0, %v67_v58 }
  0x44   :  { %1490 = vmatmul.mubr.msk.f32.gmra.mrb[18].mxu0 %vm95_vm0, %v36_v59  ;;  %1538 = vmatmul.mubr.msk.f32.gmra.mrb[18].mxu1 %vm95_vm0, %v68_v60 }
  0x45   :  { %1492 = vmatprep.mubr.msk.f32.mxu0 %vm95_vm0, %v37_v61  ;;  %1540 = vmatprep.mubr.msk.f32.mxu1 %vm95_vm0, %v69_v62 }
  0x48   :  { %1493 = vmatmul.mubr.msk.f32.gmra.mrb[20].mxu0 %vm95_vm0, %v38_v63  ;;  %1541 = vmatmul.mubr.msk.f32.gmra.mrb[20].mxu1 %vm95_vm0, %v70_v0 }
  0x49   :  { %1495 = vmatprep.mubr.msk.f32.mxu0 %vm95_vm0, %v39_v1  ;;  %1543 = vmatprep.mubr.msk.f32.mxu1 %vm95_vm0, %v71_v2 }
  0x4c   :  { %1496 = vmatmul.mubr.msk.f32.gmra.mrb[22].mxu0 %vm95_vm0, %v40_v3  ;;  %1544 = vmatmul.mubr.msk.f32.gmra.mrb[22].mxu1 %vm95_vm0, %v72_v4 }
  0x4d   :  { %1498 = vmatprep.mubr.msk.f32.mxu0 %vm95_vm0, %v41_v5  ;;  %1546 = vmatprep.mubr.msk.f32.mxu1 %vm95_vm0, %v73_v6 }
  0x50   :  { %1499 = vmatmul.mubr.msk.f32.gmra.mrb[24].mxu0 %vm95_vm0, %v42_v7  ;;  %1547 = vmatmul.mubr.msk.f32.gmra.mrb[24].mxu1 %vm95_vm0, %v74_v8 }
  0x51   :  { %1501 = vmatprep.mubr.msk.f32.mxu0 %vm95_vm0, %v43_v9  ;;  %1549 = vmatprep.mubr.msk.f32.mxu1 %vm95_vm0, %v75_v10 }
  0x54   :  { %1502 = vmatmul.mubr.msk.f32.gmra.mrb[26].mxu0 %vm95_vm0, %v44_v11  ;;  %1550 = vmatmul.mubr.msk.f32.gmra.mrb[26].mxu1 %vm95_vm0, %v76_v12 }
  0x55   :  { %1504 = vmatprep.mubr.msk.f32.mxu0 %vm95_vm0, %v45_v13  ;;  %1552 = vmatprep.mubr.msk.f32.mxu1 %vm95_vm0, %v77_v14 }
  0x58   :  { %1505 = vmatmul.mubr.msk.f32.gmra.mrb[28].mxu0 %vm95_vm0, %v46_v15  ;;  %1553 = vmatmul.mubr.msk.f32.gmra.mrb[28].mxu1 %vm95_vm0, %v78_v16 }
  0x59   :  { %1507 = vmatprep.mubr.msk.f32.mxu0 %vm95_vm0, %v47_v17  ;;  %1555 = vmatprep.mubr.msk.f32.mxu1 %vm95_vm0, %v79_v18 }
  0x5c   :  { %1508 = vmatmul.mubr.msk.f32.gmra.mrb[30].mxu0 %vm95_vm0, %v48_v19  ;;  %1556 = vmatmul.mubr.msk.f32.gmra.mrb[30].mxu1 %vm95_vm0, %v80_v20 }
  0xf3   :  { %v1929_v21 = vpop.f32.mrb[0].mxu0  ;;  %v1931_v22 = vpop.f32.mrb[0].mxu1 }
  0xf4   :  { %v679_v23 = vsel %vm677_vm4, %v1929_v21, 0.0  ;;  %v812_v24 = vmul.f32 %v1929_v21, %v1929_v21  ;;  %v1937_v25 = vpop.f32.mrb[1].mxu0  ;;  %v1939_v26 = vpop.f32.mrb[1].mxu1 }
  0xf5   :  { %v678_v27 = vsel %vm677_vm4, %v1937_v25, 0.0  ;;  %v811_v28 = vmul.f32 %v1937_v25, %v1937_v25 }
  0xf6   :  { %v876_v29 = vsel %vm677_vm4, %v812_v24, 0.0  ;;  %v680_v30 = vadd.f32 %v679_v23, %v678_v27 }
  0xf7   :  { %v875_v31 = vsel %vm677_vm4, %v811_v28, 0.0  ;;  %v1947_v32 = vpop.f32.mrb[2].mxu0  ;;  %v1949_v33 = vpop.f32.mrb[2].mxu1 }
  0xf8   :  { %v877_v34 = vadd.f32 %v876_v29, %v875_v31  ;;  %v1951_v35 = vpop.f32.mrb[3].mxu0  ;;  %v1953_v36 = vpop.f32.mrb[3].mxu1  ;;  %v814_v37 = vmul.f32 %v1947_v32, %v1947_v32  ;;  %v683_v41 = vsel %vm677_vm4, %v1947_v32, 0.0 }
  0xf9   :  { %v681_v38 = vsel %vm677_vm4, %v1951_v35, 0.0  ;;  %v813_v39 = vmul.f32 %v1951_v35, %v1951_v35 }
  0xfa   :  { %v682_v40 = vadd.f32 %v681_v38, %v680_v30  ;;  %v880_v49 = vsel %vm677_vm4, %v814_v37, 0.0 }
  0xfb   :  { %v878_v42 = vsel %vm677_vm4, %v813_v39, 0.0  ;;  %v1964_v43 = vpop.f32.mrb[4].mxu0  ;;  %v1966_v44 = vpop.f32.mrb[4].mxu1 }
  0xfc   :  { %v879_v45 = vadd.f32 %v878_v42, %v877_v34  ;;  %v1968_v46 = vpop.f32.mrb[5].mxu0  ;;  %v684_v47 = vadd.f32 %v683_v41, %v682_v40  ;;  %v1970_v48 = vpop.f32.mrb[5].mxu1  ;;  %v816_v50 = vmul.f32 %v1964_v43, %v1964_v43  ;;  %v687_v55 = vsel %vm677_vm4, %v1964_v43, 0.0 }
  0xfd   :  { %v685_v51 = vsel %vm677_vm4, %v1968_v46, 0.0  ;;  %v815_v52 = vmul.f32 %v1968_v46, %v1968_v46 }
  0xfe   :  { %v686_v53 = vadd.f32 %v685_v51, %v684_v47  ;;  %v881_v54 = vadd.f32 %v880_v49, %v879_v45  ;;  %v884_v63 = vsel %vm677_vm4, %v816_v50, 0.0 }
  0xff   :  { %v882_v56 = vsel %vm677_vm4, %v815_v52, 0.0  ;;  %v1982_v57 = vpop.f32.mrb[6].mxu0  ;;  %v1984_v58 = vpop.f32.mrb[6].mxu1 }
 0x100   :  { %v883_v59 = vadd.f32 %v882_v56, %v881_v54  ;;  %v1986_v60 = vpop.f32.mrb[7].mxu0  ;;  %v688_v61 = vadd.f32 %v687_v55, %v686_v53  ;;  %v1988_v62 = vpop.f32.mrb[7].mxu1  ;;  %v818_v0 = vmul.f32 %v1982_v57, %v1982_v57  ;;  %v691_v5 = vsel %vm677_vm4, %v1982_v57, 0.0 }
 0x101   :  { %v689_v1 = vsel %vm677_vm4, %v1986_v60, 0.0  ;;  %v817_v2 = vmul.f32 %v1986_v60, %v1986_v60 }
 0x102   :  { %v690_v3 = vadd.f32 %v689_v1, %v688_v61  ;;  %v885_v4 = vadd.f32 %v884_v63, %v883_v59  ;;  %v888_v13 = vsel %vm677_vm4, %v818_v0, 0.0 }
 0x103   :  { %v886_v6 = vsel %vm677_vm4, %v817_v2, 0.0  ;;  %v2000_v7 = vpop.f32.mrb[8].mxu0  ;;  %v2002_v8 = vpop.f32.mrb[8].mxu1 }
 0x104   :  { %v887_v9 = vadd.f32 %v886_v6, %v885_v4  ;;  %v2004_v10 = vpop.f32.mrb[9].mxu0  ;;  %v692_v11 = vadd.f32 %v691_v5, %v690_v3  ;;  %v2006_v12 = vpop.f32.mrb[9].mxu1  ;;  %v820_v14 = vmul.f32 %v2000_v7, %v2000_v7  ;;  %v695_v19 = vsel %vm677_vm4, %v2000_v7, 0.0 }
 0x105   :  { %v693_v15 = vsel %vm677_vm4, %v2004_v10, 0.0  ;;  %v819_v16 = vmul.f32 %v2004_v10, %v2004_v10 }
 0x106   :  { %v694_v17 = vadd.f32 %v693_v15, %v692_v11  ;;  %v889_v18 = vadd.f32 %v888_v13, %v887_v9  ;;  %v892_v31 = vsel %vm677_vm4, %v820_v14, 0.0 }
 0x107   :  { %v890_v20 = vsel %vm677_vm4, %v819_v16, 0.0  ;;  %v2018_v23 = vpop.f32.mrb[10].mxu0  ;;  %v2020_v24 = vpop.f32.mrb[10].mxu1 }
 0x108   :  { %v891_v27 = vadd.f32 %v890_v20, %v889_v18  ;;  %v2022_v28 = vpop.f32.mrb[11].mxu0  ;;  %v696_v29 = vadd.f32 %v695_v19, %v694_v17  ;;  %v2024_v30 = vpop.f32.mrb[11].mxu1  ;;  %v822_v34 = vmul.f32 %v2018_v23, %v2018_v23  ;;  %v699_v41 = vsel %vm677_vm4, %v2018_v23, 0.0 }
 0x109   :  { %v697_v37 = vsel %vm677_vm4, %v2022_v28, 0.0  ;;  %v821_v38 = vmul.f32 %v2022_v28, %v2022_v28 }
 0x10a   :  { %v698_v39 = vadd.f32 %v697_v37, %v696_v29  ;;  %v893_v40 = vadd.f32 %v892_v31, %v891_v27  ;;  %v896_v53 = vsel %vm677_vm4, %v822_v34, 0.0 }
 0x10b   :  { %v894_v42 = vsel %vm677_vm4, %v821_v38, 0.0  ;;  %v2036_v45 = vpop.f32.mrb[12].mxu0  ;;  %v2038_v47 = vpop.f32.mrb[12].mxu1 }
 0x10c   :  { %3265 = vst [vmem:[#allocation2_spill] sm:$0xff] %v2036_v45  ;;  %v895_v49 = vadd.f32 %v894_v42, %v893_v40  ;;  %v2040_v50 = vpop.f32.mrb[13].mxu0  ;;  %v700_v51 = vadd.f32 %v699_v41, %v698_v39  ;;  %v2042_v52 = vpop.f32.mrb[13].mxu1  ;;  %v824_v54 = vmul.f32 %v2036_v45, %v2036_v45  ;;  %v703_v63 = vsel %vm677_vm4, %v2036_v45, 0.0 }
 0x10d   :  { %v701_v55 = vsel %vm677_vm4, %v2040_v50, 0.0  ;;  %v823_v56 = vmul.f32 %v2040_v50, %v2040_v50 }
 0x10e   :  { %v702_v59 = vadd.f32 %v701_v55, %v700_v51  ;;  %v897_v61 = vadd.f32 %v896_v53, %v895_v49  ;;  %v900_v9 = vsel %vm677_vm4, %v824_v54, 0.0 }
 0x10f   :  { %v898_v0 = vsel %vm677_vm4, %v823_v56, 0.0  ;;  %v2054_v1 = vpop.f32.mrb[14].mxu0  ;;  %v2056_v2 = vpop.f32.mrb[14].mxu1 }
 0x110   :  { %3266 = vst [vmem:[#allocation3_spill] sm:$0xff] %v2054_v1  ;;  %v899_v3 = vadd.f32 %v898_v0, %v897_v61  ;;  %v2058_v4 = vpop.f32.mrb[15].mxu0  ;;  %v704_v5 = vadd.f32 %v703_v63, %v702_v59  ;;  %v2060_v6 = vpop.f32.mrb[15].mxu1  ;;  %v826_v11 = vmul.f32 %v2054_v1, %v2054_v1  ;;  %v707_v17 = vsel %vm677_vm4, %v2054_v1, 0.0 }
 0x111   :  { %3267 = vst [vmem:[#allocation4_spill] sm:$0xff] %v2058_v4  ;;  %v705_v13 = vsel %vm677_vm4, %v2058_v4, 0.0  ;;  %v825_v14 = vmul.f32 %v2058_v4, %v2058_v4  ;;  %v844_v4 = vmul.f32 %v1931_v22, %v1931_v22 }
 0x112   :  { %v706_v15 = vadd.f32 %v705_v13, %v704_v5  ;;  %v901_v16 = vadd.f32 %v900_v9, %v899_v3  ;;  %v904_v37 = vsel %vm677_vm4, %v826_v11, 0.0 }
 0x113   :  { %v902_v18 = vsel %vm677_vm4, %v825_v14, 0.0  ;;  %v2072_v19 = vpop.f32.mrb[16].mxu0  ;;  %v2074_v20 = vpop.f32.mrb[16].mxu1 }
 0x114   :  { %3268 = vst [vmem:[#allocation5_spill] sm:$0xff] %v2072_v19  ;;  %v903_v27 = vadd.f32 %v902_v18, %v901_v16  ;;  %v2076_v29 = vpop.f32.mrb[17].mxu0  ;;  %v708_v31 = vadd.f32 %v707_v17, %v706_v15  ;;  %v2078_v34 = vpop.f32.mrb[17].mxu1  ;;  %v828_v38 = vmul.f32 %v2072_v19, %v2072_v19  ;;  %v711_v49 = vsel %vm677_vm4, %v2072_v19, 0.0 }
 0x115   :  { %3269 = vst [vmem:[#allocation6_spill] sm:$0xff] %v2076_v29  ;;  %v709_v39 = vsel %vm677_vm4, %v2076_v29, 0.0  ;;  %v827_v40 = vmul.f32 %v2076_v29, %v2076_v29  ;;  %v843_v29 = vmul.f32 %v1939_v26, %v1939_v26 }
 0x116   :  { %v710_v41 = vadd.f32 %v709_v39, %v708_v31  ;;  %v905_v42 = vadd.f32 %v904_v37, %v903_v27  ;;  %v908_v63 = vsel %vm677_vm4, %v828_v38, 0.0 }
 0x117   :  { %v906_v51 = vsel %vm677_vm4, %v827_v40, 0.0  ;;  %v2090_v53 = vpop.f32.mrb[18].mxu0  ;;  %v2092_v54 = vpop.f32.mrb[18].mxu1  ;;  %v938_v45 = vsel %vm677_vm4, %v843_v29, 0.0 }
 0x118   :  { %3270 = vst [vmem:[#allocation7_spill] sm:$0xff] %v2090_v53  ;;  %v907_v55 = vadd.f32 %v906_v51, %v905_v42  ;;  %v2094_v56 = vpop.f32.mrb[19].mxu0  ;;  %v712_v59 = vadd.f32 %v711_v49, %v710_v41  ;;  %v2096_v61 = vpop.f32.mrb[19].mxu1  ;;  %v830_v0 = vmul.f32 %v2090_v53, %v2090_v53  ;;  %v715_v13 = vsel %vm677_vm4, %v2090_v53, 0.0 }
 0x119   :  { %3271 = vst [vmem:[#allocation8_spill] sm:$0xff] %v2094_v56  ;;  %v713_v3 = vsel %vm677_vm4, %v2094_v56, 0.0  ;;  %v829_v5 = vmul.f32 %v2094_v56, %v2094_v56 }
 0x11a   :  { %v714_v9 = vadd.f32 %v713_v3, %v712_v59  ;;  %v909_v11 = vadd.f32 %v908_v63, %v907_v55  ;;  %v912_v37 = vsel %vm677_vm4, %v830_v0, 0.0 }
 0x11b   :  { %v910_v14 = vsel %vm677_vm4, %v829_v5, 0.0  ;;  %v2108_v15 = vpop.f32.mrb[20].mxu0  ;;  %v2110_v16 = vpop.f32.mrb[20].mxu1 }
 0x11c   :  { %3272 = vst [vmem:[#allocation9_spill] sm:$0xff] %v2108_v15  ;;  %v911_v17 = vadd.f32 %v910_v14, %v909_v11  ;;  %v2112_v18 = vpop.f32.mrb[21].mxu0  ;;  %v716_v27 = vadd.f32 %v715_v13, %v714_v9  ;;  %v2114_v31 = vpop.f32.mrb[21].mxu1  ;;  %v832_v38 = vmul.f32 %v2108_v15, %v2108_v15  ;;  %v719_v49 = vsel %vm677_vm4, %v2108_v15, 0.0 }
 0x11d   :  { %3273 = vst [vmem:[#allocation10_spill] sm:$0xff] %v2112_v18  ;;  %v717_v39 = vsel %vm677_vm4, %v2112_v18, 0.0  ;;  %v831_v40 = vmul.f32 %v2112_v18, %v2112_v18 }
 0x11e   :  { %v718_v41 = vadd.f32 %v717_v39, %v716_v27  ;;  %v913_v42 = vadd.f32 %v912_v37, %v911_v17  ;;  %v916_v9 = vsel %vm677_vm4, %v832_v38, 0.0 }
 0x11f   :  { %v914_v51 = vsel %vm677_vm4, %v831_v40, 0.0  ;;  %v2126_v55 = vpop.f32.mrb[22].mxu0  ;;  %v2128_v59 = vpop.f32.mrb[22].mxu1 }
 0x120   :  { %3274 = vst [vmem:[#allocation11_spill] sm:$0xff] %v2126_v55  ;;  %v915_v63 = vadd.f32 %v914_v51, %v913_v42  ;;  %v2130_v0 = vpop.f32.mrb[23].mxu0  ;;  %v720_v3 = vadd.f32 %v719_v49, %v718_v41  ;;  %v2132_v5 = vpop.f32.mrb[23].mxu1  ;;  %v834_v11 = vmul.f32 %v2126_v55, %v2126_v55  ;;  %v723_v37 = vsel %vm677_vm4, %v2126_v55, 0.0 }
 0x121   :  { %3275 = vst [vmem:[#allocation12_spill] sm:$0xff] %v2130_v0  ;;  %v721_v13 = vsel %vm677_vm4, %v2130_v0, 0.0  ;;  %v833_v14 = vmul.f32 %v2130_v0, %v2130_v0 }
 0x122   :  { %v722_v17 = vadd.f32 %v721_v13, %v720_v3  ;;  %v917_v27 = vadd.f32 %v916_v9, %v915_v63  ;;  %v920_v15 = vsel %vm677_vm4, %v834_v11, 0.0 }
 0x123   :  { %v918_v39 = vsel %vm677_vm4, %v833_v14, 0.0  ;;  %v2144_v40 = vpop.f32.mrb[24].mxu0  ;;  %v2146_v41 = vpop.f32.mrb[24].mxu1 }
 0x124   :  { %3276 = vst [vmem:[#allocation13_spill] sm:$0xff] %v2144_v40  ;;  %3277 = vst [vmem:[#allocation14_spill] sm:$0xff] %v2146_v41  ;;  %v919_v38 = vadd.f32 %v918_v39, %v917_v27  ;;  %v2148_v42 = vpop.f32.mrb[25].mxu0  ;;  %v724_v49 = vadd.f32 %v723_v37, %v722_v17  ;;  %v2150_v51 = vpop.f32.mrb[25].mxu1  ;;  %v836_v63 = vmul.f32 %v2144_v40, %v2144_v40  ;;  %v727_v27 = vsel %vm677_vm4, %v2144_v40, 0.0 }
 0x125   :  { %3278 = vst [vmem:[#allocation15_spill] sm:$0xff] %v2148_v42  ;;  %v725_v3 = vsel %vm677_vm4, %v2148_v42, 0.0  ;;  %v835_v9 = vmul.f32 %v2148_v42, %v2148_v42 }
 0x126   :  { %v726_v13 = vadd.f32 %v725_v3, %v724_v49  ;;  %v921_v14 = vadd.f32 %v920_v15, %v919_v38  ;;  %v924_v53 = vsel %vm677_vm4, %v836_v63, 0.0 }
 0x127   :  { %v922_v17 = vsel %vm677_vm4, %v835_v9, 0.0  ;;  %v2162_v37 = vpop.f32.mrb[26].mxu0  ;;  %v2164_v39 = vpop.f32.mrb[26].mxu1 }
 0x128   :  { %3279 = vst [vmem:[#allocation16_spill] sm:$0xff] %v2162_v37  ;;  %3280 = vst [vmem:[#allocation17_spill] sm:$0xff] %v2164_v39  ;;  %v923_v11 = vadd.f32 %v922_v17, %v921_v14  ;;  %v2166_v55 = vpop.f32.mrb[27].mxu0  ;;  %v728_v0 = vadd.f32 %v727_v27, %v726_v13  ;;  %v2168_v18 = vpop.f32.mrb[27].mxu1  ;;  %v838_v15 = vmul.f32 %v2162_v37, %v2162_v37  ;;  %v731_v14 = vsel %vm677_vm4, %v2162_v37, 0.0 }
 0x129   :  { %3281 = vst [vmem:[#allocation18_spill] sm:$0xff] %v2166_v55  ;;  %3282 = vst [vmem:[#allocation19_spill] sm:$0xff] %v2168_v18  ;;  %v729_v38 = vsel %vm677_vm4, %v2166_v55, 0.0  ;;  %v837_v49 = vmul.f32 %v2166_v55, %v2166_v55 }
 0x12a   :  { %v730_v3 = vadd.f32 %v729_v38, %v728_v0  ;;  %v925_v9 = vadd.f32 %v924_v53, %v923_v11  ;;  %v928_v19 = vsel %vm677_vm4, %v838_v15, 0.0 }
 0x12b   :  { %v926_v13 = vsel %vm677_vm4, %v837_v49, 0.0  ;;  %v2180_v27 = vpop.f32.mrb[28].mxu0  ;;  %v2182_v17 = vpop.f32.mrb[28].mxu1 }
 0x12c   :  { %3283 = vst [vmem:[#allocation20_spill] sm:$0xff] %v2180_v27  ;;  %3284 = vst [vmem:[#allocation21_spill] sm:$0xff] %v2182_v17  ;;  %v927_v63 = vadd.f32 %v926_v13, %v925_v9  ;;  %v2184_v40 = vpop.f32.mrb[29].mxu0  ;;  %v732_v42 = vadd.f32 %v731_v14, %v730_v3  ;;  %v2186_v56 = vpop.f32.mrb[29].mxu1  ;;  %v840_v53 = vmul.f32 %v2180_v27, %v2180_v27  ;;  %v735_v9 = vsel %vm677_vm4, %v2180_v27, 0.0 }
 0x12d   :  { %3285 = vst [vmem:[#allocation22_spill] sm:$0xff] %v2184_v40  ;;  %3286 = vst [vmem:[#allocation23_spill] sm:$0xff] %v2186_v56  ;;  %v733_v0 = vsel %vm677_vm4, %v2184_v40, 0.0  ;;  %v839_v11 = vmul.f32 %v2184_v40, %v2184_v40 }
 0x12e   :  { %v734_v38 = vadd.f32 %v733_v0, %v732_v42  ;;  %v929_v49 = vadd.f32 %v928_v19, %v927_v63  ;;  %v932_v19 = vsel %vm677_vm4, %v840_v53, 0.0 }
 0x12f   :  { %v930_v3 = vsel %vm677_vm4, %v839_v11, 0.0  ;;  %v2198_v14 = vpop.f32.mrb[30].mxu0  ;;  %v2200_v13 = vpop.f32.mrb[30].mxu1 }
 0x130   :  { %3287 = vst [vmem:[#allocation24_spill] sm:$0xff] %v2200_v13  ;;  %v931_v15 = vadd.f32 %v930_v3, %v929_v49  ;;  %v2202_v37 = vpop.f32.mrb[31].mxu0  ;;  %v736_v55 = vadd.f32 %v735_v9, %v734_v38  ;;  %v2206_v1 = vpop.f32.mrb[31].mxu1  ;;  %v842_v42 = vmul.f32 %v2198_v14, %v2198_v14  ;;  %v739_v38 = vsel %vm677_vm4, %v2198_v14, 0.0 }
 0x131   :  { %3288 = vst [vmem:[#allocation25_spill] sm:$0xff] %v2206_v1  ;;  %v737_v63 = vsel %vm677_vm4, %v2202_v37, 0.0  ;;  %v841_v0 = vmul.f32 %v2202_v37, %v2202_v37  ;;  %v741_v3 = vsel %vm677_vm4, %v1939_v26, 0.0 }
 0x132   :  { %v738_v11 = vadd.f32 %v737_v63, %v736_v55  ;;  %v933_v49 = vadd.f32 %v932_v19, %v931_v15  ;;  %v936_v40 = vsel %vm677_vm4, %v842_v42, 0.0  ;;  %v845_v55 = vmul.f32 %v1953_v36, %v1953_v36 }
 0x133   :  { %v934_v9 = vsel %vm677_vm4, %v841_v0, 0.0  ;;  %v743_v63 = vsel %vm677_vm4, %v1931_v22, 0.0  ;;  %v745_v0 = vsel %vm677_vm4, %v1953_v36, 0.0  ;;  %v940_v42 = vsel %vm677_vm4, %v844_v4, 0.0 }
 0x134   :  { %v740_v53 = vadd.f32 %v739_v38, %v738_v11  ;;  %v935_v27 = vadd.f32 %v934_v9, %v933_v49  ;;  %v846_v38 = vmul.f32 %v1949_v33, %v1949_v33  ;;  %v942_v29 = vsel %vm677_vm4, %v845_v55, 0.0 }
 0x135   :  { %v847_v9 = vmul.f32 %v1970_v48, %v1970_v48 }
 0x136   :  { %v937_v15 = vadd.f32 %v936_v40, %v935_v27  ;;  %v742_v19 = vadd.f32 %v741_v3, %v740_v53  ;;  %v747_v3 = vsel %vm677_vm4, %v1949_v33, 0.0  ;;  %v749_v53 = vsel %vm677_vm4, %v1970_v48, 0.0 }
 0x137   :  { %v944_v4 = vsel %vm677_vm4, %v846_v38, 0.0  ;;  %v946_v55 = vsel %vm677_vm4, %v847_v9, 0.0 }
 0x138   :  { %v939_v11 = vadd.f32 %v938_v45, %v937_v15  ;;  %v744_v49 = vadd.f32 %v743_v63, %v742_v19  ;;  %v848_v19 = vmul.f32 %v1966_v44, %v1966_v44  ;;  %v849_v63 = vmul.f32 %v1988_v62, %v1988_v62 }
 0x13a   :  { %v746_v40 = vadd.f32 %v745_v0, %v744_v49  ;;  %v941_v27 = vadd.f32 %v940_v42, %v939_v11  ;;  %v751_v49 = vsel %vm677_vm4, %v1966_v44, 0.0  ;;  %v753_v42 = vsel %vm677_vm4, %v1988_v62, 0.0 }
 0x13b   :  { %v948_v38 = vsel %vm677_vm4, %v848_v19, 0.0  ;;  %v950_v9 = vsel %vm677_vm4, %v849_v63, 0.0 }
 0x13c   :  { %v943_v45 = vadd.f32 %v942_v29, %v941_v27  ;;  %v748_v15 = vadd.f32 %v747_v3, %v746_v40  ;;  %v850_v27 = vmul.f32 %v1984_v58, %v1984_v58  ;;  %v851_v3 = vmul.f32 %v2006_v12, %v2006_v12 }
 0x13e   :  { %v750_v0 = vadd.f32 %v749_v53, %v748_v15  ;;  %v945_v11 = vadd.f32 %v944_v4, %v943_v45  ;;  %v755_v15 = vsel %vm677_vm4, %v1984_v58, 0.0  ;;  %v757_v4 = vsel %vm677_vm4, %v2006_v12, 0.0 }
 0x13f   :  { %v952_v19 = vsel %vm677_vm4, %v850_v27, 0.0  ;;  %v954_v63 = vsel %vm677_vm4, %v851_v3, 0.0 }
 0x140   :  { %v947_v29 = vadd.f32 %v946_v55, %v945_v11  ;;  %v752_v40 = vadd.f32 %v751_v49, %v750_v0  ;;  %v852_v11 = vmul.f32 %v2002_v8, %v2002_v8  ;;  %v853_v49 = vmul.f32 %v2024_v30, %v2024_v30 }
 0x142   :  { %v754_v53 = vadd.f32 %v753_v42, %v752_v40  ;;  %v949_v45 = vadd.f32 %v948_v38, %v947_v29  ;;  %v759_v40 = vsel %vm677_vm4, %v2002_v8, 0.0  ;;  %v761_v38 = vsel %vm677_vm4, %v2024_v30, 0.0 }
 0x143   :  { %v956_v27 = vsel %vm677_vm4, %v852_v11, 0.0  ;;  %v958_v3 = vsel %vm677_vm4, %v853_v49, 0.0 }
 0x144   :  { %v951_v55 = vadd.f32 %v950_v9, %v949_v45  ;;  %v756_v0 = vadd.f32 %v755_v15, %v754_v53  ;;  %v854_v45 = vmul.f32 %v2020_v24, %v2020_v24  ;;  %v855_v15 = vmul.f32 %v2042_v52, %v2042_v52 }
 0x146   :  { %v758_v42 = vadd.f32 %v757_v4, %v756_v0  ;;  %v953_v29 = vadd.f32 %v952_v19, %v951_v55  ;;  %v763_v0 = vsel %vm677_vm4, %v2020_v24, 0.0  ;;  %v765_v19 = vsel %vm677_vm4, %v2042_v52, 0.0 }
 0x147   :  { %v960_v11 = vsel %vm677_vm4, %v854_v45, 0.0  ;;  %v962_v49 = vsel %vm677_vm4, %v855_v15, 0.0 }
 0x148   :  { %v955_v9 = vadd.f32 %v954_v63, %v953_v29  ;;  %v760_v53 = vadd.f32 %v759_v40, %v758_v42  ;;  %v856_v29 = vmul.f32 %v2038_v47, %v2038_v47  ;;  %v857_v40 = vmul.f32 %v2060_v6, %v2060_v6 }
 0x14a   :  { %v762_v4 = vadd.f32 %v761_v38, %v760_v53  ;;  %v957_v55 = vadd.f32 %v956_v27, %v955_v9  ;;  %v767_v53 = vsel %vm677_vm4, %v2038_v47, 0.0  ;;  %v769_v27 = vsel %vm677_vm4, %v2060_v6, 0.0 }
 0x14b   :  { %v964_v45 = vsel %vm677_vm4, %v856_v29, 0.0  ;;  %v966_v15 = vsel %vm677_vm4, %v857_v40, 0.0 }
 0x14c   :  { %v959_v63 = vadd.f32 %v958_v3, %v957_v55  ;;  %v764_v42 = vadd.f32 %v763_v0, %v762_v4  ;;  %v858_v55 = vmul.f32 %v2056_v2, %v2056_v2  ;;  %v859_v0 = vmul.f32 %v2078_v34, %v2078_v34 }
 0x14e   :  { %v766_v38 = vadd.f32 %v765_v19, %v764_v42  ;;  %v961_v9 = vadd.f32 %v960_v11, %v959_v63  ;;  %v771_v42 = vsel %vm677_vm4, %v2056_v2, 0.0  ;;  %v773_v11 = vsel %vm677_vm4, %v2078_v34, 0.0 }
 0x14f   :  { %v968_v29 = vsel %vm677_vm4, %v858_v55, 0.0  ;;  %v970_v40 = vsel %vm677_vm4, %v859_v0, 0.0 }
 0x150   :  { %v963_v3 = vadd.f32 %v962_v49, %v961_v9  ;;  %v768_v4 = vadd.f32 %v767_v53, %v766_v38  ;;  %v860_v9 = vmul.f32 %v2074_v20, %v2074_v20  ;;  %v861_v53 = vmul.f32 %v2096_v61, %v2096_v61 }
 0x152   :  { %v770_v19 = vadd.f32 %v769_v27, %v768_v4  ;;  %v965_v63 = vadd.f32 %v964_v45, %v963_v3  ;;  %v775_v4 = vsel %vm677_vm4, %v2074_v20, 0.0  ;;  %v777_v45 = vsel %vm677_vm4, %v2096_v61, 0.0 }
 0x153   :  { %v972_v55 = vsel %vm677_vm4, %v860_v9, 0.0  ;;  %v974_v0 = vsel %vm677_vm4, %v861_v53, 0.0 }
 0x154   :  { %v967_v49 = vadd.f32 %v966_v15, %v965_v63  ;;  %v772_v38 = vadd.f32 %v771_v42, %v770_v19  ;;  %v862_v63 = vmul.f32 %v2092_v54, %v2092_v54  ;;  %v863_v42 = vmul.f32 %v2114_v31, %v2114_v31 }
 0x156   :  { %v774_v27 = vadd.f32 %v773_v11, %v772_v38  ;;  %v969_v3 = vadd.f32 %v968_v29, %v967_v49  ;;  %v779_v38 = vsel %vm677_vm4, %v2092_v54, 0.0  ;;  %v781_v29 = vsel %vm677_vm4, %v2114_v31, 0.0 }
 0x157   :  { %v976_v9 = vsel %vm677_vm4, %v862_v63, 0.0  ;;  %v978_v53 = vsel %vm677_vm4, %v863_v42, 0.0 }
 0x158   :  { %v971_v15 = vadd.f32 %v970_v40, %v969_v3  ;;  %v776_v19 = vadd.f32 %v775_v4, %v774_v27  ;;  %v864_v3 = vmul.f32 %v2110_v16, %v2110_v16  ;;  %v865_v4 = vmul.f32 %v2132_v5, %v2132_v5 }
 0x15a   :  { %v778_v11 = vadd.f32 %v777_v45, %v776_v19  ;;  %v973_v49 = vadd.f32 %v972_v55, %v971_v15  ;;  %v783_v19 = vsel %vm677_vm4, %v2110_v16, 0.0  ;;  %v785_v55 = vsel %vm677_vm4, %v2132_v5, 0.0 }
 0x15b   :  { %v980_v63 = vsel %vm677_vm4, %v864_v3, 0.0  ;;  %v982_v42 = vsel %vm677_vm4, %v865_v4, 0.0 }
 0x15c   :  { %v975_v40 = vadd.f32 %v974_v0, %v973_v49  ;;  %v780_v27 = vadd.f32 %v779_v38, %v778_v11  ;;  %v866_v49 = vmul.f32 %v2128_v59, %v2128_v59  ;;  %v867_v38 = vmul.f32 %v2150_v51, %v2150_v51 }
 0x15e   :  { %v782_v45 = vadd.f32 %v781_v29, %v780_v27  ;;  %v977_v15 = vadd.f32 %v976_v9, %v975_v40  ;;  %v787_v27 = vsel %vm677_vm4, %v2128_v59, 0.0  ;;  %v789_v9 = vsel %vm677_vm4, %v2150_v51, 0.0 }
 0x15f   :  { %v984_v3 = vsel %vm677_vm4, %v866_v49, 0.0  ;;  %v986_v4 = vsel %vm677_vm4, %v867_v38, 0.0 }
 0x160   :  { %v979_v0 = vadd.f32 %v978_v53, %v977_v15  ;;  %v784_v11 = vadd.f32 %v783_v19, %v782_v45  ;;  %v868_v15 = vmul.f32 %v2146_v41, %v2146_v41  ;;  %v869_v19 = vmul.f32 %v2168_v18, %v2168_v18 }
 0x162   :  { %v786_v29 = vadd.f32 %v785_v55, %v784_v11  ;;  %v981_v40 = vadd.f32 %v980_v63, %v979_v0  ;;  %v791_v11 = vsel %vm677_vm4, %v2146_v41, 0.0  ;;  %v793_v63 = vsel %vm677_vm4, %v2168_v18, 0.0 }
 0x163   :  { %v988_v49 = vsel %vm677_vm4, %v868_v15, 0.0  ;;  %v990_v38 = vsel %vm677_vm4, %v869_v19, 0.0 }
 0x164   :  { %v983_v53 = vadd.f32 %v982_v42, %v981_v40  ;;  %v788_v45 = vadd.f32 %v787_v27, %v786_v29  ;;  %v870_v40 = vmul.f32 %v2164_v39, %v2164_v39  ;;  %v871_v27 = vmul.f32 %v2186_v56, %v2186_v56 }
 0x166   :  { %v790_v55 = vadd.f32 %v789_v9, %v788_v45  ;;  %v985_v0 = vadd.f32 %v984_v3, %v983_v53  ;;  %v795_v45 = vsel %vm677_vm4, %v2164_v39, 0.0  ;;  %v797_v3 = vsel %vm677_vm4, %v2186_v56, 0.0 }
 0x167   :  { %v992_v15 = vsel %vm677_vm4, %v870_v40, 0.0  ;;  %v994_v19 = vsel %vm677_vm4, %v871_v27, 0.0 }
 0x168   :  { %v987_v42 = vadd.f32 %v986_v4, %v985_v0  ;;  %v792_v29 = vadd.f32 %v791_v11, %v790_v55  ;;  %v872_v0 = vmul.f32 %v2182_v17, %v2182_v17  ;;  %v873_v11 = vmul.f32 %v2206_v1, %v2206_v1 }
 0x16a   :  { %v794_v9 = vadd.f32 %v793_v63, %v792_v29  ;;  %v989_v53 = vadd.f32 %v988_v49, %v987_v42  ;;  %v799_v29 = vsel %vm677_vm4, %v2182_v17, 0.0  ;;  %v801_v49 = vsel %vm677_vm4, %v2206_v1, 0.0 }
 0x16b   :  { %v996_v40 = vsel %vm677_vm4, %v872_v0, 0.0  ;;  %v998_v27 = vsel %vm677_vm4, %v873_v11, 0.0 }
 0x16c   :  { %v991_v4 = vadd.f32 %v990_v38, %v989_v53  ;;  %v796_v55 = vadd.f32 %v795_v45, %v794_v9  ;;  %v874_v53 = vmul.f32 %v2200_v13, %v2200_v13 }
 0x16e   :  { %v798_v63 = vadd.f32 %v797_v3, %v796_v55  ;;  %v993_v42 = vadd.f32 %v992_v15, %v991_v4  ;;  %v803_v3 = vsel %vm677_vm4, %v2200_v13, 0.0  ;;  %v1000_v15 = vsel %vm677_vm4, %v874_v53, 0.0 }
 0x16f   :  { %v1020_v53 = vlaneseq }
 0x170   :  { %v995_v38 = vadd.f32 %v994_v19, %v993_v42  ;;  %v800_v9 = vadd.f32 %v799_v29, %v798_v63 }
 0x172   :  { %v802_v45 = vadd.f32 %v801_v49, %v800_v9  ;;  %v997_v56 = vadd.f32 %v996_v40, %v995_v38 }
 0x174   :  { %v804_v4 = vadd.f32 %v803_v3, %v802_v45  ;;  %v999_v55 = vadd.f32 %v998_v27, %v997_v56  ;;  %v2377_v27 = vshrl.u32 %v1020_v53, 7  ;;  %v3296_v53 = vld [vmem:[#allocation10_spill] sm:$0xff] }
 0x176   :  { %v805_v17 = vrot.slane %v804_v4, 4  ;;  %v1001_v1 = vadd.f32 %v1000_v15, %v999_v55 }
 0x178   :  { %v806_v19 = vadd.f32 %v805_v17, %v804_v4  ;;  %v1002_v63 = vrot.slane %v1001_v1, 4  ;;  %v3264_v17 = vsub.s32 0, %v2377_v27  ;;  %v3304_v4 = vld [vmem:[#allocation18_spill] sm:$0xff] }
 0x17a   :  { %v807_v42 = vrot.slane %v806_v19, 2  ;;  %v1003_v0 = vadd.f32 %v1002_v63, %v1001_v1  ;;  %v1012_v1 = vld [vmem:[%s3237_s2] sm:$0x1] }
 0x17c   :  { %v808_v29 = vadd.f32 %v807_v42, %v806_v19  ;;  %v1004_v39 = vrot.slane %v1003_v0, 2 }
 0x17e   :  { %v809_v18 = vrot.slane %v808_v29, 1  ;;  %v1005_v41 = vadd.f32 %v1004_v39, %v1003_v0  ;;  %v3289_v0 = vld [vmem:[#allocation2_spill] sm:$0xff] }
 0x180   :  { %v810_v11 = vadd.f32 %v809_v18, %v808_v29  ;;  %v1006_v49 = vrot.slane %v1005_v41, 1  ;;  %v2386_v18 = vld [vmem:[%s3238_s3] sm:$0x1]  ;;  %v3290_v29 = vld [vmem:[#allocation4_spill] sm:$0xff] }
 0x182   :  { %v1007_v38 = vadd.f32 %v1006_v49, %v1005_v41  ;;  %v1008_v9 = vmul.f32 0.001953125, %v810_v11  ;;  %v3291_v11 = vld [vmem:[#allocation3_spill] sm:$0xff]  ;;  %v3292_v49 = vld [vmem:[#allocation6_spill] sm:$0xff] }
 0x184   :  { %v1009_v40 = vmul.f32 0.001953125, %v1007_v38  ;;  %v1010_v13 = vmul.f32 %v1008_v9, %v1008_v9  ;;  %v3293_v38 = vld [vmem:[#allocation5_spill] sm:$0xff] }
 0x186   :  { %v1011_v45 = vsub.f32 %v1009_v40, %v1010_v13 }
 0x188   :  { %v1013_v56 = vadd.f32 1e-05, %v1011_v45  ;;  %v3295_v45 = vld [vmem:[#allocation7_spill] sm:$0xff] }
 0x18a   :  { %1603 = vrsqrt.f32 %v1013_v56 }
 0x194   :  { %v1604_v3 = vpop.eup %1603 }
 0x195   :  { %v1015_v39 = vmul.f32 %v1604_v3, %v1012_v1  ;;  %v3297_v3 = vld [vmem:[#allocation9_spill] sm:$0xff] }
 0x197   :  { %v2388_v41 = vmul.f32 %v1015_v39, %v1008_v9  ;;  %v2392_v13 = vrot.slane %v1015_v39, %v3264_v17  ;;  %v3294_v9 = vld [vmem:[#allocation8_spill] sm:$0xff] }
 0x198   :  { %v3305_v17 = vld [vmem:[#allocation16_spill] sm:$0xff] }
 0x199   :  { %v2398_v55 = vmul.f32 %v2392_v13, %v1937_v25  ;;  %v2402_v15 = vmul.f32 %v1929_v21, %v2392_v13  ;;  %v2406_v19 = vmul.f32 %v2392_v13, %v1951_v35  ;;  %v2410_v63 = vmul.f32 %v1947_v32, %v2392_v13 }
 0x19a   :  { %v2414_v42 = vmul.f32 %v2392_v13, %v1968_v46  ;;  %v2418_v25 = vmul.f32 %v1964_v43, %v2392_v13  ;;  %v2422_v21 = vmul.f32 %v2392_v13, %v1986_v60  ;;  %v2426_v35 = vmul.f32 %v1982_v57, %v2392_v13 }
 0x19b   :  { %v2430_v32 = vmul.f32 %v2392_v13, %v2004_v10  ;;  %v2434_v46 = vmul.f32 %v2000_v7, %v2392_v13  ;;  %v2438_v43 = vmul.f32 %v2392_v13, %v2022_v28  ;;  %v2442_v60 = vmul.f32 %v2018_v23, %v2392_v13 }
 0x19c   :  { %v2446_v57 = vmul.f32 %v2392_v13, %v2040_v50  ;;  %v2450_v10 = vmul.f32 %v3289_v0, %v2392_v13  ;;  %v2454_v7 = vmul.f32 %v2392_v13, %v3290_v29  ;;  %v2458_v28 = vmul.f32 %v3291_v11, %v2392_v13  ;;  %v3298_v0 = vld [vmem:[#allocation12_spill] sm:$0xff]  ;;  %v3300_v11 = vld [vmem:[#allocation11_spill] sm:$0xff] }
 0x19d   :  { %v2462_v23 = vmul.f32 %v2392_v13, %v3292_v49  ;;  %v2466_v50 = vmul.f32 %v3293_v38, %v2392_v13  ;;  %v2470_v40 = vmul.f32 %v2392_v13, %v3294_v9  ;;  %v2474_v56 = vmul.f32 %v3295_v45, %v2392_v13  ;;  %v3302_v38 = vld [vmem:[#allocation15_spill] sm:$0xff]  ;;  %v3303_v45 = vld [vmem:[#allocation13_spill] sm:$0xff] }
 0x19e   :  { %v2478_v1 = vmul.f32 %v2392_v13, %v3296_v53  ;;  %v2482_v39 = vmul.f32 %v3297_v3, %v2392_v13  ;;  %v2486_v29 = vmul.f32 %v2392_v13, %v3298_v0  ;;  %v2490_v49 = vmul.f32 %v3300_v11, %v2392_v13 }
 0x19f   :  { %v2494_v9 = vmul.f32 %v2392_v13, %v3302_v38  ;;  %v2498_v53 = vmul.f32 %v3303_v45, %v2392_v13  ;;  %v2502_v3 = vmul.f32 %v2392_v13, %v3304_v4  ;;  %v2506_v0 = vmul.f32 %v3305_v17, %v2392_v13 }
 0x1a0   :  { %3299 = vst [vmem:[#allocation2_spill] sm:$0xff] %v2486_v29  ;;  %3301 = vst [vmem:[#allocation4_spill] sm:$0xff] %v2490_v49  ;;  %v3306_v29 = vld [vmem:[#allocation22_spill] sm:$0xff]  ;;  %v3307_v49 = vld [vmem:[#allocation20_spill] sm:$0xff]  ;;  %v2518_v45 = vmul.f32 %v2392_v13, %v2202_v37  ;;  %v2522_v4 = vmul.f32 %v2198_v14, %v2392_v13  ;;  %v2526_v17 = vmul.f32 %v2392_v13, %v1939_v26 }
 0x1a1   :  { %v2510_v11 = vmul.f32 %v2392_v13, %v3306_v29  ;;  %v2514_v38 = vmul.f32 %v3307_v49, %v2392_v13  ;;  %v2530_v29 = vmul.f32 %v1931_v22, %v2392_v13  ;;  %v2534_v49 = vmul.f32 %v2392_v13, %v1953_v36 }
 0x1a2   :  { %v2538_v37 = vmul.f32 %v1949_v33, %v2392_v13  ;;  %v2542_v14 = vmul.f32 %v2392_v13, %v1970_v48  ;;  %v2546_v26 = vmul.f32 %v1966_v44, %v2392_v13  ;;  %v2550_v22 = vmul.f32 %v2392_v13, %v1988_v62 }
 0x1a3   :  { %v2554_v36 = vmul.f32 %v1984_v58, %v2392_v13  ;;  %v2558_v33 = vmul.f32 %v2392_v13, %v2006_v12  ;;  %v2562_v48 = vmul.f32 %v2002_v8, %v2392_v13  ;;  %v2566_v44 = vmul.f32 %v2392_v13, %v2024_v30 }
 0x1a4   :  { %v2570_v62 = vmul.f32 %v2020_v24, %v2392_v13  ;;  %v2574_v58 = vmul.f32 %v2392_v13, %v2042_v52  ;;  %v2578_v12 = vmul.f32 %v2038_v47, %v2392_v13  ;;  %v2582_v8 = vmul.f32 %v2392_v13, %v2060_v6 }
 0x1a5   :  { %v2586_v30 = vmul.f32 %v2056_v2, %v2392_v13  ;;  %v2590_v24 = vmul.f32 %v2392_v13, %v2078_v34  ;;  %v2594_v52 = vmul.f32 %v2074_v20, %v2392_v13  ;;  %v2598_v47 = vmul.f32 %v2392_v13, %v2096_v61 }
 0x1a6   :  { %v2602_v6 = vmul.f32 %v2092_v54, %v2392_v13  ;;  %v2606_v2 = vmul.f32 %v2392_v13, %v2114_v31  ;;  %v2610_v34 = vmul.f32 %v2110_v16, %v2392_v13  ;;  %v2614_v20 = vmul.f32 %v2392_v13, %v2132_v5 }
 0x1a7   :  { %v2618_v61 = vmul.f32 %v2128_v59, %v2392_v13  ;;  %v2622_v54 = vmul.f32 %v2392_v13, %v2150_v51 }
 0x1a8   :  { %3308 = vst [vmem:[#allocation3_spill] sm:$0xff] %v2602_v6  ;;  %3309 = vst [vmem:[#allocation6_spill] sm:$0xff] %v2606_v2  ;;  %v3314_v6 = vld [vmem:[#allocation14_spill] sm:$0xff]  ;;  %v3316_v2 = vld [vmem:[#allocation19_spill] sm:$0xff] }
 0x1a9   :  { %3310 = vst [vmem:[#allocation5_spill] sm:$0xff] %v2610_v34  ;;  %3311 = vst [vmem:[#allocation8_spill] sm:$0xff] %v2614_v20  ;;  %v2626_v31 = vmul.f32 %v3314_v6, %v2392_v13  ;;  %v2630_v16 = vmul.f32 %v2392_v13, %v3316_v2  ;;  %v3318_v34 = vld [vmem:[#allocation17_spill] sm:$0xff]  ;;  %v3320_v20 = vld [vmem:[#allocation23_spill] sm:$0xff] }
 0x1aa   :  { %3312 = vst [vmem:[#allocation7_spill] sm:$0xff] %v2618_v61  ;;  %3313 = vst [vmem:[#allocation10_spill] sm:$0xff] %v2622_v54  ;;  %v2634_v5 = vmul.f32 %v3318_v34, %v2392_v13  ;;  %v2638_v59 = vmul.f32 %v2392_v13, %v3320_v20  ;;  %v3321_v61 = vld [vmem:[#allocation21_spill] sm:$0xff]  ;;  %v3325_v34 = vsub.f32 %v2386_v18, %v2388_v41 }
 0x1ab   :  { %3315 = vst [vmem:[#allocation9_spill] sm:$0xff] %v2626_v31  ;;  %3317 = vst [vmem:[#allocation12_spill] sm:$0xff] %v2630_v16  ;;  %v2642_v51 = vmul.f32 %v3321_v61, %v2392_v13  ;;  %v3322_v54 = vld [vmem:[#allocation25_spill] sm:$0xff]  ;;  %v3323_v31 = vld [vmem:[#allocation24_spill] sm:$0xff]  ;;  %v3324_v16 = vsub.s32 0, %v2377_v27 }
 0x1ac   :  { %3319 = vst [vmem:[#allocation11_spill] sm:$0xff] %v2634_v5  ;;  %v2646_v6 = vmul.f32 %v2392_v13, %v3322_v54  ;;  %v2650_v2 = vmul.f32 %v3323_v31, %v2392_v13 }
 0x1ad   :  { %v2657_v5 = vrot.slane %v3325_v34, %v3324_v16 }
 0x1af   :  { %v2661_v20 = vadd.f32 %v2657_v5, %v2398_v55  ;;  %v2665_v61 = vadd.f32 %v2657_v5, %v2402_v15  ;;  %v2669_v54 = vadd.f32 %v2657_v5, %v2406_v19  ;;  %v2673_v27 = vadd.f32 %v2657_v5, %v2410_v63  ;;  %v3331_v34 = vld [vmem:[#allocation3_spill] sm:$0xff] }
 0x1b0   :  { %v2677_v18 = vadd.f32 %v2657_v5, %v2414_v42  ;;  %v2681_v41 = vadd.f32 %v2657_v5, %v2418_v25  ;;  %v2685_v13 = vadd.f32 %v2657_v5, %v2422_v21  ;;  %v2689_v55 = vadd.f32 %v2657_v5, %v2426_v35 }
 0x1b1   :  { %v2693_v15 = vadd.f32 %v2657_v5, %v2430_v32  ;;  %v2697_v19 = vadd.f32 %v2657_v5, %v2434_v46  ;;  %v2701_v63 = vadd.f32 %v2657_v5, %v2438_v43  ;;  %v2705_v42 = vadd.f32 %v2657_v5, %v2442_v60 }
 0x1b2   :  { %v2709_v25 = vadd.f32 %v2657_v5, %v2446_v57  ;;  %v2713_v21 = vadd.f32 %v2657_v5, %v2450_v10  ;;  %v2717_v35 = vadd.f32 %v2657_v5, %v2454_v7  ;;  %v2721_v32 = vadd.f32 %v2657_v5, %v2458_v28  ;;  %v3326_v28 = vld [vmem:[#allocation2_spill] sm:$0xff] }
 0x1b3   :  { %v2725_v46 = vadd.f32 %v2657_v5, %v2462_v23  ;;  %v2729_v43 = vadd.f32 %v2657_v5, %v2466_v50  ;;  %v2733_v60 = vadd.f32 %v2657_v5, %v2470_v40  ;;  %v2737_v57 = vadd.f32 %v2657_v5, %v2474_v56  ;;  %v3327_v50 = vld [vmem:[#allocation4_spill] sm:$0xff] }
 0x1b4   :  { %v2741_v10 = vadd.f32 %v2657_v5, %v2478_v1  ;;  %v2745_v7 = vadd.f32 %v2657_v5, %v2482_v39  ;;  %v2749_v23 = vadd.f32 %v2657_v5, %v3326_v28  ;;  %v2753_v40 = vadd.f32 %v2657_v5, %v3327_v50  ;;  %v3333_v28 = vld [vmem:[#allocation6_spill] sm:$0xff]  ;;  %v3335_v50 = vld [vmem:[#allocation5_spill] sm:$0xff] }
 0x1b5   :  { %v2757_v56 = vadd.f32 %v2657_v5, %v2494_v9  ;;  %v2761_v1 = vadd.f32 %v2657_v5, %v2498_v53  ;;  %v2765_v39 = vadd.f32 %v2657_v5, %v2502_v3  ;;  %v2769_v31 = vadd.f32 %v2657_v5, %v2506_v0 }
 0x1b6   :  { %v2773_v16 = vadd.f32 %v2657_v5, %v2510_v11  ;;  %v2777_v9 = vadd.f32 %v2657_v5, %v2514_v38  ;;  %v2781_v53 = vadd.f32 %v2657_v5, %v2518_v45  ;;  %v2785_v3 = vadd.f32 %v2657_v5, %v2522_v4 }
 0x1b7   :  { %v2789_v0 = vadd.f32 %v2657_v5, %v2526_v17  ;;  %v2793_v11 = vadd.f32 %v2657_v5, %v2530_v29  ;;  %v2797_v38 = vadd.f32 %v2657_v5, %v2534_v49  ;;  %v2801_v45 = vadd.f32 %v2657_v5, %v2538_v37 }
 0x1b8   :  { %v2805_v4 = vadd.f32 %v2657_v5, %v2542_v14  ;;  %v2809_v17 = vadd.f32 %v2657_v5, %v2546_v26  ;;  %v2813_v29 = vadd.f32 %v2657_v5, %v2550_v22  ;;  %v2817_v49 = vadd.f32 %v2657_v5, %v2554_v36 }
 0x1b9   :  { %v2821_v37 = vadd.f32 %v2657_v5, %v2558_v33  ;;  %v2825_v14 = vadd.f32 %v2657_v5, %v2562_v48  ;;  %v2829_v26 = vadd.f32 %v2657_v5, %v2566_v44  ;;  %v2833_v22 = vadd.f32 %v2657_v5, %v2570_v62 }
 0x1ba   :  { %v2837_v36 = vadd.f32 %v2657_v5, %v2574_v58  ;;  %v2841_v33 = vadd.f32 %v2657_v5, %v2578_v12  ;;  %v2845_v48 = vadd.f32 %v2657_v5, %v2582_v8  ;;  %v2849_v44 = vadd.f32 %v2657_v5, %v2586_v30 }
 0x1bb   :  { %v2853_v62 = vadd.f32 %v2657_v5, %v2590_v24  ;;  %v2857_v58 = vadd.f32 %v2657_v5, %v2594_v52  ;;  %v2861_v12 = vadd.f32 %v2657_v5, %v2598_v47  ;;  %v2865_v8 = vadd.f32 %v2657_v5, %v3331_v34 }
 0x1bc   :  { %v2869_v30 = vadd.f32 %v2657_v5, %v3333_v28  ;;  %v2873_v24 = vadd.f32 %v2657_v5, %v3335_v50 }
 0x1bd   :  { %3328 = vst [vmem:[#allocation15_spill] sm:$0xff] %v2853_v62  ;;  %3329 = vst [vmem:[#allocation13_spill] sm:$0xff] %v2857_v58  ;;  %v3337_v62 = vld [vmem:[#allocation8_spill] sm:$0xff]  ;;  %v3338_v58 = vld [vmem:[#allocation7_spill] sm:$0xff] }
 0x1be   :  { %3330 = vst [vmem:[#allocation18_spill] sm:$0xff] %v2861_v12  ;;  %3332 = vst [vmem:[#allocation16_spill] sm:$0xff] %v2865_v8  ;;  %v2877_v52 = vadd.f32 %v2657_v5, %v3337_v62  ;;  %v2881_v47 = vadd.f32 %v2657_v5, %v3338_v58  ;;  %v3339_v12 = vld [vmem:[#allocation10_spill] sm:$0xff]  ;;  %v3340_v8 = vld [vmem:[#allocation9_spill] sm:$0xff]  ;;  %v2901_v58 = vadd.f32 %v2657_v5, %v2638_v59  ;;  %v1162_v59 = vmax.f32 %v2673_v27, 0.0 }
 0x1bf   :  { %3334 = vst [vmem:[#allocation22_spill] sm:$0xff] %v2869_v30  ;;  %3336 = vst [vmem:[#allocation20_spill] sm:$0xff] %v2873_v24  ;;  %v2885_v34 = vadd.f32 %v2657_v5, %v3339_v12  ;;  %v2889_v28 = vadd.f32 %v2657_v5, %v3340_v8  ;;  %v3341_v30 = vld [vmem:[#allocation12_spill] sm:$0xff]  ;;  %v3343_v24 = vld [vmem:[#allocation11_spill] sm:$0xff]  ;;  %v2905_v12 = vadd.f32 %v2657_v5, %v2642_v51  ;;  %v1164_v51 = vmax.f32 %v2681_v41, 0.0 }
 0x1c0   :  { %v2893_v50 = vadd.f32 %v2657_v5, %v3341_v30  ;;  %v2897_v62 = vadd.f32 %v2657_v5, %v3343_v24  ;;  %3345 = vst [vmem:[#allocation17_spill] sm:$0xff] %v2901_v58  ;;  %v2909_v8 = vadd.f32 %v2657_v5, %v2646_v6  ;;  %v2913_v30 = vadd.f32 %v2657_v5, %v2650_v2 }
 0x1c1   :  { %3346 = vst [vmem:[#allocation23_spill] sm:$0xff] %v2905_v12  ;;  %v1160_v24 = vmax.f32 %v2665_v61, 0.0  ;;  %v1163_v58 = vmax.f32 %v2677_v18, 0.0  ;;  %v1165_v12 = vmax.f32 %v2685_v13, 0.0  ;;  %v1166_v6 = vmax.f32 %v2689_v55, 0.0  ;;  %1226 = vst.msk [vmem:[%s3239_s4 + $0x18] sm:$0xff] %vm677_vm4, %v1162_v59 }
 0x1c2   :  { %3342 = vst [vmem:[#allocation14_spill] sm:$0xff] %v2893_v50  ;;  %3344 = vst [vmem:[#allocation19_spill] sm:$0xff] %v2897_v62  ;;  %v1159_v50 = vmax.f32 %v2661_v20, 0.0  ;;  %v1161_v62 = vmax.f32 %v2669_v54, 0.0  ;;  %v1168_v5 = vmax.f32 %v2697_v19, 0.0  ;;  %v1169_v2 = vmax.f32 %v2701_v63, 0.0 }
 0x1c3   :  { %3347 = vst [vmem:[#allocation21_spill] sm:$0xff] %v2909_v8  ;;  %v1167_v8 = vmax.f32 %v2693_v15, 0.0  ;;  %v1170_v20 = vmax.f32 %v2705_v42, 0.0  ;;  %1224 = vst.msk [vmem:[%s3239_s4 + $0x8] sm:$0xff] %vm677_vm4, %v1160_v24  ;;  %v1171_v61 = vmax.f32 %v2709_v25, 0.0  ;;  %v1172_v54 = vmax.f32 %v2713_v21, 0.0 }
 0x1c4   :  { %1223 = vst.msk [vmem:[%s3239_s4] sm:$0xff] %vm677_vm4, %v1159_v50  ;;  %1225 = vst.msk [vmem:[%s3239_s4 + $0x10] sm:$0xff] %vm677_vm4, %v1161_v62  ;;  %v1173_v27 = vmax.f32 %v2717_v35, 0.0  ;;  %v1174_v18 = vmax.f32 %v2721_v32, 0.0  ;;  %v1175_v41 = vmax.f32 %v2725_v46, 0.0  ;;  %v1176_v13 = vmax.f32 %v2729_v43, 0.0 }
 0x1c5   :  { %1227 = vst.msk [vmem:[%s3239_s4 + $0x20] sm:$0xff] %vm677_vm4, %v1163_v58  ;;  %1228 = vst.msk [vmem:[%s3239_s4 + $0x28] sm:$0xff] %vm677_vm4, %v1164_v51  ;;  %v1177_v55 = vmax.f32 %v2733_v60, 0.0  ;;  %v1178_v15 = vmax.f32 %v2737_v57, 0.0  ;;  %v1179_v19 = vmax.f32 %v2741_v10, 0.0  ;;  %v1180_v63 = vmax.f32 %v2745_v7, 0.0 }
 0x1c6   :  { %1229 = vst.msk [vmem:[%s3239_s4 + $0x30] sm:$0xff] %vm677_vm4, %v1165_v12  ;;  %1230 = vst.msk [vmem:[%s3239_s4 + $0x38] sm:$0xff] %vm677_vm4, %v1166_v6  ;;  %v1181_v42 = vmax.f32 %v2749_v23, 0.0  ;;  %v1182_v25 = vmax.f32 %v2753_v40, 0.0  ;;  %v1183_v21 = vmax.f32 %v2757_v56, 0.0  ;;  %v1184_v35 = vmax.f32 %v2761_v1, 0.0 }
 0x1c7   :  { %1231 = vst.msk [vmem:[%s3239_s4 + $0x40] sm:$0xff] %vm677_vm4, %v1167_v8  ;;  %1232 = vst.msk [vmem:[%s3239_s4 + $0x48] sm:$0xff] %vm677_vm4, %v1168_v5  ;;  %v1185_v32 = vmax.f32 %v2765_v39, 0.0  ;;  %v1186_v46 = vmax.f32 %v2769_v31, 0.0  ;;  %v1187_v43 = vmax.f32 %v2773_v16, 0.0  ;;  %v1188_v60 = vmax.f32 %v2777_v9, 0.0 }
 0x1c8   :  { %1233 = vst.msk [vmem:[%s3239_s4 + $0x50] sm:$0xff] %vm677_vm4, %v1169_v2  ;;  %1234 = vst.msk [vmem:[%s3239_s4 + $0x58] sm:$0xff] %vm677_vm4, %v1170_v20  ;;  %v1189_v57 = vmax.f32 %v2781_v53, 0.0  ;;  %v1190_v10 = vmax.f32 %v2785_v3, 0.0  ;;  %v1191_v7 = vmax.f32 %v2789_v0, 0.0  ;;  %v1192_v23 = vmax.f32 %v2793_v11, 0.0 }
 0x1c9   :  { %1235 = vst.msk [vmem:[%s3239_s4 + $0x60] sm:$0xff] %vm677_vm4, %v1171_v61  ;;  %1236 = vst.msk [vmem:[%s3239_s4 + $0x68] sm:$0xff] %vm677_vm4, %v1172_v54  ;;  %v1193_v40 = vmax.f32 %v2797_v38, 0.0  ;;  %v1194_v56 = vmax.f32 %v2801_v45, 0.0  ;;  %v1195_v1 = vmax.f32 %v2805_v4, 0.0  ;;  %v1196_v39 = vmax.f32 %v2809_v17, 0.0 }
 0x1ca   :  { %1237 = vst.msk [vmem:[%s3239_s4 + $0x70] sm:$0xff] %vm677_vm4, %v1173_v27  ;;  %1238 = vst.msk [vmem:[%s3239_s4 + $0x78] sm:$0xff] %vm677_vm4, %v1174_v18  ;;  %v1197_v31 = vmax.f32 %v2813_v29, 0.0  ;;  %v1198_v16 = vmax.f32 %v2817_v49, 0.0  ;;  %v1199_v9 = vmax.f32 %v2821_v37, 0.0  ;;  %v1200_v53 = vmax.f32 %v2825_v14, 0.0 }
 0x1cb   :  { %1239 = vst.msk [vmem:[%s3239_s4 + $0x80] sm:$0xff] %vm677_vm4, %v1175_v41  ;;  %1240 = vst.msk [vmem:[%s3239_s4 + $0x88] sm:$0xff] %vm677_vm4, %v1176_v13  ;;  %v1201_v3 = vmax.f32 %v2829_v26, 0.0  ;;  %v1202_v0 = vmax.f32 %v2833_v22, 0.0  ;;  %v1203_v11 = vmax.f32 %v2837_v36, 0.0  ;;  %v1204_v38 = vmax.f32 %v2841_v33, 0.0 }
 0x1cc   :  { %1241 = vst.msk [vmem:[%s3239_s4 + $0x90] sm:$0xff] %vm677_vm4, %v1177_v55  ;;  %1242 = vst.msk [vmem:[%s3239_s4 + $0x98] sm:$0xff] %vm677_vm4, %v1178_v15  ;;  %v1205_v45 = vmax.f32 %v2845_v48, 0.0  ;;  %v1206_v4 = vmax.f32 %v2849_v44, 0.0  ;;  %v3348_v17 = vld [vmem:[#allocation15_spill] sm:$0xff]  ;;  %v3349_v49 = vld [vmem:[#allocation13_spill] sm:$0xff] }
 0x1cd   :  { %1243 = vst.msk [vmem:[%s3239_s4 + $0xa0] sm:$0xff] %vm677_vm4, %v1179_v19  ;;  %1244 = vst.msk [vmem:[%s3239_s4 + $0xa8] sm:$0xff] %vm677_vm4, %v1180_v63  ;;  %v1207_v29 = vmax.f32 %v3348_v17, 0.0  ;;  %v1208_v37 = vmax.f32 %v3349_v49, 0.0  ;;  %v3350_v14 = vld [vmem:[#allocation18_spill] sm:$0xff]  ;;  %v3351_v22 = vld [vmem:[#allocation16_spill] sm:$0xff] }
 0x1ce   :  { %1245 = vst.msk [vmem:[%s3239_s4 + $0xb0] sm:$0xff] %vm677_vm4, %v1181_v42  ;;  %1246 = vst.msk [vmem:[%s3239_s4 + $0xb8] sm:$0xff] %vm677_vm4, %v1182_v25  ;;  %v1209_v26 = vmax.f32 %v3350_v14, 0.0  ;;  %v1210_v36 = vmax.f32 %v3351_v22, 0.0  ;;  %v3352_v33 = vld [vmem:[#allocation22_spill] sm:$0xff]  ;;  %v3353_v44 = vld [vmem:[#allocation20_spill] sm:$0xff] }
 0x1cf   :  { %1247 = vst.msk [vmem:[%s3239_s4 + $0xc0] sm:$0xff] %vm677_vm4, %v1183_v21  ;;  %1248 = vst.msk [vmem:[%s3239_s4 + $0xc8] sm:$0xff] %vm677_vm4, %v1184_v35  ;;  %v1211_v48 = vmax.f32 %v3352_v33, 0.0  ;;  %v1212_v50 = vmax.f32 %v3353_v44, 0.0  ;;  %v1213_v62 = vmax.f32 %v2877_v52, 0.0  ;;  %v1214_v58 = vmax.f32 %v2881_v47, 0.0 }
 0x1d0   :  { %1249 = vst.msk [vmem:[%s3239_s4 + $0xd0] sm:$0xff] %vm677_vm4, %v1185_v32  ;;  %1250 = vst.msk [vmem:[%s3239_s4 + $0xd8] sm:$0xff] %vm677_vm4, %v1186_v46  ;;  %v1215_v52 = vmax.f32 %v2885_v34, 0.0  ;;  %v1216_v47 = vmax.f32 %v2889_v28, 0.0  ;;  %v3354_v12 = vld [vmem:[#allocation14_spill] sm:$0xff]  ;;  %v3355_v24 = vld [vmem:[#allocation19_spill] sm:$0xff] }
 0x1d1   :  { %1251 = vst.msk [vmem:[%s3239_s4 + $0xe0] sm:$0xff] %vm677_vm4, %v1187_v43  ;;  %1252 = vst.msk [vmem:[%s3239_s4 + $0xe8] sm:$0xff] %vm677_vm4, %v1188_v60  ;;  %v1217_v8 = vmax.f32 %v3354_v12, 0.0  ;;  %v1218_v59 = vmax.f32 %v3355_v24, 0.0  ;;  %v3356_v34 = vld [vmem:[#allocation17_spill] sm:$0xff]  ;;  %v3357_v51 = vld [vmem:[#allocation23_spill] sm:$0xff] }
 0x1d2   :  { %1253 = vst.msk [vmem:[%s3239_s4 + $0xf0] sm:$0xff] %vm677_vm4, %v1189_v57  ;;  %1254 = vst.msk [vmem:[%s3239_s4 + $0xf8] sm:$0xff] %vm677_vm4, %v1190_v10  ;;  %v1219_v28 = vmax.f32 %v3356_v34, 0.0  ;;  %v1220_v6 = vmax.f32 %v3357_v51, 0.0  ;;  %v3358_v5 = vld [vmem:[#allocation21_spill] sm:$0xff]  ;;  %v1222_v20 = vmax.f32 %v2913_v30, 0.0 }
 0x1d3   :  { %1255 = vst.msk [vmem:[%s3239_s4 + $0x100] sm:$0xff] %vm677_vm4, %v1191_v7  ;;  %1256 = vst.msk [vmem:[%s3239_s4 + $0x108] sm:$0xff] %vm677_vm4, %v1192_v23  ;;  %v1221_v2 = vmax.f32 %v3358_v5, 0.0 }
 0x1d4   :  { %1257 = vst.msk [vmem:[%s3239_s4 + $0x110] sm:$0xff] %vm677_vm4, %v1193_v40  ;;  %1258 = vst.msk [vmem:[%s3239_s4 + $0x118] sm:$0xff] %vm677_vm4, %v1194_v56 }
 0x1d5   :  { %1259 = vst.msk [vmem:[%s3239_s4 + $0x120] sm:$0xff] %vm677_vm4, %v1195_v1  ;;  %1260 = vst.msk [vmem:[%s3239_s4 + $0x128] sm:$0xff] %vm677_vm4, %v1196_v39 }
 0x1d6   :  { %1261 = vst.msk [vmem:[%s3239_s4 + $0x130] sm:$0xff] %vm677_vm4, %v1197_v31  ;;  %1262 = vst.msk [vmem:[%s3239_s4 + $0x138] sm:$0xff] %vm677_vm4, %v1198_v16 }
 0x1d7   :  { %1263 = vst.msk [vmem:[%s3239_s4 + $0x140] sm:$0xff] %vm677_vm4, %v1199_v9  ;;  %1264 = vst.msk [vmem:[%s3239_s4 + $0x148] sm:$0xff] %vm677_vm4, %v1200_v53 }
 0x1d8   :  { %1265 = vst.msk [vmem:[%s3239_s4 + $0x150] sm:$0xff] %vm677_vm4, %v1201_v3  ;;  %1266 = vst.msk [vmem:[%s3239_s4 + $0x158] sm:$0xff] %vm677_vm4, %v1202_v0 }
 0x1d9   :  { %1267 = vst.msk [vmem:[%s3239_s4 + $0x160] sm:$0xff] %vm677_vm4, %v1203_v11  ;;  %1268 = vst.msk [vmem:[%s3239_s4 + $0x168] sm:$0xff] %vm677_vm4, %v1204_v38 }
 0x1da   :  { %1269 = vst.msk [vmem:[%s3239_s4 + $0x170] sm:$0xff] %vm677_vm4, %v1205_v45  ;;  %1270 = vst.msk [vmem:[%s3239_s4 + $0x178] sm:$0xff] %vm677_vm4, %v1206_v4 }
 0x1db   :  { %1271 = vst.msk [vmem:[%s3239_s4 + $0x180] sm:$0xff] %vm677_vm4, %v1207_v29  ;;  %1272 = vst.msk [vmem:[%s3239_s4 + $0x188] sm:$0xff] %vm677_vm4, %v1208_v37 }
 0x1dc   :  { %1273 = vst.msk [vmem:[%s3239_s4 + $0x190] sm:$0xff] %vm677_vm4, %v1209_v26  ;;  %1274 = vst.msk [vmem:[%s3239_s4 + $0x198] sm:$0xff] %vm677_vm4, %v1210_v36 }
 0x1dd   :  { %1275 = vst.msk [vmem:[%s3239_s4 + $0x1a0] sm:$0xff] %vm677_vm4, %v1211_v48  ;;  %1276 = vst.msk [vmem:[%s3239_s4 + $0x1a8] sm:$0xff] %vm677_vm4, %v1212_v50 }
 0x1de   :  { %1277 = vst.msk [vmem:[%s3239_s4 + $0x1b0] sm:$0xff] %vm677_vm4, %v1213_v62  ;;  %1278 = vst.msk [vmem:[%s3239_s4 + $0x1b8] sm:$0xff] %vm677_vm4, %v1214_v58 }
 0x1df   :  { %1279 = vst.msk [vmem:[%s3239_s4 + $0x1c0] sm:$0xff] %vm677_vm4, %v1215_v52  ;;  %1280 = vst.msk [vmem:[%s3239_s4 + $0x1c8] sm:$0xff] %vm677_vm4, %v1216_v47 }
 0x1e0   :  { %1281 = vst.msk [vmem:[%s3239_s4 + $0x1d0] sm:$0xff] %vm677_vm4, %v1217_v8  ;;  %1282 = vst.msk [vmem:[%s3239_s4 + $0x1d8] sm:$0xff] %vm677_vm4, %v1218_v59 }
 0x1e1   :  { %1283 = vst.msk [vmem:[%s3239_s4 + $0x1e0] sm:$0xff] %vm677_vm4, %v1219_v28  ;;  %1284 = vst.msk [vmem:[%s3239_s4 + $0x1e8] sm:$0xff] %vm677_vm4, %v1220_v6 }
 0x1e2   :  { %1285 = vst.msk [vmem:[%s3239_s4 + $0x1f0] sm:$0xff] %vm677_vm4, %v1221_v2  ;;  %1286 = vst.msk [vmem:[%s3239_s4 + $0x1f8] sm:$0xff] %vm677_vm4, %v1222_v20 }

// kernel: st_res_block_forward.7
= control target key start
LH: loop header
LB: loop body
LE: loop exit
PB: predicated region body
PF: predicated region fallthrough
CT: control target
= control target key end

     0   :  { %vm99_vm0 = vcmask 883712   ;;  %vm292_vm1 = vcmask 1043456   ;;  %vm1776_vm2 = vmmov 1   ;;  %s3600_s0 = inlined_call_operand.vmem [shape: f32[512,108], index: 0, kind: input, shape index: {}]   ;;  %s3601_s1 = inlined_call_operand.vmem [shape: f32[108,16], index: 1, kind: input, shape index: {}]   ;;  %s3602_s2 = inlined_call_operand.vmem [shape: f32[1,16], index: 2, kind: input, shape index: {}]   ;;  %s3603_s3 = inlined_call_operand.vmem [shape: f32[1,16], index: 3, kind: input, shape index: {}]   ;;  %s3604_s4 = inlined_call_operand.vmem [shape: f32[512,16], index: 4, kind: input, shape index: {}]   ;;  %s3605_s5 = inlined_call_operand.hbm [shape: f32[512,16], index: 5, kind: output, shape index: {}]  }
   0x1   :  { %v85_v0 = vld [vmem:[%s3601_s1] sm:$0xff]  ;;  %v86_v1 = vld [vmem:[%s3601_s1 + $0x8] sm:$0xff]  ;;  %v87_v2 = vld [vmem:[%s3601_s1 + $0x10] sm:$0xff] }
   0x2   :  { %v1702_v3 = vpack.c.bf16 %v86_v1, %v85_v0  ;;  %v88_v4 = vld [vmem:[%s3601_s1 + $0x18] sm:$0xff]  ;;  %v89_v6 = vld [vmem:[%s3601_s1 + $0x20] sm:$0xff]  ;;  %v90_v7 = vld [vmem:[%s3601_s1 + $0x28] sm:$0xff] }
   0x3   :  { %v1706_v5 = vpack.c.bf16 %v88_v4, %v87_v2  ;;  %v1710_v8 = vpack.c.bf16 %v90_v7, %v89_v6  ;;  %v21_v9 = vld [vmem:[%s3600_s0] sm:$0xff]  ;;  %v91_v10 = vld [vmem:[%s3601_s1 + $0x30] sm:$0xff]  ;;  %v92_v11 = vld [vmem:[%s3601_s1 + $0x38] sm:$0xff] }
   0x4   :  { %1703 = vmatprep.subr.bf16.mxu0 %v1702_v3  ;;  %1732 = vmatprep.subr.bf16.mxu1 %v1702_v3  ;;  %v1714_v12 = vpack.c.bf16 %v92_v11, %v91_v10  ;;  %v93_v13 = vld [vmem:[%s3601_s1 + $0x40] sm:$0xff]  ;;  %v94_v14 = vld [vmem:[%s3601_s1 + $0x48] sm:$0xff]  ;;  %v95_v16 = vld [vmem:[%s3601_s1 + $0x50] sm:$0xff] }
   0x5   :  { %1705 = vmatpush3.bf16.msra.mxu0 %v1702_v3  ;;  %1739 = vmatpush3.bf16.msra.mxu1 %v1702_v3  ;;  %v1718_v15 = vpack.c.bf16 %v94_v14, %v93_v13  ;;  %v96_v17 = vld [vmem:[%s3601_s1 + $0x58] sm:$0xff]  ;;  %v53_v18 = vld [vmem:[%s3600_s0 + $0x100] sm:$0xff]  ;;  %v98_v21 = vld [vmem:[%s3601_s1 + $0x68] sm:$0xf] }
   0x6   :  { %1707 = vmatprep.subr.bf16.mxu0 %v1706_v5  ;;  %1733 = vmatprep.subr.bf16.mxu1 %v1706_v5  ;;  %v1722_v19 = vpack.c.bf16 %v96_v17, %v95_v16  ;;  %v97_v20 = vld [vmem:[%s3601_s1 + $0x60] sm:$0xff]  ;;  %vm1727_vm3 = vmpackc.low %vm292_vm1, %vm1776_vm2 }
   0x7   :  { %1606 = vmatprep.mubr.msk.f32.mxu0 %vm99_vm0, %v21_v9  ;;  %1654 = vmatprep.mubr.msk.f32.mxu1 %vm99_vm0, %v53_v18  ;;  %v1726_v22 = vpack.c.bf16 %v98_v21, %v97_v20 }
   0x9   :  { %1709 = vmatpush3.bf16.msra.mxu0 %v1706_v5  ;;  %1740 = vmatpush3.bf16.msra.mxu1 %v1706_v5 }
   0xa   :  { %1711 = vmatprep.subr.bf16.mxu0 %v1710_v8  ;;  %1734 = vmatprep.subr.bf16.mxu1 %v1710_v8 }
   0xd   :  { %1713 = vmatpush3.bf16.msra.mxu0 %v1710_v8  ;;  %1741 = vmatpush3.bf16.msra.mxu1 %v1710_v8 }
   0xe   :  { %1715 = vmatprep.subr.bf16.mxu0 %v1714_v12  ;;  %1735 = vmatprep.subr.bf16.mxu1 %v1714_v12 }
  0x11   :  { %1717 = vmatpush3.bf16.msra.mxu0 %v1714_v12  ;;  %1742 = vmatpush3.bf16.msra.mxu1 %v1714_v12 }
  0x12   :  { %1719 = vmatprep.subr.bf16.mxu0 %v1718_v15  ;;  %1736 = vmatprep.subr.bf16.mxu1 %v1718_v15 }
  0x15   :  { %1721 = vmatpush3.bf16.msra.mxu0 %v1718_v15  ;;  %1743 = vmatpush3.bf16.msra.mxu1 %v1718_v15 }
  0x16   :  { %1723 = vmatprep.subr.bf16.mxu0 %v1722_v19  ;;  %1737 = vmatprep.subr.bf16.mxu1 %v1722_v19 }
  0x19   :  { %1725 = vmatpush3.bf16.msra.mxu0 %v1722_v19  ;;  %1744 = vmatpush3.bf16.msra.mxu1 %v1722_v19 }
  0x1a   :  { %1728 = vmatprep.subr.msk.bf16.mxu0 %vm1727_vm3, %v1726_v22  ;;  %1738 = vmatprep.subr.msk.bf16.mxu1 %vm1727_vm3, %v1726_v22 }
  0x1b   :  { %10 = vsyncpa [#allocation3], 0  ;;  %v22_v23 = vld [vmem:[%s3600_s0 + $0x8] sm:$0xff]  ;;  %v23_v25 = vld [vmem:[%s3600_s0 + $0x10] sm:$0xff]  ;;  %vm681_vm4 = vcmask 130048  }
  0x1c   :  { %v54_v24 = vld [vmem:[%s3600_s0 + $0x108] sm:$0xff]  ;;  %v55_v26 = vld [vmem:[%s3600_s0 + $0x110] sm:$0xff]  ;;  %v24_v27 = vld [vmem:[%s3600_s0 + $0x18] sm:$0xff] }
  0x1d   :  { %1731 = vmatpush3.bf16.msk.msra.mxu0 %vm1727_vm3, %v1726_v22  ;;  %1745 = vmatpush3.bf16.msk.msra.mxu1 %vm1727_vm3, %v1726_v22  ;;  %v56_v28 = vld [vmem:[%s3600_s0 + $0x118] sm:$0xff]  ;;  %v25_v29 = vld [vmem:[%s3600_s0 + $0x20] sm:$0xff]  ;;  %v26_v31 = vld [vmem:[%s3600_s0 + $0x28] sm:$0xff] }
  0x1e   :  { %v57_v30 = vld [vmem:[%s3600_s0 + $0x120] sm:$0xff]  ;;  %v58_v32 = vld [vmem:[%s3600_s0 + $0x128] sm:$0xff]  ;;  %v27_v33 = vld [vmem:[%s3600_s0 + $0x30] sm:$0xff] }
  0x1f   :  { %v59_v34 = vld [vmem:[%s3600_s0 + $0x130] sm:$0xff]  ;;  %v28_v35 = vld [vmem:[%s3600_s0 + $0x38] sm:$0xff]  ;;  %v29_v37 = vld [vmem:[%s3600_s0 + $0x40] sm:$0xff] }
  0x20   :  { %1607 = vmatmul.mubr.msk.f32.vlgmr.msra.gmra.mrb[0].mxu0 %vm99_vm0, %v22_v23  ;;  %1655 = vmatmul.mubr.msk.f32.vlgmr.msra.gmra.mrb[0].mxu1 %vm99_vm0, %v54_v24  ;;  %v60_v36 = vld [vmem:[%s3600_s0 + $0x138] sm:$0xff]  ;;  %v61_v38 = vld [vmem:[%s3600_s0 + $0x140] sm:$0xff]  ;;  %v30_v39 = vld [vmem:[%s3600_s0 + $0x48] sm:$0xff] }
  0x21   :  { %1609 = vmatprep.mubr.msk.f32.mxu0 %vm99_vm0, %v23_v25  ;;  %1657 = vmatprep.mubr.msk.f32.mxu1 %vm99_vm0, %v55_v26  ;;  %v62_v40 = vld [vmem:[%s3600_s0 + $0x148] sm:$0xff]  ;;  %v31_v41 = vld [vmem:[%s3600_s0 + $0x50] sm:$0xff]  ;;  %v32_v43 = vld [vmem:[%s3600_s0 + $0x58] sm:$0xff] }
  0x22   :  { %v63_v42 = vld [vmem:[%s3600_s0 + $0x150] sm:$0xff]  ;;  %v64_v44 = vld [vmem:[%s3600_s0 + $0x158] sm:$0xff]  ;;  %v33_v45 = vld [vmem:[%s3600_s0 + $0x60] sm:$0xff] }
  0x23   :  { %v65_v46 = vld [vmem:[%s3600_s0 + $0x160] sm:$0xff]  ;;  %v34_v47 = vld [vmem:[%s3600_s0 + $0x68] sm:$0xff]  ;;  %v35_v49 = vld [vmem:[%s3600_s0 + $0x70] sm:$0xff] }
  0x24   :  { %1610 = vmatmul.mubr.msk.f32.gmra.mrb[2].mxu0 %vm99_vm0, %v24_v27  ;;  %1658 = vmatmul.mubr.msk.f32.gmra.mrb[2].mxu1 %vm99_vm0, %v56_v28  ;;  %v66_v48 = vld [vmem:[%s3600_s0 + $0x168] sm:$0xff]  ;;  %v67_v50 = vld [vmem:[%s3600_s0 + $0x170] sm:$0xff]  ;;  %v36_v51 = vld [vmem:[%s3600_s0 + $0x78] sm:$0xff] }
  0x25   :  { %1612 = vmatprep.mubr.msk.f32.mxu0 %vm99_vm0, %v25_v29  ;;  %1660 = vmatprep.mubr.msk.f32.mxu1 %vm99_vm0, %v57_v30  ;;  %v68_v52 = vld [vmem:[%s3600_s0 + $0x178] sm:$0xff]  ;;  %v37_v53 = vld [vmem:[%s3600_s0 + $0x80] sm:$0xff]  ;;  %v38_v55 = vld [vmem:[%s3600_s0 + $0x88] sm:$0xff] }
  0x26   :  { %v69_v54 = vld [vmem:[%s3600_s0 + $0x180] sm:$0xff]  ;;  %v70_v56 = vld [vmem:[%s3600_s0 + $0x188] sm:$0xff]  ;;  %v39_v57 = vld [vmem:[%s3600_s0 + $0x90] sm:$0xff] }
  0x27   :  { %v71_v58 = vld [vmem:[%s3600_s0 + $0x190] sm:$0xff]  ;;  %v40_v59 = vld [vmem:[%s3600_s0 + $0x98] sm:$0xff]  ;;  %v41_v61 = vld [vmem:[%s3600_s0 + $0xa0] sm:$0xff] }
  0x28   :  { %1613 = vmatmul.mubr.msk.f32.gmra.mrb[4].mxu0 %vm99_vm0, %v26_v31  ;;  %1661 = vmatmul.mubr.msk.f32.gmra.mrb[4].mxu1 %vm99_vm0, %v58_v32  ;;  %v72_v60 = vld [vmem:[%s3600_s0 + $0x198] sm:$0xff]  ;;  %v73_v62 = vld [vmem:[%s3600_s0 + $0x1a0] sm:$0xff]  ;;  %v42_v63 = vld [vmem:[%s3600_s0 + $0xa8] sm:$0xff] }
  0x29   :  { %1615 = vmatprep.mubr.msk.f32.mxu0 %vm99_vm0, %v27_v33  ;;  %1663 = vmatprep.mubr.msk.f32.mxu1 %vm99_vm0, %v59_v34  ;;  %v74_v0 = vld [vmem:[%s3600_s0 + $0x1a8] sm:$0xff]  ;;  %v43_v1 = vld [vmem:[%s3600_s0 + $0xb0] sm:$0xff]  ;;  %v44_v3 = vld [vmem:[%s3600_s0 + $0xb8] sm:$0xff] }
  0x2a   :  { %v75_v2 = vld [vmem:[%s3600_s0 + $0x1b0] sm:$0xff]  ;;  %v76_v4 = vld [vmem:[%s3600_s0 + $0x1b8] sm:$0xff]  ;;  %v45_v5 = vld [vmem:[%s3600_s0 + $0xc0] sm:$0xff] }
  0x2b   :  { %v77_v6 = vld [vmem:[%s3600_s0 + $0x1c0] sm:$0xff]  ;;  %v46_v7 = vld [vmem:[%s3600_s0 + $0xc8] sm:$0xff]  ;;  %v47_v9 = vld [vmem:[%s3600_s0 + $0xd0] sm:$0xff] }
  0x2c   :  { %1616 = vmatmul.mubr.msk.f32.gmra.mrb[6].mxu0 %vm99_vm0, %v28_v35  ;;  %1664 = vmatmul.mubr.msk.f32.gmra.mrb[6].mxu1 %vm99_vm0, %v60_v36  ;;  %v78_v8 = vld [vmem:[%s3600_s0 + $0x1c8] sm:$0xff]  ;;  %v79_v10 = vld [vmem:[%s3600_s0 + $0x1d0] sm:$0xff]  ;;  %v48_v11 = vld [vmem:[%s3600_s0 + $0xd8] sm:$0xff] }
  0x2d   :  { %1618 = vmatprep.mubr.msk.f32.mxu0 %vm99_vm0, %v29_v37  ;;  %1666 = vmatprep.mubr.msk.f32.mxu1 %vm99_vm0, %v61_v38  ;;  %v80_v12 = vld [vmem:[%s3600_s0 + $0x1d8] sm:$0xff]  ;;  %v49_v13 = vld [vmem:[%s3600_s0 + $0xe0] sm:$0xff]  ;;  %v50_v15 = vld [vmem:[%s3600_s0 + $0xe8] sm:$0xff] }
  0x2e   :  { %v81_v14 = vld [vmem:[%s3600_s0 + $0x1e0] sm:$0xff]  ;;  %v82_v16 = vld [vmem:[%s3600_s0 + $0x1e8] sm:$0xff]  ;;  %v51_v17 = vld [vmem:[%s3600_s0 + $0xf0] sm:$0xff] }
  0x2f   :  { %v83_v18 = vld [vmem:[%s3600_s0 + $0x1f0] sm:$0xff]  ;;  %v52_v19 = vld [vmem:[%s3600_s0 + $0xf8] sm:$0xff] }
  0x30   :  { %1619 = vmatmul.mubr.msk.f32.gmra.mrb[8].mxu0 %vm99_vm0, %v30_v39  ;;  %1667 = vmatmul.mubr.msk.f32.gmra.mrb[8].mxu1 %vm99_vm0, %v62_v40  ;;  %v84_v20 = vld [vmem:[%s3600_s0 + $0x1f8] sm:$0xff] }
  0x31   :  { %1621 = vmatprep.mubr.msk.f32.mxu0 %vm99_vm0, %v31_v41  ;;  %1669 = vmatprep.mubr.msk.f32.mxu1 %vm99_vm0, %v63_v42 }
  0x34   :  { %1622 = vmatmul.mubr.msk.f32.gmra.mrb[10].mxu0 %vm99_vm0, %v32_v43  ;;  %1670 = vmatmul.mubr.msk.f32.gmra.mrb[10].mxu1 %vm99_vm0, %v64_v44 }
  0x35   :  { %1624 = vmatprep.mubr.msk.f32.mxu0 %vm99_vm0, %v33_v45  ;;  %1672 = vmatprep.mubr.msk.f32.mxu1 %vm99_vm0, %v65_v46 }
  0x38   :  { %1625 = vmatmul.mubr.msk.f32.gmra.mrb[12].mxu0 %vm99_vm0, %v34_v47  ;;  %1673 = vmatmul.mubr.msk.f32.gmra.mrb[12].mxu1 %vm99_vm0, %v66_v48 }
  0x39   :  { %1627 = vmatprep.mubr.msk.f32.mxu0 %vm99_vm0, %v35_v49  ;;  %1675 = vmatprep.mubr.msk.f32.mxu1 %vm99_vm0, %v67_v50 }
  0x3c   :  { %1628 = vmatmul.mubr.msk.f32.gmra.mrb[14].mxu0 %vm99_vm0, %v36_v51  ;;  %1676 = vmatmul.mubr.msk.f32.gmra.mrb[14].mxu1 %vm99_vm0, %v68_v52 }
  0x3d   :  { %1630 = vmatprep.mubr.msk.f32.mxu0 %vm99_vm0, %v37_v53  ;;  %1678 = vmatprep.mubr.msk.f32.mxu1 %vm99_vm0, %v69_v54 }
  0x40   :  { %1631 = vmatmul.mubr.msk.f32.gmra.mrb[16].mxu0 %vm99_vm0, %v38_v55  ;;  %1679 = vmatmul.mubr.msk.f32.gmra.mrb[16].mxu1 %vm99_vm0, %v70_v56 }
  0x41   :  { %1633 = vmatprep.mubr.msk.f32.mxu0 %vm99_vm0, %v39_v57  ;;  %1681 = vmatprep.mubr.msk.f32.mxu1 %vm99_vm0, %v71_v58 }
  0x44   :  { %1634 = vmatmul.mubr.msk.f32.gmra.mrb[18].mxu0 %vm99_vm0, %v40_v59  ;;  %1682 = vmatmul.mubr.msk.f32.gmra.mrb[18].mxu1 %vm99_vm0, %v72_v60 }
  0x45   :  { %1636 = vmatprep.mubr.msk.f32.mxu0 %vm99_vm0, %v41_v61  ;;  %1684 = vmatprep.mubr.msk.f32.mxu1 %vm99_vm0, %v73_v62 }
  0x48   :  { %1637 = vmatmul.mubr.msk.f32.gmra.mrb[20].mxu0 %vm99_vm0, %v42_v63  ;;  %1685 = vmatmul.mubr.msk.f32.gmra.mrb[20].mxu1 %vm99_vm0, %v74_v0 }
  0x49   :  { %1639 = vmatprep.mubr.msk.f32.mxu0 %vm99_vm0, %v43_v1  ;;  %1687 = vmatprep.mubr.msk.f32.mxu1 %vm99_vm0, %v75_v2 }
  0x4c   :  { %1640 = vmatmul.mubr.msk.f32.gmra.mrb[22].mxu0 %vm99_vm0, %v44_v3  ;;  %1688 = vmatmul.mubr.msk.f32.gmra.mrb[22].mxu1 %vm99_vm0, %v76_v4 }
  0x4d   :  { %1642 = vmatprep.mubr.msk.f32.mxu0 %vm99_vm0, %v45_v5  ;;  %1690 = vmatprep.mubr.msk.f32.mxu1 %vm99_vm0, %v77_v6 }
  0x50   :  { %1643 = vmatmul.mubr.msk.f32.gmra.mrb[24].mxu0 %vm99_vm0, %v46_v7  ;;  %1691 = vmatmul.mubr.msk.f32.gmra.mrb[24].mxu1 %vm99_vm0, %v78_v8 }
  0x51   :  { %1645 = vmatprep.mubr.msk.f32.mxu0 %vm99_vm0, %v47_v9  ;;  %1693 = vmatprep.mubr.msk.f32.mxu1 %vm99_vm0, %v79_v10 }
  0x54   :  { %1646 = vmatmul.mubr.msk.f32.gmra.mrb[26].mxu0 %vm99_vm0, %v48_v11  ;;  %1694 = vmatmul.mubr.msk.f32.gmra.mrb[26].mxu1 %vm99_vm0, %v80_v12 }
  0x55   :  { %1648 = vmatprep.mubr.msk.f32.mxu0 %vm99_vm0, %v49_v13  ;;  %1696 = vmatprep.mubr.msk.f32.mxu1 %vm99_vm0, %v81_v14 }
  0x58   :  { %1649 = vmatmul.mubr.msk.f32.gmra.mrb[28].mxu0 %vm99_vm0, %v50_v15  ;;  %1697 = vmatmul.mubr.msk.f32.gmra.mrb[28].mxu1 %vm99_vm0, %v82_v16 }
  0x59   :  { %1651 = vmatprep.mubr.msk.f32.mxu0 %vm99_vm0, %v51_v17  ;;  %1699 = vmatprep.mubr.msk.f32.mxu1 %vm99_vm0, %v83_v18 }
  0x5c   :  { %1652 = vmatmul.mubr.msk.f32.gmra.mrb[30].mxu0 %vm99_vm0, %v52_v19  ;;  %1700 = vmatmul.mubr.msk.f32.gmra.mrb[30].mxu1 %vm99_vm0, %v84_v20 }
  0xf3   :  { %v2108_v21 = vpop.f32.mrb[0].mxu0  ;;  %v2110_v22 = vpop.f32.mrb[0].mxu1 }
  0xf4   :  { %v683_v23 = vsel %vm681_vm4, %v2108_v21, 0.0  ;;  %v816_v24 = vmul.f32 %v2108_v21, %v2108_v21  ;;  %v2116_v25 = vpop.f32.mrb[1].mxu0  ;;  %v2118_v26 = vpop.f32.mrb[1].mxu1 }
  0xf5   :  { %v682_v27 = vsel %vm681_vm4, %v2116_v25, 0.0  ;;  %v815_v28 = vmul.f32 %v2116_v25, %v2116_v25 }
  0xf6   :  { %v880_v29 = vsel %vm681_vm4, %v816_v24, 0.0  ;;  %v684_v30 = vadd.f32 %v683_v23, %v682_v27 }
  0xf7   :  { %v879_v31 = vsel %vm681_vm4, %v815_v28, 0.0  ;;  %v2126_v32 = vpop.f32.mrb[2].mxu0  ;;  %v2128_v33 = vpop.f32.mrb[2].mxu1 }
  0xf8   :  { %v881_v34 = vadd.f32 %v880_v29, %v879_v31  ;;  %v2130_v35 = vpop.f32.mrb[3].mxu0  ;;  %v2132_v36 = vpop.f32.mrb[3].mxu1  ;;  %v818_v37 = vmul.f32 %v2126_v32, %v2126_v32  ;;  %v687_v41 = vsel %vm681_vm4, %v2126_v32, 0.0 }
  0xf9   :  { %v685_v38 = vsel %vm681_vm4, %v2130_v35, 0.0  ;;  %v817_v39 = vmul.f32 %v2130_v35, %v2130_v35 }
  0xfa   :  { %v686_v40 = vadd.f32 %v685_v38, %v684_v30  ;;  %v884_v49 = vsel %vm681_vm4, %v818_v37, 0.0 }
  0xfb   :  { %v882_v42 = vsel %vm681_vm4, %v817_v39, 0.0  ;;  %v2143_v43 = vpop.f32.mrb[4].mxu0  ;;  %v2145_v44 = vpop.f32.mrb[4].mxu1 }
  0xfc   :  { %v883_v45 = vadd.f32 %v882_v42, %v881_v34  ;;  %v2147_v46 = vpop.f32.mrb[5].mxu0  ;;  %v688_v47 = vadd.f32 %v687_v41, %v686_v40  ;;  %v2149_v48 = vpop.f32.mrb[5].mxu1  ;;  %v820_v50 = vmul.f32 %v2143_v43, %v2143_v43  ;;  %v691_v55 = vsel %vm681_vm4, %v2143_v43, 0.0 }
  0xfd   :  { %v689_v51 = vsel %vm681_vm4, %v2147_v46, 0.0  ;;  %v819_v52 = vmul.f32 %v2147_v46, %v2147_v46 }
  0xfe   :  { %v690_v53 = vadd.f32 %v689_v51, %v688_v47  ;;  %v885_v54 = vadd.f32 %v884_v49, %v883_v45  ;;  %v888_v63 = vsel %vm681_vm4, %v820_v50, 0.0 }
  0xff   :  { %v886_v56 = vsel %vm681_vm4, %v819_v52, 0.0  ;;  %v2161_v57 = vpop.f32.mrb[6].mxu0  ;;  %v2163_v58 = vpop.f32.mrb[6].mxu1 }
 0x100   :  { %v887_v59 = vadd.f32 %v886_v56, %v885_v54  ;;  %v2165_v60 = vpop.f32.mrb[7].mxu0  ;;  %v692_v61 = vadd.f32 %v691_v55, %v690_v53  ;;  %v2167_v62 = vpop.f32.mrb[7].mxu1  ;;  %v822_v0 = vmul.f32 %v2161_v57, %v2161_v57  ;;  %v695_v5 = vsel %vm681_vm4, %v2161_v57, 0.0 }
 0x101   :  { %v693_v1 = vsel %vm681_vm4, %v2165_v60, 0.0  ;;  %v821_v2 = vmul.f32 %v2165_v60, %v2165_v60 }
 0x102   :  { %v694_v3 = vadd.f32 %v693_v1, %v692_v61  ;;  %v889_v4 = vadd.f32 %v888_v63, %v887_v59  ;;  %v892_v13 = vsel %vm681_vm4, %v822_v0, 0.0 }
 0x103   :  { %v890_v6 = vsel %vm681_vm4, %v821_v2, 0.0  ;;  %v2179_v7 = vpop.f32.mrb[8].mxu0  ;;  %v2181_v8 = vpop.f32.mrb[8].mxu1 }
 0x104   :  { %v891_v9 = vadd.f32 %v890_v6, %v889_v4  ;;  %v2183_v10 = vpop.f32.mrb[9].mxu0  ;;  %v696_v11 = vadd.f32 %v695_v5, %v694_v3  ;;  %v2185_v12 = vpop.f32.mrb[9].mxu1  ;;  %v824_v14 = vmul.f32 %v2179_v7, %v2179_v7  ;;  %v699_v19 = vsel %vm681_vm4, %v2179_v7, 0.0 }
 0x105   :  { %v697_v15 = vsel %vm681_vm4, %v2183_v10, 0.0  ;;  %v823_v16 = vmul.f32 %v2183_v10, %v2183_v10 }
 0x106   :  { %v698_v17 = vadd.f32 %v697_v15, %v696_v11  ;;  %v893_v18 = vadd.f32 %v892_v13, %v891_v9  ;;  %v896_v31 = vsel %vm681_vm4, %v824_v14, 0.0 }
 0x107   :  { %v894_v20 = vsel %vm681_vm4, %v823_v16, 0.0  ;;  %v2197_v23 = vpop.f32.mrb[10].mxu0  ;;  %v2199_v24 = vpop.f32.mrb[10].mxu1 }
 0x108   :  { %v895_v27 = vadd.f32 %v894_v20, %v893_v18  ;;  %v2201_v28 = vpop.f32.mrb[11].mxu0  ;;  %v700_v29 = vadd.f32 %v699_v19, %v698_v17  ;;  %v2203_v30 = vpop.f32.mrb[11].mxu1  ;;  %v826_v34 = vmul.f32 %v2197_v23, %v2197_v23  ;;  %v703_v41 = vsel %vm681_vm4, %v2197_v23, 0.0 }
 0x109   :  { %v701_v37 = vsel %vm681_vm4, %v2201_v28, 0.0  ;;  %v825_v38 = vmul.f32 %v2201_v28, %v2201_v28 }
 0x10a   :  { %v702_v39 = vadd.f32 %v701_v37, %v700_v29  ;;  %v897_v40 = vadd.f32 %v896_v31, %v895_v27  ;;  %v900_v53 = vsel %vm681_vm4, %v826_v34, 0.0 }
 0x10b   :  { %v898_v42 = vsel %vm681_vm4, %v825_v38, 0.0  ;;  %v2215_v45 = vpop.f32.mrb[12].mxu0  ;;  %v2217_v47 = vpop.f32.mrb[12].mxu1 }
 0x10c   :  { %3632 = vst [vmem:[#allocation5_spill] sm:$0xff] %v2215_v45  ;;  %v899_v49 = vadd.f32 %v898_v42, %v897_v40  ;;  %v2219_v50 = vpop.f32.mrb[13].mxu0  ;;  %v704_v51 = vadd.f32 %v703_v41, %v702_v39  ;;  %v2221_v52 = vpop.f32.mrb[13].mxu1  ;;  %v828_v54 = vmul.f32 %v2215_v45, %v2215_v45  ;;  %v707_v63 = vsel %vm681_vm4, %v2215_v45, 0.0 }
 0x10d   :  { %v705_v55 = vsel %vm681_vm4, %v2219_v50, 0.0  ;;  %v827_v56 = vmul.f32 %v2219_v50, %v2219_v50 }
 0x10e   :  { %v706_v59 = vadd.f32 %v705_v55, %v704_v51  ;;  %v901_v61 = vadd.f32 %v900_v53, %v899_v49  ;;  %v904_v9 = vsel %vm681_vm4, %v828_v54, 0.0 }
 0x10f   :  { %v902_v0 = vsel %vm681_vm4, %v827_v56, 0.0  ;;  %v2233_v1 = vpop.f32.mrb[14].mxu0  ;;  %v2235_v2 = vpop.f32.mrb[14].mxu1 }
 0x110   :  { %3633 = vst [vmem:[#allocation6_spill] sm:$0xff] %v2233_v1  ;;  %v903_v3 = vadd.f32 %v902_v0, %v901_v61  ;;  %v2237_v4 = vpop.f32.mrb[15].mxu0  ;;  %v708_v5 = vadd.f32 %v707_v63, %v706_v59  ;;  %v2239_v6 = vpop.f32.mrb[15].mxu1  ;;  %v830_v11 = vmul.f32 %v2233_v1, %v2233_v1  ;;  %v711_v17 = vsel %vm681_vm4, %v2233_v1, 0.0 }
 0x111   :  { %3634 = vst [vmem:[#allocation7_spill] sm:$0xff] %v2237_v4  ;;  %v709_v13 = vsel %vm681_vm4, %v2237_v4, 0.0  ;;  %v829_v14 = vmul.f32 %v2237_v4, %v2237_v4  ;;  %v848_v4 = vmul.f32 %v2110_v22, %v2110_v22 }
 0x112   :  { %v710_v15 = vadd.f32 %v709_v13, %v708_v5  ;;  %v905_v16 = vadd.f32 %v904_v9, %v903_v3  ;;  %v908_v37 = vsel %vm681_vm4, %v830_v11, 0.0 }
 0x113   :  { %v906_v18 = vsel %vm681_vm4, %v829_v14, 0.0  ;;  %v2251_v19 = vpop.f32.mrb[16].mxu0  ;;  %v2253_v20 = vpop.f32.mrb[16].mxu1 }
 0x114   :  { %3635 = vst [vmem:[#allocation8_spill] sm:$0xff] %v2251_v19  ;;  %v907_v27 = vadd.f32 %v906_v18, %v905_v16  ;;  %v2255_v29 = vpop.f32.mrb[17].mxu0  ;;  %v712_v31 = vadd.f32 %v711_v17, %v710_v15  ;;  %v2257_v34 = vpop.f32.mrb[17].mxu1  ;;  %v832_v38 = vmul.f32 %v2251_v19, %v2251_v19  ;;  %v715_v49 = vsel %vm681_vm4, %v2251_v19, 0.0 }
 0x115   :  { %3636 = vst [vmem:[#allocation9_spill] sm:$0xff] %v2255_v29  ;;  %v713_v39 = vsel %vm681_vm4, %v2255_v29, 0.0  ;;  %v831_v40 = vmul.f32 %v2255_v29, %v2255_v29  ;;  %v847_v29 = vmul.f32 %v2118_v26, %v2118_v26 }
 0x116   :  { %v714_v41 = vadd.f32 %v713_v39, %v712_v31  ;;  %v909_v42 = vadd.f32 %v908_v37, %v907_v27  ;;  %v912_v63 = vsel %vm681_vm4, %v832_v38, 0.0 }
 0x117   :  { %v910_v51 = vsel %vm681_vm4, %v831_v40, 0.0  ;;  %v2269_v53 = vpop.f32.mrb[18].mxu0  ;;  %v2271_v54 = vpop.f32.mrb[18].mxu1  ;;  %v942_v45 = vsel %vm681_vm4, %v847_v29, 0.0 }
 0x118   :  { %3637 = vst [vmem:[#allocation10_spill] sm:$0xff] %v2269_v53  ;;  %v911_v55 = vadd.f32 %v910_v51, %v909_v42  ;;  %v2273_v56 = vpop.f32.mrb[19].mxu0  ;;  %v716_v59 = vadd.f32 %v715_v49, %v714_v41  ;;  %v2275_v61 = vpop.f32.mrb[19].mxu1  ;;  %v834_v0 = vmul.f32 %v2269_v53, %v2269_v53  ;;  %v719_v13 = vsel %vm681_vm4, %v2269_v53, 0.0 }
 0x119   :  { %3638 = vst [vmem:[#allocation11_spill] sm:$0xff] %v2273_v56  ;;  %v717_v3 = vsel %vm681_vm4, %v2273_v56, 0.0  ;;  %v833_v5 = vmul.f32 %v2273_v56, %v2273_v56 }
 0x11a   :  { %v718_v9 = vadd.f32 %v717_v3, %v716_v59  ;;  %v913_v11 = vadd.f32 %v912_v63, %v911_v55  ;;  %v916_v37 = vsel %vm681_vm4, %v834_v0, 0.0 }
 0x11b   :  { %v914_v14 = vsel %vm681_vm4, %v833_v5, 0.0  ;;  %v2287_v15 = vpop.f32.mrb[20].mxu0  ;;  %v2289_v16 = vpop.f32.mrb[20].mxu1 }
 0x11c   :  { %3639 = vst [vmem:[#allocation12_spill] sm:$0xff] %v2287_v15  ;;  %v915_v17 = vadd.f32 %v914_v14, %v913_v11  ;;  %v2291_v18 = vpop.f32.mrb[21].mxu0  ;;  %v720_v27 = vadd.f32 %v719_v13, %v718_v9  ;;  %v2293_v31 = vpop.f32.mrb[21].mxu1  ;;  %v836_v38 = vmul.f32 %v2287_v15, %v2287_v15  ;;  %v723_v49 = vsel %vm681_vm4, %v2287_v15, 0.0 }
 0x11d   :  { %3640 = vst [vmem:[#allocation13_spill] sm:$0xff] %v2291_v18  ;;  %v721_v39 = vsel %vm681_vm4, %v2291_v18, 0.0  ;;  %v835_v40 = vmul.f32 %v2291_v18, %v2291_v18 }
 0x11e   :  { %v722_v41 = vadd.f32 %v721_v39, %v720_v27  ;;  %v917_v42 = vadd.f32 %v916_v37, %v915_v17  ;;  %v920_v9 = vsel %vm681_vm4, %v836_v38, 0.0 }
 0x11f   :  { %v918_v51 = vsel %vm681_vm4, %v835_v40, 0.0  ;;  %v2305_v55 = vpop.f32.mrb[22].mxu0  ;;  %v2307_v59 = vpop.f32.mrb[22].mxu1 }
 0x120   :  { %3641 = vst [vmem:[#allocation14_spill] sm:$0xff] %v2305_v55  ;;  %v919_v63 = vadd.f32 %v918_v51, %v917_v42  ;;  %v2309_v0 = vpop.f32.mrb[23].mxu0  ;;  %v724_v3 = vadd.f32 %v723_v49, %v722_v41  ;;  %v2311_v5 = vpop.f32.mrb[23].mxu1  ;;  %v838_v11 = vmul.f32 %v2305_v55, %v2305_v55  ;;  %v727_v37 = vsel %vm681_vm4, %v2305_v55, 0.0 }
 0x121   :  { %3642 = vst [vmem:[#allocation15_spill] sm:$0xff] %v2309_v0  ;;  %v725_v13 = vsel %vm681_vm4, %v2309_v0, 0.0  ;;  %v837_v14 = vmul.f32 %v2309_v0, %v2309_v0 }
 0x122   :  { %v726_v17 = vadd.f32 %v725_v13, %v724_v3  ;;  %v921_v27 = vadd.f32 %v920_v9, %v919_v63  ;;  %v924_v15 = vsel %vm681_vm4, %v838_v11, 0.0 }
 0x123   :  { %v922_v39 = vsel %vm681_vm4, %v837_v14, 0.0  ;;  %v2323_v40 = vpop.f32.mrb[24].mxu0  ;;  %v2325_v41 = vpop.f32.mrb[24].mxu1 }
 0x124   :  { %3643 = vst [vmem:[#allocation16_spill] sm:$0xff] %v2323_v40  ;;  %3644 = vst [vmem:[#allocation17_spill] sm:$0xff] %v2325_v41  ;;  %v923_v38 = vadd.f32 %v922_v39, %v921_v27  ;;  %v2327_v42 = vpop.f32.mrb[25].mxu0  ;;  %v728_v49 = vadd.f32 %v727_v37, %v726_v17  ;;  %v2329_v51 = vpop.f32.mrb[25].mxu1  ;;  %v840_v63 = vmul.f32 %v2323_v40, %v2323_v40  ;;  %v731_v27 = vsel %vm681_vm4, %v2323_v40, 0.0 }
 0x125   :  { %3645 = vst [vmem:[#allocation18_spill] sm:$0xff] %v2327_v42  ;;  %3646 = vst [vmem:[#allocation19_spill] sm:$0xff] %v2329_v51  ;;  %v729_v3 = vsel %vm681_vm4, %v2327_v42, 0.0  ;;  %v839_v9 = vmul.f32 %v2327_v42, %v2327_v42 }
 0x126   :  { %v730_v13 = vadd.f32 %v729_v3, %v728_v49  ;;  %v925_v14 = vadd.f32 %v924_v15, %v923_v38  ;;  %v928_v53 = vsel %vm681_vm4, %v840_v63, 0.0 }
 0x127   :  { %v926_v17 = vsel %vm681_vm4, %v839_v9, 0.0  ;;  %v2341_v37 = vpop.f32.mrb[26].mxu0  ;;  %v2343_v39 = vpop.f32.mrb[26].mxu1 }
 0x128   :  { %3647 = vst [vmem:[#allocation20_spill] sm:$0xff] %v2341_v37  ;;  %3648 = vst [vmem:[#allocation21_spill] sm:$0xff] %v2343_v39  ;;  %v927_v11 = vadd.f32 %v926_v17, %v925_v14  ;;  %v2345_v55 = vpop.f32.mrb[27].mxu0  ;;  %v732_v0 = vadd.f32 %v731_v27, %v730_v13  ;;  %v2347_v18 = vpop.f32.mrb[27].mxu1  ;;  %v842_v15 = vmul.f32 %v2341_v37, %v2341_v37  ;;  %v735_v14 = vsel %vm681_vm4, %v2341_v37, 0.0 }
 0x129   :  { %3649 = vst [vmem:[#allocation22_spill] sm:$0xff] %v2345_v55  ;;  %3650 = vst [vmem:[#allocation23_spill] sm:$0xff] %v2347_v18  ;;  %v733_v38 = vsel %vm681_vm4, %v2345_v55, 0.0  ;;  %v841_v49 = vmul.f32 %v2345_v55, %v2345_v55 }
 0x12a   :  { %v734_v3 = vadd.f32 %v733_v38, %v732_v0  ;;  %v929_v9 = vadd.f32 %v928_v53, %v927_v11  ;;  %v932_v19 = vsel %vm681_vm4, %v842_v15, 0.0 }
 0x12b   :  { %v930_v13 = vsel %vm681_vm4, %v841_v49, 0.0  ;;  %v2359_v27 = vpop.f32.mrb[28].mxu0  ;;  %v2361_v17 = vpop.f32.mrb[28].mxu1 }
 0x12c   :  { %3651 = vst [vmem:[#allocation24_spill] sm:$0xff] %v2359_v27  ;;  %3652 = vst [vmem:[#allocation25_spill] sm:$0xff] %v2361_v17  ;;  %v931_v63 = vadd.f32 %v930_v13, %v929_v9  ;;  %v2363_v40 = vpop.f32.mrb[29].mxu0  ;;  %v736_v42 = vadd.f32 %v735_v14, %v734_v3  ;;  %v2365_v56 = vpop.f32.mrb[29].mxu1  ;;  %v844_v53 = vmul.f32 %v2359_v27, %v2359_v27  ;;  %v739_v9 = vsel %vm681_vm4, %v2359_v27, 0.0 }
 0x12d   :  { %3653 = vst [vmem:[#allocation26_spill] sm:$0xff] %v2363_v40  ;;  %3654 = vst [vmem:[#allocation27_spill] sm:$0xff] %v2365_v56  ;;  %v737_v0 = vsel %vm681_vm4, %v2363_v40, 0.0  ;;  %v843_v11 = vmul.f32 %v2363_v40, %v2363_v40 }
 0x12e   :  { %v738_v38 = vadd.f32 %v737_v0, %v736_v42  ;;  %v933_v49 = vadd.f32 %v932_v19, %v931_v63  ;;  %v936_v19 = vsel %vm681_vm4, %v844_v53, 0.0 }
 0x12f   :  { %v934_v3 = vsel %vm681_vm4, %v843_v11, 0.0  ;;  %v2377_v14 = vpop.f32.mrb[30].mxu0  ;;  %v2379_v13 = vpop.f32.mrb[30].mxu1 }
 0x130   :  { %3655 = vst [vmem:[#allocation28_spill] sm:$0xff] %v2379_v13  ;;  %v935_v15 = vadd.f32 %v934_v3, %v933_v49  ;;  %v2381_v37 = vpop.f32.mrb[31].mxu0  ;;  %v740_v55 = vadd.f32 %v739_v9, %v738_v38  ;;  %v2385_v1 = vpop.f32.mrb[31].mxu1  ;;  %v846_v42 = vmul.f32 %v2377_v14, %v2377_v14  ;;  %v743_v38 = vsel %vm681_vm4, %v2377_v14, 0.0 }
 0x131   :  { %v741_v63 = vsel %vm681_vm4, %v2381_v37, 0.0  ;;  %v845_v0 = vmul.f32 %v2381_v37, %v2381_v37  ;;  %v745_v3 = vsel %vm681_vm4, %v2118_v26, 0.0 }
 0x132   :  { %v742_v11 = vadd.f32 %v741_v63, %v740_v55  ;;  %v937_v49 = vadd.f32 %v936_v19, %v935_v15  ;;  %v940_v40 = vsel %vm681_vm4, %v846_v42, 0.0  ;;  %v849_v55 = vmul.f32 %v2132_v36, %v2132_v36 }
 0x133   :  { %v938_v9 = vsel %vm681_vm4, %v845_v0, 0.0  ;;  %v747_v63 = vsel %vm681_vm4, %v2110_v22, 0.0  ;;  %v749_v0 = vsel %vm681_vm4, %v2132_v36, 0.0  ;;  %v944_v42 = vsel %vm681_vm4, %v848_v4, 0.0 }
 0x134   :  { %v744_v53 = vadd.f32 %v743_v38, %v742_v11  ;;  %v939_v27 = vadd.f32 %v938_v9, %v937_v49  ;;  %v850_v38 = vmul.f32 %v2128_v33, %v2128_v33  ;;  %v946_v29 = vsel %vm681_vm4, %v849_v55, 0.0 }
 0x135   :  { %v851_v9 = vmul.f32 %v2149_v48, %v2149_v48 }
 0x136   :  { %v941_v15 = vadd.f32 %v940_v40, %v939_v27  ;;  %v746_v19 = vadd.f32 %v745_v3, %v744_v53  ;;  %v751_v3 = vsel %vm681_vm4, %v2128_v33, 0.0  ;;  %v753_v53 = vsel %vm681_vm4, %v2149_v48, 0.0 }
 0x137   :  { %v948_v4 = vsel %vm681_vm4, %v850_v38, 0.0  ;;  %v950_v55 = vsel %vm681_vm4, %v851_v9, 0.0 }
 0x138   :  { %v943_v11 = vadd.f32 %v942_v45, %v941_v15  ;;  %v748_v49 = vadd.f32 %v747_v63, %v746_v19  ;;  %v852_v19 = vmul.f32 %v2145_v44, %v2145_v44  ;;  %v853_v63 = vmul.f32 %v2167_v62, %v2167_v62 }
 0x13a   :  { %v750_v40 = vadd.f32 %v749_v0, %v748_v49  ;;  %v945_v27 = vadd.f32 %v944_v42, %v943_v11  ;;  %v755_v49 = vsel %vm681_vm4, %v2145_v44, 0.0  ;;  %v757_v42 = vsel %vm681_vm4, %v2167_v62, 0.0 }
 0x13b   :  { %v952_v38 = vsel %vm681_vm4, %v852_v19, 0.0  ;;  %v954_v9 = vsel %vm681_vm4, %v853_v63, 0.0 }
 0x13c   :  { %v947_v45 = vadd.f32 %v946_v29, %v945_v27  ;;  %v752_v15 = vadd.f32 %v751_v3, %v750_v40  ;;  %v854_v27 = vmul.f32 %v2163_v58, %v2163_v58  ;;  %v855_v3 = vmul.f32 %v2185_v12, %v2185_v12 }
 0x13e   :  { %v754_v0 = vadd.f32 %v753_v53, %v752_v15  ;;  %v949_v11 = vadd.f32 %v948_v4, %v947_v45  ;;  %v759_v15 = vsel %vm681_vm4, %v2163_v58, 0.0  ;;  %v761_v4 = vsel %vm681_vm4, %v2185_v12, 0.0 }
 0x13f   :  { %v956_v19 = vsel %vm681_vm4, %v854_v27, 0.0  ;;  %v958_v63 = vsel %vm681_vm4, %v855_v3, 0.0 }
 0x140   :  { %v951_v29 = vadd.f32 %v950_v55, %v949_v11  ;;  %v756_v40 = vadd.f32 %v755_v49, %v754_v0  ;;  %v856_v11 = vmul.f32 %v2181_v8, %v2181_v8  ;;  %v857_v49 = vmul.f32 %v2203_v30, %v2203_v30 }
 0x142   :  { %v758_v53 = vadd.f32 %v757_v42, %v756_v40  ;;  %v953_v45 = vadd.f32 %v952_v38, %v951_v29  ;;  %v763_v40 = vsel %vm681_vm4, %v2181_v8, 0.0  ;;  %v765_v38 = vsel %vm681_vm4, %v2203_v30, 0.0 }
 0x143   :  { %v960_v27 = vsel %vm681_vm4, %v856_v11, 0.0  ;;  %v962_v3 = vsel %vm681_vm4, %v857_v49, 0.0 }
 0x144   :  { %v955_v55 = vadd.f32 %v954_v9, %v953_v45  ;;  %v760_v0 = vadd.f32 %v759_v15, %v758_v53  ;;  %v858_v45 = vmul.f32 %v2199_v24, %v2199_v24  ;;  %v859_v15 = vmul.f32 %v2221_v52, %v2221_v52 }
 0x146   :  { %v762_v42 = vadd.f32 %v761_v4, %v760_v0  ;;  %v957_v29 = vadd.f32 %v956_v19, %v955_v55  ;;  %v767_v0 = vsel %vm681_vm4, %v2199_v24, 0.0  ;;  %v769_v19 = vsel %vm681_vm4, %v2221_v52, 0.0 }
 0x147   :  { %v964_v11 = vsel %vm681_vm4, %v858_v45, 0.0  ;;  %v966_v49 = vsel %vm681_vm4, %v859_v15, 0.0 }
 0x148   :  { %v959_v9 = vadd.f32 %v958_v63, %v957_v29  ;;  %v764_v53 = vadd.f32 %v763_v40, %v762_v42  ;;  %v860_v29 = vmul.f32 %v2217_v47, %v2217_v47  ;;  %v861_v40 = vmul.f32 %v2239_v6, %v2239_v6 }
 0x14a   :  { %v766_v4 = vadd.f32 %v765_v38, %v764_v53  ;;  %v961_v55 = vadd.f32 %v960_v27, %v959_v9  ;;  %v771_v53 = vsel %vm681_vm4, %v2217_v47, 0.0  ;;  %v773_v27 = vsel %vm681_vm4, %v2239_v6, 0.0 }
 0x14b   :  { %v968_v45 = vsel %vm681_vm4, %v860_v29, 0.0  ;;  %v970_v15 = vsel %vm681_vm4, %v861_v40, 0.0 }
 0x14c   :  { %v963_v63 = vadd.f32 %v962_v3, %v961_v55  ;;  %v768_v42 = vadd.f32 %v767_v0, %v766_v4  ;;  %v862_v55 = vmul.f32 %v2235_v2, %v2235_v2  ;;  %v863_v0 = vmul.f32 %v2257_v34, %v2257_v34 }
 0x14e   :  { %v770_v38 = vadd.f32 %v769_v19, %v768_v42  ;;  %v965_v9 = vadd.f32 %v964_v11, %v963_v63  ;;  %v775_v42 = vsel %vm681_vm4, %v2235_v2, 0.0  ;;  %v777_v11 = vsel %vm681_vm4, %v2257_v34, 0.0 }
 0x14f   :  { %v972_v29 = vsel %vm681_vm4, %v862_v55, 0.0  ;;  %v974_v40 = vsel %vm681_vm4, %v863_v0, 0.0 }
 0x150   :  { %v967_v3 = vadd.f32 %v966_v49, %v965_v9  ;;  %v772_v4 = vadd.f32 %v771_v53, %v770_v38  ;;  %v864_v9 = vmul.f32 %v2253_v20, %v2253_v20  ;;  %v865_v53 = vmul.f32 %v2275_v61, %v2275_v61 }
 0x152   :  { %v774_v19 = vadd.f32 %v773_v27, %v772_v4  ;;  %v969_v63 = vadd.f32 %v968_v45, %v967_v3  ;;  %v779_v4 = vsel %vm681_vm4, %v2253_v20, 0.0  ;;  %v781_v45 = vsel %vm681_vm4, %v2275_v61, 0.0 }
 0x153   :  { %v976_v55 = vsel %vm681_vm4, %v864_v9, 0.0  ;;  %v978_v0 = vsel %vm681_vm4, %v865_v53, 0.0 }
 0x154   :  { %v971_v49 = vadd.f32 %v970_v15, %v969_v63  ;;  %v776_v38 = vadd.f32 %v775_v42, %v774_v19  ;;  %v866_v63 = vmul.f32 %v2271_v54, %v2271_v54  ;;  %v867_v42 = vmul.f32 %v2293_v31, %v2293_v31 }
 0x156   :  { %v778_v27 = vadd.f32 %v777_v11, %v776_v38  ;;  %v973_v3 = vadd.f32 %v972_v29, %v971_v49  ;;  %v783_v38 = vsel %vm681_vm4, %v2271_v54, 0.0  ;;  %v785_v29 = vsel %vm681_vm4, %v2293_v31, 0.0 }
 0x157   :  { %v980_v9 = vsel %vm681_vm4, %v866_v63, 0.0  ;;  %v982_v53 = vsel %vm681_vm4, %v867_v42, 0.0 }
 0x158   :  { %v975_v15 = vadd.f32 %v974_v40, %v973_v3  ;;  %v780_v19 = vadd.f32 %v779_v4, %v778_v27  ;;  %v868_v3 = vmul.f32 %v2289_v16, %v2289_v16  ;;  %v869_v4 = vmul.f32 %v2311_v5, %v2311_v5 }
 0x15a   :  { %v782_v11 = vadd.f32 %v781_v45, %v780_v19  ;;  %v977_v49 = vadd.f32 %v976_v55, %v975_v15  ;;  %v787_v19 = vsel %vm681_vm4, %v2289_v16, 0.0  ;;  %v789_v55 = vsel %vm681_vm4, %v2311_v5, 0.0 }
 0x15b   :  { %v984_v63 = vsel %vm681_vm4, %v868_v3, 0.0  ;;  %v986_v42 = vsel %vm681_vm4, %v869_v4, 0.0 }
 0x15c   :  { %v979_v40 = vadd.f32 %v978_v0, %v977_v49  ;;  %v784_v27 = vadd.f32 %v783_v38, %v782_v11  ;;  %v870_v49 = vmul.f32 %v2307_v59, %v2307_v59  ;;  %v871_v38 = vmul.f32 %v2329_v51, %v2329_v51 }
 0x15e   :  { %v786_v45 = vadd.f32 %v785_v29, %v784_v27  ;;  %v981_v15 = vadd.f32 %v980_v9, %v979_v40  ;;  %v791_v27 = vsel %vm681_vm4, %v2307_v59, 0.0  ;;  %v793_v9 = vsel %vm681_vm4, %v2329_v51, 0.0 }
 0x15f   :  { %v988_v3 = vsel %vm681_vm4, %v870_v49, 0.0  ;;  %v990_v4 = vsel %vm681_vm4, %v871_v38, 0.0 }
 0x160   :  { %v983_v0 = vadd.f32 %v982_v53, %v981_v15  ;;  %v788_v11 = vadd.f32 %v787_v19, %v786_v45  ;;  %v872_v15 = vmul.f32 %v2325_v41, %v2325_v41  ;;  %v873_v19 = vmul.f32 %v2347_v18, %v2347_v18 }
 0x162   :  { %v790_v29 = vadd.f32 %v789_v55, %v788_v11  ;;  %v985_v40 = vadd.f32 %v984_v63, %v983_v0  ;;  %v795_v11 = vsel %vm681_vm4, %v2325_v41, 0.0  ;;  %v797_v63 = vsel %vm681_vm4, %v2347_v18, 0.0 }
 0x163   :  { %v992_v49 = vsel %vm681_vm4, %v872_v15, 0.0  ;;  %v994_v38 = vsel %vm681_vm4, %v873_v19, 0.0 }
 0x164   :  { %v987_v53 = vadd.f32 %v986_v42, %v985_v40  ;;  %v792_v45 = vadd.f32 %v791_v27, %v790_v29  ;;  %v874_v40 = vmul.f32 %v2343_v39, %v2343_v39  ;;  %v875_v27 = vmul.f32 %v2365_v56, %v2365_v56 }
 0x166   :  { %v794_v55 = vadd.f32 %v793_v9, %v792_v45  ;;  %v989_v0 = vadd.f32 %v988_v3, %v987_v53  ;;  %v799_v45 = vsel %vm681_vm4, %v2343_v39, 0.0  ;;  %v801_v3 = vsel %vm681_vm4, %v2365_v56, 0.0 }
 0x167   :  { %v996_v15 = vsel %vm681_vm4, %v874_v40, 0.0  ;;  %v998_v19 = vsel %vm681_vm4, %v875_v27, 0.0 }
 0x168   :  { %v991_v42 = vadd.f32 %v990_v4, %v989_v0  ;;  %v796_v29 = vadd.f32 %v795_v11, %v794_v55  ;;  %v876_v0 = vmul.f32 %v2361_v17, %v2361_v17  ;;  %v877_v11 = vmul.f32 %v2385_v1, %v2385_v1 }
 0x16a   :  { %v798_v9 = vadd.f32 %v797_v63, %v796_v29  ;;  %v993_v53 = vadd.f32 %v992_v49, %v991_v42  ;;  %v803_v29 = vsel %vm681_vm4, %v2361_v17, 0.0  ;;  %v805_v49 = vsel %vm681_vm4, %v2385_v1, 0.0 }
 0x16b   :  { %v1000_v40 = vsel %vm681_vm4, %v876_v0, 0.0  ;;  %v1002_v27 = vsel %vm681_vm4, %v877_v11, 0.0 }
 0x16c   :  { %v995_v4 = vadd.f32 %v994_v38, %v993_v53  ;;  %v800_v55 = vadd.f32 %v799_v45, %v798_v9  ;;  %v878_v53 = vmul.f32 %v2379_v13, %v2379_v13 }
 0x16e   :  { %v802_v63 = vadd.f32 %v801_v3, %v800_v55  ;;  %v997_v42 = vadd.f32 %v996_v15, %v995_v4  ;;  %v807_v3 = vsel %vm681_vm4, %v2379_v13, 0.0  ;;  %v1004_v15 = vsel %vm681_vm4, %v878_v53, 0.0 }
 0x16f   :  { %v1088_v53 = vlaneseq }
 0x170   :  { %v999_v38 = vadd.f32 %v998_v19, %v997_v42  ;;  %v804_v9 = vadd.f32 %v803_v29, %v802_v63 }
 0x172   :  { %v806_v45 = vadd.f32 %v805_v49, %v804_v9  ;;  %v1001_v56 = vadd.f32 %v1000_v40, %v999_v38 }
 0x174   :  { %v808_v4 = vadd.f32 %v807_v3, %v806_v45  ;;  %v1003_v55 = vadd.f32 %v1002_v27, %v1001_v56  ;;  %v1089_v27 = vshrl.u32 %v1088_v53, 7  ;;  %v3662_v53 = vld [vmem:[#allocation11_spill] sm:$0xff] }
 0x176   :  { %v809_v17 = vrot.slane %v808_v4, 4  ;;  %v1005_v39 = vadd.f32 %v1004_v15, %v1003_v55 }
 0x178   :  { %v810_v19 = vadd.f32 %v809_v17, %v808_v4  ;;  %v1006_v63 = vrot.slane %v1005_v39, 4  ;;  %v1016_v17 = vld [vmem:[%s3602_s2] sm:$0x1] }
 0x17a   :  { %v811_v42 = vrot.slane %v810_v19, 2  ;;  %v1007_v0 = vadd.f32 %v1006_v63, %v1005_v39  ;;  %v1090_v39 = vsub.s32 0, %v1089_v27 }
 0x17c   :  { %v812_v29 = vadd.f32 %v811_v42, %v810_v19  ;;  %v1008_v18 = vrot.slane %v1007_v0, 2 }
 0x17e   :  { %v813_v41 = vrot.slane %v812_v29, 1  ;;  %v1009_v51 = vadd.f32 %v1008_v18, %v1007_v0  ;;  %v1020_v18 = vld [vmem:[%s3603_s3] sm:$0x1] }
 0x180   :  { %v814_v11 = vadd.f32 %v813_v41, %v812_v29  ;;  %v1010_v49 = vrot.slane %v1009_v51, 1 }
 0x182   :  { %v1011_v38 = vadd.f32 %v1010_v49, %v1009_v51  ;;  %v1012_v9 = vmul.f32 0.001953125, %v814_v11 }
 0x184   :  { %v1013_v40 = vmul.f32 0.001953125, %v1011_v38  ;;  %v1014_v13 = vmul.f32 %v1012_v9, %v1012_v9 }
 0x186   :  { %v1015_v45 = vsub.f32 %v1013_v40, %v1014_v13  ;;  %v1085_v13 = vld [vmem:[%s3604_s4 + $0x1f0] sm:$0xff] }
 0x188   :  { %v1017_v56 = vadd.f32 1e-05, %v1015_v45 }
 0x18a   :  { %1750 = vrsqrt.f32 %v1017_v56  ;;  %v3661_v56 = vld [vmem:[#allocation8_spill] sm:$0xff] }
 0x194   :  { %v1751_v3 = vpop.eup %1750 }
 0x195   :  { %v1019_v4 = vmul.f32 %v1751_v3, %v1016_v17 }
 0x197   :  { %v1021_v41 = vmul.f32 %v1019_v4, %v1012_v9  ;;  %v2562_v51 = vrot.slane %v1019_v4, %v1090_v39  ;;  %v3664_v4 = vld [vmem:[#allocation13_spill] sm:$0xff] }
 0x199   :  { %v1022_v55 = vsub.f32 %v1020_v18, %v1021_v41  ;;  %v1155_v15 = vmul.f32 %v2562_v51, %v2385_v1  ;;  %v2571_v19 = vmul.f32 %v2562_v51, %v2116_v25  ;;  %v2575_v63 = vmul.f32 %v2108_v21, %v2562_v51  ;;  %v3665_v41 = vld [vmem:[#allocation12_spill] sm:$0xff] }
 0x19a   :  { %v2579_v42 = vmul.f32 %v2562_v51, %v2130_v35  ;;  %v2583_v0 = vmul.f32 %v2126_v32, %v2562_v51  ;;  %v2587_v29 = vmul.f32 %v2562_v51, %v2147_v46  ;;  %v2591_v25 = vmul.f32 %v2143_v43, %v2562_v51 }
 0x19b   :  { %v1219_v1 = vadd.f32 %v1155_v15, %v1085_v13  ;;  %v2593_v11 = vrot.slane %v1022_v55, %v1090_v39  ;;  %v2597_v21 = vmul.f32 %v2562_v51, %v2165_v60  ;;  %v2601_v35 = vmul.f32 %v2161_v57, %v2562_v51  ;;  %v3663_v39 = vld [vmem:[#allocation10_spill] sm:$0xff]  ;;  %v3666_v55 = vld [vmem:[#allocation15_spill] sm:$0xff] }
 0x19c   :  { %v2605_v32 = vmul.f32 %v2562_v51, %v2183_v10  ;;  %v2609_v46 = vmul.f32 %v2179_v7, %v2562_v51  ;;  %v2613_v43 = vmul.f32 %v2562_v51, %v2201_v28  ;;  %v2617_v60 = vmul.f32 %v2197_v23, %v2562_v51  ;;  %v3657_v10 = vld [vmem:[#allocation5_spill] sm:$0xff]  ;;  %v3658_v7 = vld [vmem:[#allocation7_spill] sm:$0xff]  ;;  %v3659_v28 = vld [vmem:[#allocation6_spill] sm:$0xff] }
 0x19d   :  { %3656 = vst [vmem:[#allocation29_spill] sm:$0xff] %v2593_v11  ;;  %v1289_v49 = vadd.f32 %v2593_v11, %v1219_v1  ;;  %v2622_v57 = vmul.f32 %v2562_v51, %v2219_v50  ;;  %v2626_v38 = vmul.f32 %v3657_v10, %v2562_v51  ;;  %v2630_v9 = vmul.f32 %v2562_v51, %v3658_v7  ;;  %v3660_v23 = vld [vmem:[#allocation9_spill] sm:$0xff]  ;;  %v3667_v1 = vld [vmem:[#allocation14_spill] sm:$0xff]  ;;  %v1026_v11 = vld [vmem:[%s3604_s4 + $0x18] sm:$0xff] }
 0x19e   :  { %v2634_v40 = vmul.f32 %v3659_v28, %v2562_v51  ;;  %v2638_v45 = vmul.f32 %v2562_v51, %v3660_v23  ;;  %v2642_v50 = vmul.f32 %v3661_v56, %v2562_v51  ;;  %v2646_v27 = vmul.f32 %v2562_v51, %v3662_v53  ;;  %v3669_v28 = vld [vmem:[#allocation16_spill] sm:$0xff]  ;;  %v3670_v56 = vld [vmem:[#allocation22_spill] sm:$0xff] }
 0x19f   :  { %v1353_v17 = vmax.f32 %v1289_v49, 0.0  ;;  %v2650_v3 = vmul.f32 %v3663_v39, %v2562_v51  ;;  %v2654_v18 = vmul.f32 %v2562_v51, %v3664_v4  ;;  %v2658_v13 = vmul.f32 %v3665_v41, %v2562_v51  ;;  %v3668_v49 = vld [vmem:[#allocation18_spill] sm:$0xff]  ;;  %v3671_v39 = vld [vmem:[#allocation20_spill] sm:$0xff] }
 0x1a0   :  { %v2662_v15 = vmul.f32 %v2562_v51, %v3666_v55  ;;  %v2666_v10 = vmul.f32 %v3667_v1, %v2562_v51  ;;  %v2670_v7 = vmul.f32 %v2562_v51, %v3668_v49  ;;  %v2674_v23 = vmul.f32 %v3669_v28, %v2562_v51  ;;  %v3672_v41 = vld [vmem:[#allocation26_spill] sm:$0xff]  ;;  %v3673_v1 = vld [vmem:[#allocation24_spill] sm:$0xff] }
 0x1a1   :  { %1417 = vst.msk [vmem:[#allocation2 + $0x1f0] sm:$0xff] %vm681_vm4, %v1353_v17  ;;  %v2679_v53 = vmul.f32 %v2562_v51, %v3670_v56  ;;  %v2683_v4 = vmul.f32 %v3671_v39, %v2562_v51  ;;  %v2687_v55 = vmul.f32 %v2562_v51, %v3672_v41  ;;  %v2691_v49 = vmul.f32 %v3673_v1, %v2562_v51 }
 0x1a2   :  { %v2695_v28 = vmul.f32 %v2562_v51, %v2381_v37  ;;  %v2699_v17 = vmul.f32 %v2377_v14, %v2562_v51  ;;  %v2703_v56 = vmul.f32 %v2562_v51, %v2118_v26  ;;  %v2707_v39 = vmul.f32 %v2110_v22, %v2562_v51 }
 0x1a3   :  { %v2711_v41 = vmul.f32 %v2562_v51, %v2132_v36  ;;  %v2715_v37 = vmul.f32 %v2128_v33, %v2562_v51  ;;  %v2719_v14 = vmul.f32 %v2562_v51, %v2149_v48  ;;  %v2723_v26 = vmul.f32 %v2145_v44, %v2562_v51  ;;  %v1024_v44 = vld [vmem:[%s3604_s4 + $0x8] sm:$0xff] }
 0x1a4   :  { %v2727_v22 = vmul.f32 %v2562_v51, %v2167_v62  ;;  %v2731_v36 = vmul.f32 %v2163_v58, %v2562_v51  ;;  %v2735_v33 = vmul.f32 %v2562_v51, %v2185_v12  ;;  %v2739_v48 = vmul.f32 %v2181_v8, %v2562_v51  ;;  %v1023_v62 = vld [vmem:[%s3604_s4] sm:$0xff] }
 0x1a5   :  { %3674 = vst [vmem:[#allocation5_spill] sm:$0xff] %v2711_v41  ;;  %3675 = vst [vmem:[#allocation7_spill] sm:$0xff] %v2715_v37  ;;  %v2749_v58 = vmul.f32 %v2562_v51, %v2203_v30  ;;  %v2753_v12 = vmul.f32 %v2199_v24, %v2562_v51  ;;  %v2757_v8 = vmul.f32 %v2562_v51, %v2221_v52  ;;  %v1025_v30 = vld [vmem:[%s3604_s4 + $0x10] sm:$0xff]  ;;  %v1028_v24 = vld [vmem:[%s3604_s4 + $0x28] sm:$0xff] }
 0x1a6   :  { %3676 = vst [vmem:[#allocation6_spill] sm:$0xff] %v2719_v14  ;;  %3677 = vst [vmem:[#allocation9_spill] sm:$0xff] %v2723_v26  ;;  %v2761_v1 = vmul.f32 %v2217_v47, %v2562_v51  ;;  %v1027_v52 = vld [vmem:[%s3604_s4 + $0x20] sm:$0xff]  ;;  %v2777_v47 = vmul.f32 %v2562_v51, %v2239_v6  ;;  %v1029_v6 = vld [vmem:[%s3604_s4 + $0x30] sm:$0xff] }
 0x1a7   :  { %3678 = vst [vmem:[#allocation8_spill] sm:$0xff] %v2727_v22  ;;  %3679 = vst [vmem:[#allocation11_spill] sm:$0xff] %v2731_v36  ;;  %v3706_v22 = vld [vmem:[#allocation25_spill] sm:$0xff]  ;;  %v1042_v14 = vld [vmem:[%s3604_s4 + $0x98] sm:$0xff] }
 0x1a8   :  { %3680 = vst [vmem:[#allocation10_spill] sm:$0xff] %v2735_v33  ;;  %3681 = vst [vmem:[#allocation13_spill] sm:$0xff] %v2739_v48  ;;  %v1038_v33 = vld [vmem:[%s3604_s4 + $0x78] sm:$0xff]  ;;  %v2873_v26 = vmul.f32 %v3706_v22, %v2562_v51  ;;  %v1045_v41 = vld [vmem:[%s3604_s4 + $0xb0] sm:$0xff] }
 0x1a9   :  { %3682 = vst [vmem:[#allocation12_spill] sm:$0xff] %v2749_v58  ;;  %3683 = vst [vmem:[#allocation15_spill] sm:$0xff] %v2753_v12  ;;  %v2789_v12 = vmul.f32 %v2253_v20, %v2562_v51  ;;  %v1030_v58 = vld [vmem:[%s3604_s4 + $0x38] sm:$0xff]  ;;  %v2805_v20 = vmul.f32 %v2562_v51, %v2275_v61  ;;  %v1033_v61 = vld [vmem:[%s3604_s4 + $0x50] sm:$0xff] }
 0x1aa   :  { %3684 = vst [vmem:[#allocation14_spill] sm:$0xff] %v2757_v8  ;;  %3685 = vst [vmem:[#allocation18_spill] sm:$0xff] %v2761_v1  ;;  %v2781_v1 = vmul.f32 %v2235_v2, %v2562_v51  ;;  %v2785_v8 = vmul.f32 %v2562_v51, %v2257_v34  ;;  %v1032_v2 = vld [vmem:[%s3604_s4 + $0x48] sm:$0xff]  ;;  %v1031_v34 = vld [vmem:[%s3604_s4 + $0x40] sm:$0xff] }
 0x1ab   :  { %3686 = vst [vmem:[#allocation16_spill] sm:$0xff] %v2777_v47  ;;  %3689 = vst [vmem:[#allocation26_spill] sm:$0xff] %v2789_v12  ;;  %v2809_v12 = vmul.f32 %v2271_v54, %v2562_v51  ;;  %v1034_v47 = vld [vmem:[%s3604_s4 + $0x58] sm:$0xff]  ;;  %v1036_v54 = vld [vmem:[%s3604_s4 + $0x68] sm:$0xff] }
 0x1ac   :  { %3687 = vst [vmem:[#allocation22_spill] sm:$0xff] %v2781_v1  ;;  %3688 = vst [vmem:[#allocation20_spill] sm:$0xff] %v2785_v8  ;;  %v2813_v8 = vmul.f32 %v2562_v51, %v2293_v31  ;;  %v2817_v1 = vmul.f32 %v2289_v16, %v2562_v51  ;;  %v1035_v31 = vld [vmem:[%s3604_s4 + $0x60] sm:$0xff]  ;;  %v2833_v16 = vmul.f32 %v2562_v51, %v2311_v5  ;;  %v1037_v5 = vld [vmem:[%s3604_s4 + $0x70] sm:$0xff] }
 0x1ad   :  { %3690 = vst [vmem:[#allocation24_spill] sm:$0xff] %v2805_v20  ;;  %3691 = vst [vmem:[#allocation30_spill] sm:$0xff] %v2809_v12  ;;  %v3698_v20 = vld [vmem:[#allocation17_spill] sm:$0xff]  ;;  %v1046_v37 = vld [vmem:[%s3604_s4 + $0xb8] sm:$0xff] }
 0x1ae   :  { %3692 = vst [vmem:[#allocation31_spill] sm:$0xff] %v2813_v8  ;;  %3693 = vst [vmem:[#allocation32_spill] sm:$0xff] %v2817_v1  ;;  %v2837_v1 = vmul.f32 %v2307_v59, %v2562_v51  ;;  %v3696_v8 = vld [vmem:[#allocation19_spill] sm:$0xff]  ;;  %v2845_v48 = vmul.f32 %v3698_v20, %v2562_v51  ;;  %v1040_v59 = vld [vmem:[%s3604_s4 + $0x88] sm:$0xff] }
 0x1af   :  { %3694 = vst [vmem:[#allocation33_spill] sm:$0xff] %v2833_v16  ;;  %v2841_v12 = vmul.f32 %v2562_v51, %v3696_v8  ;;  %v1039_v8 = vld [vmem:[%s3604_s4 + $0x80] sm:$0xff]  ;;  %v3704_v16 = vld [vmem:[#allocation27_spill] sm:$0xff]  ;;  %3707 = vst [vmem:[#allocation25_spill] sm:$0xff] %v2873_v26  ;;  %v2892_v26 = vadd.f32 %v2571_v19, %v1023_v62 }
 0x1b0   :  { %3695 = vst [vmem:[#allocation34_spill] sm:$0xff] %v2837_v1  ;;  %3699 = vst [vmem:[#allocation17_spill] sm:$0xff] %v2845_v48  ;;  %v3702_v48 = vld [vmem:[#allocation21_spill] sm:$0xff]  ;;  %v2869_v36 = vmul.f32 %v2562_v51, %v3704_v16  ;;  %v1050_v62 = vld [vmem:[%s3604_s4 + $0xd8] sm:$0xff] }
 0x1b1   :  { %3697 = vst [vmem:[#allocation19_spill] sm:$0xff] %v2841_v12  ;;  %v3700_v12 = vld [vmem:[#allocation23_spill] sm:$0xff]  ;;  %v2865_v1 = vmul.f32 %v3702_v48, %v2562_v51  ;;  %v1044_v48 = vld [vmem:[%s3604_s4 + $0xa8] sm:$0xff]  ;;  %v1043_v16 = vld [vmem:[%s3604_s4 + $0xa0] sm:$0xff] }
 0x1b2   :  { %v2861_v20 = vmul.f32 %v2562_v51, %v3700_v12  ;;  %3705 = vst [vmem:[#allocation27_spill] sm:$0xff] %v2869_v36  ;;  %v1041_v12 = vld [vmem:[%s3604_s4 + $0x90] sm:$0xff]  ;;  %v3708_v36 = vld [vmem:[#allocation28_spill] sm:$0xff]  ;;  %v1047_v19 = vld [vmem:[%s3604_s4 + $0xc0] sm:$0xff] }
 0x1b3   :  { %3703 = vst [vmem:[#allocation21_spill] sm:$0xff] %v2865_v1  ;;  %v2889_v22 = vmul.f32 %v3708_v36, %v2562_v51  ;;  %v2895_v1 = vadd.f32 %v2575_v63, %v1024_v44  ;;  %v1048_v51 = vld [vmem:[%s3604_s4 + $0xc8] sm:$0xff]  ;;  %v2913_v63 = vadd.f32 %v2583_v0, %v1026_v11  ;;  %v2919_v36 = vadd.f32 %v2591_v25, %v1028_v24 }
 0x1b4   :  { %3701 = vst [vmem:[#allocation23_spill] sm:$0xff] %v2861_v20  ;;  %v2898_v20 = vadd.f32 %v2579_v42, %v1025_v30  ;;  %v2916_v42 = vadd.f32 %v2587_v29, %v1027_v52  ;;  %v2922_v44 = vadd.f32 %v2597_v21, %v1029_v6  ;;  %v1049_v30 = vld [vmem:[%s3604_s4 + $0xd0] sm:$0xff]  ;;  %v1052_v0 = vld [vmem:[%s3604_s4 + $0xe8] sm:$0xff]  ;;  %v1051_v29 = vld [vmem:[%s3604_s4 + $0xe0] sm:$0xff]  ;;  %v2937_v25 = vadd.f32 %v2601_v35, %v1030_v58 }
 0x1b5   :  { %v2940_v11 = vadd.f32 %v2605_v32, %v1031_v34  ;;  %v2943_v21 = vadd.f32 %v2609_v46, %v1032_v2  ;;  %v2946_v24 = vadd.f32 %v2613_v43, %v1033_v61  ;;  %v1054_v52 = vld [vmem:[%s3604_s4 + $0xf8] sm:$0xff]  ;;  %v1053_v6 = vld [vmem:[%s3604_s4 + $0xf0] sm:$0xff]  ;;  %v1056_v35 = vld [vmem:[%s3604_s4 + $0x108] sm:$0xff]  ;;  %v2961_v46 = vadd.f32 %v2617_v60, %v1034_v47 }
 0x1b6   :  { %v1055_v32 = vld [vmem:[%s3604_s4 + $0x100] sm:$0xff]  ;;  %v2964_v43 = vadd.f32 %v2622_v57, %v1035_v31  ;;  %v2967_v58 = vadd.f32 %v2626_v38, %v1036_v54  ;;  %v2970_v2 = vadd.f32 %v2630_v9, %v1037_v5  ;;  %v1058_v34 = vld [vmem:[%s3604_s4 + $0x118] sm:$0xff]  ;;  %v1057_v61 = vld [vmem:[%s3604_s4 + $0x110] sm:$0xff]  ;;  %v2985_v38 = vadd.f32 %v2634_v40, %v1038_v33 }
 0x1b7   :  { %v1060_v60 = vld [vmem:[%s3604_s4 + $0x128] sm:$0xff]  ;;  %v1059_v57 = vld [vmem:[%s3604_s4 + $0x120] sm:$0xff]  ;;  %v2988_v9 = vadd.f32 %v2638_v45, %v1039_v8  ;;  %v2991_v47 = vadd.f32 %v2642_v50, %v1040_v59  ;;  %v2994_v54 = vadd.f32 %v2646_v27, %v1041_v12  ;;  %v1062_v31 = vld [vmem:[%s3604_s4 + $0x138] sm:$0xff]  ;;  %v3009_v50 = vadd.f32 %v2650_v3, %v1042_v14 }
 0x1b8   :  { %v1061_v5 = vld [vmem:[%s3604_s4 + $0x130] sm:$0xff]  ;;  %v1064_v40 = vld [vmem:[%s3604_s4 + $0x148] sm:$0xff]  ;;  %v1063_v45 = vld [vmem:[%s3604_s4 + $0x140] sm:$0xff]  ;;  %v3012_v27 = vadd.f32 %v2654_v18, %v1043_v16  ;;  %v3015_v33 = vadd.f32 %v2658_v13, %v1044_v48  ;;  %v3018_v59 = vadd.f32 %v2662_v15, %v1045_v41  ;;  %v3030_v18 = vadd.f32 %v2666_v10, %v1046_v37 }
 0x1b9   :  { %v1066_v8 = vld [vmem:[%s3604_s4 + $0x158] sm:$0xff]  ;;  %v1065_v12 = vld [vmem:[%s3604_s4 + $0x150] sm:$0xff]  ;;  %v1068_v3 = vld [vmem:[%s3604_s4 + $0x168] sm:$0xff]  ;;  %v3033_v13 = vadd.f32 %v2670_v7, %v1047_v19  ;;  %v3036_v15 = vadd.f32 %v2674_v23, %v1048_v51  ;;  %v3039_v41 = vadd.f32 %v2679_v53, %v1049_v30  ;;  %v3051_v7 = vadd.f32 %v2683_v4, %v1050_v62 }
 0x1ba   :  { %v1067_v14 = vld [vmem:[%s3604_s4 + $0x160] sm:$0xff]  ;;  %v1070_v48 = vld [vmem:[%s3604_s4 + $0x178] sm:$0xff]  ;;  %v1069_v10 = vld [vmem:[%s3604_s4 + $0x170] sm:$0xff]  ;;  %v3054_v23 = vadd.f32 %v2687_v55, %v1051_v29  ;;  %v3057_v53 = vadd.f32 %v2691_v49, %v1052_v0  ;;  %v3060_v37 = vadd.f32 %v2695_v28, %v1053_v6  ;;  %v3072_v55 = vadd.f32 %v2699_v17, %v1054_v52 }
 0x1bb   :  { %v1072_v16 = vld [vmem:[%s3604_s4 + $0x188] sm:$0xff]  ;;  %v1071_v51 = vld [vmem:[%s3604_s4 + $0x180] sm:$0xff]  ;;  %v1074_v4 = vld [vmem:[%s3604_s4 + $0x198] sm:$0xff]  ;;  %v3075_v49 = vadd.f32 %v2703_v56, %v1055_v32  ;;  %v3078_v28 = vadd.f32 %v2707_v39, %v1056_v35 }
 0x1bc   :  { %v3710_v19 = vld [vmem:[#allocation5_spill] sm:$0xff]  ;;  %v1073_v30 = vld [vmem:[%s3604_s4 + $0x190] sm:$0xff]  ;;  %v1076_v0 = vld [vmem:[%s3604_s4 + $0x1a8] sm:$0xff] }
 0x1bd   :  { %3709 = vst [vmem:[#allocation28_spill] sm:$0xff] %v3078_v28  ;;  %v3081_v62 = vadd.f32 %v3710_v19, %v1057_v61  ;;  %v1075_v17 = vld [vmem:[%s3604_s4 + $0x1a0] sm:$0xff]  ;;  %v3712_v56 = vld [vmem:[#allocation7_spill] sm:$0xff]  ;;  %v3714_v39 = vld [vmem:[#allocation6_spill] sm:$0xff] }
 0x1be   :  { %v3093_v29 = vadd.f32 %v3712_v56, %v1058_v34  ;;  %v3096_v52 = vadd.f32 %v3714_v39, %v1059_v57  ;;  %v3716_v6 = vld [vmem:[#allocation9_spill] sm:$0xff]  ;;  %v3718_v32 = vld [vmem:[#allocation8_spill] sm:$0xff]  ;;  %v1080_v34 = vld [vmem:[%s3604_s4 + $0x1c8] sm:$0xff] }
 0x1bf   :  { %3711 = vst [vmem:[#allocation5_spill] sm:$0xff] %v3081_v62  ;;  %v3099_v35 = vadd.f32 %v3716_v6, %v1060_v60  ;;  %v3102_v61 = vadd.f32 %v3718_v32, %v1061_v5  ;;  %v1078_v19 = vld [vmem:[%s3604_s4 + $0x1b8] sm:$0xff]  ;;  %v1077_v62 = vld [vmem:[%s3604_s4 + $0x1b0] sm:$0xff]  ;;  %v3722_v60 = vld [vmem:[#allocation10_spill] sm:$0xff] }
 0x1c0   :  { %3713 = vst [vmem:[#allocation7_spill] sm:$0xff] %v3093_v29  ;;  %3715 = vst [vmem:[#allocation6_spill] sm:$0xff] %v3096_v52  ;;  %v3720_v57 = vld [vmem:[#allocation11_spill] sm:$0xff]  ;;  %v3117_v39 = vadd.f32 %v3722_v60, %v1063_v45  ;;  %v3724_v5 = vld [vmem:[#allocation13_spill] sm:$0xff] }
 0x1c1   :  { %3717 = vst [vmem:[#allocation9_spill] sm:$0xff] %v3099_v35  ;;  %3719 = vst [vmem:[#allocation8_spill] sm:$0xff] %v3102_v61  ;;  %v3114_v56 = vadd.f32 %v3720_v57, %v1062_v31  ;;  %v3120_v6 = vadd.f32 %v3724_v5, %v1064_v40  ;;  %v3726_v32 = vld [vmem:[#allocation12_spill] sm:$0xff]  ;;  %v1079_v35 = vld [vmem:[%s3604_s4 + $0x1c0] sm:$0xff] }
 0x1c2   :  { %3723 = vst [vmem:[#allocation10_spill] sm:$0xff] %v3117_v39  ;;  %v3123_v61 = vadd.f32 %v3726_v32, %v1065_v12  ;;  %v1082_v52 = vld [vmem:[%s3604_s4 + $0x1d8] sm:$0xff]  ;;  %v1081_v31 = vld [vmem:[%s3604_s4 + $0x1d0] sm:$0xff]  ;;  %v3730_v40 = vld [vmem:[#allocation14_spill] sm:$0xff] }
 0x1c3   :  { %3721 = vst [vmem:[#allocation11_spill] sm:$0xff] %v3114_v56  ;;  %3725 = vst [vmem:[#allocation13_spill] sm:$0xff] %v3120_v6  ;;  %v3728_v45 = vld [vmem:[#allocation15_spill] sm:$0xff]  ;;  %v3138_v60 = vadd.f32 %v3730_v40, %v1067_v14  ;;  %v3732_v12 = vld [vmem:[#allocation18_spill] sm:$0xff] }
 0x1c4   :  { %3727 = vst [vmem:[#allocation12_spill] sm:$0xff] %v3123_v61  ;;  %v3135_v57 = vadd.f32 %v3728_v45, %v1066_v8  ;;  %v3141_v5 = vadd.f32 %v3732_v12, %v1068_v3  ;;  %v3734_v32 = vld [vmem:[#allocation16_spill] sm:$0xff]  ;;  %v1084_v6 = vld [vmem:[%s3604_s4 + $0x1e8] sm:$0xff]  ;;  %v1083_v39 = vld [vmem:[%s3604_s4 + $0x1e0] sm:$0xff] }
 0x1c5   :  { %3731 = vst [vmem:[#allocation14_spill] sm:$0xff] %v3138_v60  ;;  %v3144_v61 = vadd.f32 %v3734_v32, %v1069_v10  ;;  %v1086_v8 = vld [vmem:[%s3604_s4 + $0x1f8] sm:$0xff]  ;;  %v3736_v14 = vld [vmem:[#allocation22_spill] sm:$0xff]  ;;  %s1777_s4 = smov [#allocation2]  }
 0x1c6   :  { %3729 = vst [vmem:[#allocation15_spill] sm:$0xff] %v3135_v57  ;;  %3733 = vst [vmem:[#allocation18_spill] sm:$0xff] %v3141_v5  ;;  %v3156_v45 = vadd.f32 %v3736_v14, %v1070_v48  ;;  %v3737_v3 = vld [vmem:[#allocation20_spill] sm:$0xff]  ;;  %v3738_v10 = vld [vmem:[#allocation26_spill] sm:$0xff]  ;;  %s1424_s6 = sshll.u32 %s1777_s4, 4  ;;  %s3569_s6 = int_to_ptr.vmem [resolvable:$true] %s1424_s6 }
 0x1c7   :  { %3735 = vst [vmem:[#allocation16_spill] sm:$0xff] %v3144_v61  ;;  %v3159_v40 = vadd.f32 %v3737_v3, %v1071_v51  ;;  %v3162_v12 = vadd.f32 %v3738_v10, %v1072_v16  ;;  %v3739_v32 = vld [vmem:[#allocation24_spill] sm:$0xff]  ;;  %v3740_v5 = vld [vmem:[#allocation30_spill] sm:$0xff]  ;;  %v3741_v57 = vld [vmem:[#allocation31_spill] sm:$0xff]  ;;  %s1752_s7 = scalar_lea.vmem %s3569_s6, 8192  ;;  %p1757_p1 = scmp.lt.s32.totalorder %s3569_s6, %s3569_s6 }
 0x1c8   :  { %v3165_v61 = vadd.f32 %v3739_v32, %v1073_v30  ;;  %v3168_v60 = vadd.f32 %v3740_v5, %v1074_v4  ;;  %v3171_v56 = vadd.f32 %v3741_v57, %v1075_v17  ;;  %v3742_v29 = vld [vmem:[#allocation32_spill] sm:$0xff]  ;;  %v3743_v48 = vld [vmem:[#allocation33_spill] sm:$0xff]  ;;  %v3744_v51 = vld [vmem:[#allocation34_spill] sm:$0xff]  ;;  %p1753_p0 = scmp.ne.s32.totalorder %s3569_s6, %s1752_s7  ;;  %p1758_p2 = scmp.lt.s32.totalorder %s1752_s7, %s1752_s7 }
 0x1c9   :  { %v3174_v28 = vadd.f32 %v3742_v29, %v1076_v0  ;;  %v3177_v14 = vadd.f32 %v3743_v48, %v1077_v62  ;;  %v3180_v3 = vadd.f32 %v3744_v51, %v1078_v19  ;;  %v3745_v16 = vld [vmem:[#allocation19_spill] sm:$0xff]  ;;  %v3746_v30 = vld [vmem:[#allocation17_spill] sm:$0xff]  ;;  %v3201_v19 = vadd.f32 %v2889_v22, %v1086_v8 }
 0x1ca   :  { %v3183_v10 = vadd.f32 %v3745_v16, %v1079_v35  ;;  %v3186_v32 = vadd.f32 %v3746_v30, %v1080_v34  ;;  %v3747_v4 = vld [vmem:[#allocation23_spill] sm:$0xff]  ;;  %v3748_v17 = vld [vmem:[#allocation21_spill] sm:$0xff]  ;;  %v3755_v16 = vld [vmem:[#allocation6_spill] sm:$0xff]  ;;  %p1759_p3 = por %p1758_p2, %p1757_p1 }
 0x1cb   :  { %v3189_v5 = vadd.f32 %v3747_v4, %v1081_v31  ;;  %v3192_v57 = vadd.f32 %v3748_v17, %v1082_v52  ;;  %v3749_v0 = vld [vmem:[#allocation27_spill] sm:$0xff]  ;;  %v3750_v62 = vld [vmem:[#allocation25_spill] sm:$0xff]  ;;  %v3759_v4 = vld [vmem:[#allocation8_spill] sm:$0xff] }
 0x1cc   :  { %v3195_v29 = vadd.f32 %v3749_v0, %v1083_v39  ;;  %v3198_v48 = vadd.f32 %v3750_v62, %v1084_v6  ;;  %v3751_v35 = vld [vmem:[#allocation29_spill] sm:$0xff]  ;;  %v3752_v6 = vld [vmem:[#allocation28_spill] sm:$0xff]  ;;  %v3754_v8 = vld [vmem:[#allocation7_spill] sm:$0xff]  ;;  %p1760_p4 = pnand %p1759_p3, %p1753_p0 }
 0x1cd   :  { %v3205_v51 = vadd.f32 %v3751_v35, %v2892_v26  ;;  %v3209_v34 = vadd.f32 %v3751_v35, %v2895_v1  ;;  %v3213_v52 = vadd.f32 %v3751_v35, %v2898_v20  ;;  %v3217_v39 = vadd.f32 %v3751_v35, %v2913_v63  ;;  %v3753_v31 = vld [vmem:[#allocation5_spill] sm:$0xff]  ;;  %v3761_v0 = vld [vmem:[#allocation11_spill] sm:$0xff] }
 0x1ce   :  { %v3221_v22 = vadd.f32 %v3751_v35, %v2916_v42  ;;  %v3225_v26 = vadd.f32 %v3751_v35, %v2919_v36  ;;  %v3229_v1 = vadd.f32 %v3751_v35, %v2922_v44  ;;  %v3233_v20 = vadd.f32 %v3751_v35, %v2937_v25  ;;  %v3757_v30 = vld [vmem:[#allocation9_spill] sm:$0xff] }
 0x1cf   :  { %v3237_v63 = vadd.f32 %v3751_v35, %v2940_v11  ;;  %v3241_v42 = vadd.f32 %v3751_v35, %v2943_v21  ;;  %v3245_v36 = vadd.f32 %v3751_v35, %v2946_v24  ;;  %v3249_v44 = vadd.f32 %v3751_v35, %v2961_v46 }
 0x1d0   :  { %v3253_v25 = vadd.f32 %v3751_v35, %v2964_v43  ;;  %v3257_v11 = vadd.f32 %v3751_v35, %v2967_v58  ;;  %v3261_v21 = vadd.f32 %v3751_v35, %v2970_v2  ;;  %v3265_v24 = vadd.f32 %v3751_v35, %v2985_v38 }
 0x1d1   :  { %v3269_v46 = vadd.f32 %v3751_v35, %v2988_v9  ;;  %v3273_v43 = vadd.f32 %v3751_v35, %v2991_v47  ;;  %v3277_v58 = vadd.f32 %v3751_v35, %v2994_v54  ;;  %v3281_v2 = vadd.f32 %v3751_v35, %v3009_v50 }
 0x1d2   :  { %v3285_v38 = vadd.f32 %v3751_v35, %v3012_v27  ;;  %v3289_v9 = vadd.f32 %v3751_v35, %v3015_v33  ;;  %v3293_v47 = vadd.f32 %v3751_v35, %v3018_v59  ;;  %v3297_v54 = vadd.f32 %v3751_v35, %v3030_v18 }
 0x1d3   :  { %v3301_v50 = vadd.f32 %v3751_v35, %v3033_v13  ;;  %v3305_v27 = vadd.f32 %v3751_v35, %v3036_v15  ;;  %v3309_v33 = vadd.f32 %v3751_v35, %v3039_v41  ;;  %v3313_v59 = vadd.f32 %v3751_v35, %v3051_v7 }
 0x1d4   :  { %v3317_v18 = vadd.f32 %v3751_v35, %v3054_v23  ;;  %v3321_v13 = vadd.f32 %v3751_v35, %v3057_v53  ;;  %v3325_v15 = vadd.f32 %v3751_v35, %v3060_v37  ;;  %v3329_v41 = vadd.f32 %v3751_v35, %v3072_v55 }
 0x1d5   :  { %v3333_v7 = vadd.f32 %v3751_v35, %v3075_v49  ;;  %v3337_v23 = vadd.f32 %v3751_v35, %v3752_v6  ;;  %v3341_v53 = vadd.f32 %v3751_v35, %v3753_v31  ;;  %v3345_v37 = vadd.f32 %v3751_v35, %v3754_v8  ;;  %v3763_v6 = vld [vmem:[#allocation10_spill] sm:$0xff]  ;;  %v3765_v8 = vld [vmem:[#allocation13_spill] sm:$0xff] }
 0x1d6   :  { %v3349_v55 = vadd.f32 %v3751_v35, %v3755_v16  ;;  %v3353_v49 = vadd.f32 %v3751_v35, %v3757_v30  ;;  %v3357_v17 = vadd.f32 %v3751_v35, %v3759_v4  ;;  %v3361_v62 = vadd.f32 %v3751_v35, %v3761_v0 }
 0x1d7   :  { %v3365_v31 = vadd.f32 %v3751_v35, %v3763_v6  ;;  %v3369_v16 = vadd.f32 %v3751_v35, %v3765_v8 }
 0x1d8   :  { %3756 = vst [vmem:[#allocation22_spill] sm:$0xff] %v3349_v55  ;;  %3758 = vst [vmem:[#allocation20_spill] sm:$0xff] %v3353_v49  ;;  %v3766_v55 = vld [vmem:[#allocation12_spill] sm:$0xff]  ;;  %v3767_v49 = vld [vmem:[#allocation15_spill] sm:$0xff] }
 0x1d9   :  { %3760 = vst [vmem:[#allocation26_spill] sm:$0xff] %v3357_v17  ;;  %3762 = vst [vmem:[#allocation24_spill] sm:$0xff] %v3361_v62  ;;  %v3373_v30 = vadd.f32 %v3751_v35, %v3766_v55  ;;  %v3377_v4 = vadd.f32 %v3751_v35, %v3767_v49  ;;  %v3768_v17 = vld [vmem:[#allocation14_spill] sm:$0xff]  ;;  %v3393_v55 = vadd.f32 %v3751_v35, %v3156_v45 }
 0x1da   :  { %3764 = vst [vmem:[#allocation30_spill] sm:$0xff] %v3365_v31  ;;  %v3381_v0 = vadd.f32 %v3751_v35, %v3768_v17  ;;  %v3769_v62 = vld [vmem:[#allocation18_spill] sm:$0xff]  ;;  %v3770_v31 = vld [vmem:[#allocation16_spill] sm:$0xff]  ;;  %v3397_v49 = vadd.f32 %v3751_v35, %v3159_v40  ;;  %v3401_v17 = vadd.f32 %v3751_v35, %v3162_v12  ;;  %v3413_v45 = vadd.f32 %v3751_v35, %v3171_v56 }
 0x1db   :  { %v3385_v6 = vadd.f32 %v3751_v35, %v3769_v62  ;;  %v3389_v8 = vadd.f32 %v3751_v35, %v3770_v31  ;;  %v3405_v62 = vadd.f32 %v3751_v35, %v3165_v61  ;;  %v3409_v31 = vadd.f32 %v3751_v35, %v3168_v60 }
 0x1dc   :  { %v3417_v40 = vadd.f32 %v3751_v35, %v3174_v28  ;;  %v3421_v12 = vadd.f32 %v3751_v35, %v3177_v14  ;;  %v3425_v61 = vadd.f32 %v3751_v35, %v3180_v3  ;;  %v3429_v60 = vadd.f32 %v3751_v35, %v3183_v10 }
 0x1dd   :  { %v3433_v56 = vadd.f32 %v3751_v35, %v3186_v32  ;;  %v3437_v28 = vadd.f32 %v3751_v35, %v3189_v5  ;;  %v3441_v14 = vadd.f32 %v3751_v35, %v3192_v57  ;;  %v3445_v3 = vadd.f32 %v3751_v35, %v3195_v29 }
 0x1de   :  { %v3449_v10 = vadd.f32 %v3751_v35, %v3198_v48  ;;  %v3453_v32 = vadd.f32 %v3751_v35, %v3201_v19  ;;  %v1292_v5 = vmax.f32 %v3209_v34, 0.0  ;;  %v1294_v57 = vmax.f32 %v3217_v39, 0.0 }
 0x1df   :  { %3771 = vst [vmem:[#allocation31_spill] sm:$0xff] %v3433_v56  ;;  %3772 = vst [vmem:[#allocation32_spill] sm:$0xff] %v3437_v28  ;;  %v1291_v56 = vmax.f32 %v3205_v51, 0.0  ;;  %v1293_v28 = vmax.f32 %v3213_v52, 0.0  ;;  %v1296_v29 = vmax.f32 %v3225_v26, 0.0  ;;  %v1298_v48 = vmax.f32 %v3233_v20, 0.0 }
 0x1e0   :  { %3773 = vst [vmem:[#allocation33_spill] sm:$0xff] %v3441_v14  ;;  %3774 = vst [vmem:[#allocation34_spill] sm:$0xff] %v3445_v3  ;;  %v1295_v14 = vmax.f32 %v3221_v22, 0.0  ;;  %v1297_v3 = vmax.f32 %v3229_v1, 0.0  ;;  %v1300_v19 = vmax.f32 %v3241_v42, 0.0  ;;  %v1301_v35 = vmax.f32 %v3245_v36, 0.0 }
 0x1e1   :  { %3775 = vst [vmem:[#allocation19_spill] sm:$0xff] %v3449_v10  ;;  %v1299_v10 = vmax.f32 %v3237_v63, 0.0  ;;  %1355 = vst.msk [vmem:[#allocation2] sm:$0xff] %vm681_vm4, %v1291_v56  ;;  %v1302_v51 = vmax.f32 %v3249_v44, 0.0  ;;  %v1303_v34 = vmax.f32 %v3253_v25, 0.0  ;;  %v1304_v52 = vmax.f32 %v3257_v11, 0.0 }
 0x1e2   :  { %1356 = vst.msk [vmem:[#allocation2 + $0x8] sm:$0xff] %vm681_vm4, %v1292_v5  ;;  %1357 = vst.msk [vmem:[#allocation2 + $0x10] sm:$0xff] %vm681_vm4, %v1293_v28  ;;  %v1305_v39 = vmax.f32 %v3261_v21, 0.0  ;;  %v1306_v22 = vmax.f32 %v3265_v24, 0.0  ;;  %v1307_v26 = vmax.f32 %v3269_v46, 0.0  ;;  %v1308_v1 = vmax.f32 %v3273_v43, 0.0 }
 0x1e3   :  { %1358 = vst.msk [vmem:[#allocation2 + $0x18] sm:$0xff] %vm681_vm4, %v1294_v57  ;;  %1359 = vst.msk [vmem:[#allocation2 + $0x20] sm:$0xff] %vm681_vm4, %v1295_v14  ;;  %v1309_v20 = vmax.f32 %v3277_v58, 0.0  ;;  %v1310_v63 = vmax.f32 %v3281_v2, 0.0  ;;  %v1311_v42 = vmax.f32 %v3285_v38, 0.0  ;;  %v1312_v36 = vmax.f32 %v3289_v9, 0.0 }
 0x1e4   :  { %1360 = vst.msk [vmem:[#allocation2 + $0x28] sm:$0xff] %vm681_vm4, %v1296_v29  ;;  %1361 = vst.msk [vmem:[#allocation2 + $0x30] sm:$0xff] %vm681_vm4, %v1297_v3  ;;  %v1313_v44 = vmax.f32 %v3293_v47, 0.0  ;;  %v1314_v25 = vmax.f32 %v3297_v54, 0.0  ;;  %v1315_v11 = vmax.f32 %v3301_v50, 0.0  ;;  %v1316_v21 = vmax.f32 %v3305_v27, 0.0 }
 0x1e5   :  { %1362 = vst.msk [vmem:[#allocation2 + $0x38] sm:$0xff] %vm681_vm4, %v1298_v48  ;;  %1363 = vst.msk [vmem:[#allocation2 + $0x40] sm:$0xff] %vm681_vm4, %v1299_v10  ;;  %v1317_v24 = vmax.f32 %v3309_v33, 0.0  ;;  %v1318_v46 = vmax.f32 %v3313_v59, 0.0  ;;  %v1319_v43 = vmax.f32 %v3317_v18, 0.0  ;;  %v1320_v58 = vmax.f32 %v3321_v13, 0.0 }
 0x1e6   :  { %1364 = vst.msk [vmem:[#allocation2 + $0x48] sm:$0xff] %vm681_vm4, %v1300_v19  ;;  %1365 = vst.msk [vmem:[#allocation2 + $0x50] sm:$0xff] %vm681_vm4, %v1301_v35  ;;  %v1321_v2 = vmax.f32 %v3325_v15, 0.0  ;;  %v1322_v38 = vmax.f32 %v3329_v41, 0.0  ;;  %v1323_v9 = vmax.f32 %v3333_v7, 0.0  ;;  %v1324_v47 = vmax.f32 %v3337_v23, 0.0 }
 0x1e7   :  { %1366 = vst.msk [vmem:[#allocation2 + $0x58] sm:$0xff] %vm681_vm4, %v1302_v51  ;;  %1367 = vst.msk [vmem:[#allocation2 + $0x60] sm:$0xff] %vm681_vm4, %v1303_v34  ;;  %v1325_v54 = vmax.f32 %v3341_v53, 0.0  ;;  %v1326_v50 = vmax.f32 %v3345_v37, 0.0  ;;  %v3776_v27 = vld [vmem:[#allocation22_spill] sm:$0xff]  ;;  %v3777_v59 = vld [vmem:[#allocation20_spill] sm:$0xff] }
 0x1e8   :  { %1368 = vst.msk [vmem:[#allocation2 + $0x68] sm:$0xff] %vm681_vm4, %v1304_v52  ;;  %1369 = vst.msk [vmem:[#allocation2 + $0x70] sm:$0xff] %vm681_vm4, %v1305_v39  ;;  %v1327_v33 = vmax.f32 %v3776_v27, 0.0  ;;  %v1328_v18 = vmax.f32 %v3777_v59, 0.0  ;;  %v3778_v13 = vld [vmem:[#allocation26_spill] sm:$0xff]  ;;  %v3779_v41 = vld [vmem:[#allocation24_spill] sm:$0xff] }
 0x1e9   :  { %1370 = vst.msk [vmem:[#allocation2 + $0x78] sm:$0xff] %vm681_vm4, %v1306_v22  ;;  %1371 = vst.msk [vmem:[#allocation2 + $0x80] sm:$0xff] %vm681_vm4, %v1307_v26  ;;  %v1329_v15 = vmax.f32 %v3778_v13, 0.0  ;;  %v1330_v7 = vmax.f32 %v3779_v41, 0.0  ;;  %v3780_v23 = vld [vmem:[#allocation30_spill] sm:$0xff]  ;;  %v1332_v37 = vmax.f32 %v3369_v16, 0.0 }
 0x1ea   :  { %1372 = vst.msk [vmem:[#allocation2 + $0x88] sm:$0xff] %vm681_vm4, %v1308_v1  ;;  %1373 = vst.msk [vmem:[#allocation2 + $0x90] sm:$0xff] %vm681_vm4, %v1309_v20  ;;  %v1331_v53 = vmax.f32 %v3780_v23, 0.0  ;;  %v1333_v56 = vmax.f32 %v3373_v30, 0.0  ;;  %v1334_v28 = vmax.f32 %v3377_v4, 0.0  ;;  %v1335_v14 = vmax.f32 %v3381_v0, 0.0 }
 0x1eb   :  { %1374 = vst.msk [vmem:[#allocation2 + $0x98] sm:$0xff] %vm681_vm4, %v1310_v63  ;;  %1375 = vst.msk [vmem:[#allocation2 + $0xa0] sm:$0xff] %vm681_vm4, %v1311_v42  ;;  %v1336_v3 = vmax.f32 %v3385_v6, 0.0  ;;  %v1337_v10 = vmax.f32 %v3389_v8, 0.0  ;;  %v1338_v16 = vmax.f32 %v3393_v55, 0.0  ;;  %v1339_v30 = vmax.f32 %v3397_v49, 0.0 }
 0x1ec   :  { %1376 = vst.msk [vmem:[#allocation2 + $0xa8] sm:$0xff] %vm681_vm4, %v1312_v36  ;;  %1377 = vst.msk [vmem:[#allocation2 + $0xb0] sm:$0xff] %vm681_vm4, %v1313_v44  ;;  %v1340_v4 = vmax.f32 %v3401_v17, 0.0  ;;  %v1341_v0 = vmax.f32 %v3405_v62, 0.0  ;;  %v1342_v6 = vmax.f32 %v3409_v31, 0.0  ;;  %v1343_v8 = vmax.f32 %v3413_v45, 0.0 }
 0x1ed   :  { %1378 = vst.msk [vmem:[#allocation2 + $0xb8] sm:$0xff] %vm681_vm4, %v1314_v25  ;;  %1379 = vst.msk [vmem:[#allocation2 + $0xc0] sm:$0xff] %vm681_vm4, %v1315_v11  ;;  %v1344_v55 = vmax.f32 %v3417_v40, 0.0  ;;  %v1345_v49 = vmax.f32 %v3421_v12, 0.0  ;;  %v1346_v17 = vmax.f32 %v3425_v61, 0.0  ;;  %v1347_v62 = vmax.f32 %v3429_v60, 0.0 }
 0x1ee   :  { %1380 = vst.msk [vmem:[#allocation2 + $0xc8] sm:$0xff] %vm681_vm4, %v1316_v21  ;;  %1381 = vst.msk [vmem:[#allocation2 + $0xd0] sm:$0xff] %vm681_vm4, %v1317_v24  ;;  %v3781_v31 = vld [vmem:[#allocation31_spill] sm:$0xff]  ;;  %v3782_v5 = vld [vmem:[#allocation32_spill] sm:$0xff]  ;;  %v1354_v19 = vmax.f32 %v3453_v32, 0.0 }
 0x1ef   :  { %1382 = vst.msk [vmem:[#allocation2 + $0xd8] sm:$0xff] %vm681_vm4, %v1318_v46  ;;  %1383 = vst.msk [vmem:[#allocation2 + $0xe0] sm:$0xff] %vm681_vm4, %v1319_v43  ;;  %v1348_v45 = vmax.f32 %v3781_v31, 0.0  ;;  %v1349_v57 = vmax.f32 %v3782_v5, 0.0  ;;  %v3783_v29 = vld [vmem:[#allocation33_spill] sm:$0xff]  ;;  %v3784_v48 = vld [vmem:[#allocation34_spill] sm:$0xff] }
 0x1f0   :  { %1384 = vst.msk [vmem:[#allocation2 + $0xe8] sm:$0xff] %vm681_vm4, %v1320_v58  ;;  %1385 = vst.msk [vmem:[#allocation2 + $0xf0] sm:$0xff] %vm681_vm4, %v1321_v2  ;;  %v1350_v40 = vmax.f32 %v3783_v29, 0.0  ;;  %v1351_v12 = vmax.f32 %v3784_v48, 0.0  ;;  %v3785_v61 = vld [vmem:[#allocation19_spill] sm:$0xff] }
 0x1f1   :  { %1386 = vst.msk [vmem:[#allocation2 + $0xf8] sm:$0xff] %vm681_vm4, %v1322_v38  ;;  %1387 = vst.msk [vmem:[#allocation2 + $0x100] sm:$0xff] %vm681_vm4, %v1323_v9  ;;  %v1352_v60 = vmax.f32 %v3785_v61, 0.0 }
 0x1f2   :  { %1388 = vst.msk [vmem:[#allocation2 + $0x108] sm:$0xff] %vm681_vm4, %v1324_v47  ;;  %1389 = vst.msk [vmem:[#allocation2 + $0x110] sm:$0xff] %vm681_vm4, %v1325_v54 }
 0x1f3   :  { %1390 = vst.msk [vmem:[#allocation2 + $0x118] sm:$0xff] %vm681_vm4, %v1326_v50  ;;  %1391 = vst.msk [vmem:[#allocation2 + $0x120] sm:$0xff] %vm681_vm4, %v1327_v33 }
 0x1f4   :  { %1392 = vst.msk [vmem:[#allocation2 + $0x128] sm:$0xff] %vm681_vm4, %v1328_v18  ;;  %1393 = vst.msk [vmem:[#allocation2 + $0x130] sm:$0xff] %vm681_vm4, %v1329_v15 }
 0x1f5   :  { %1394 = vst.msk [vmem:[#allocation2 + $0x138] sm:$0xff] %vm681_vm4, %v1330_v7  ;;  %1395 = vst.msk [vmem:[#allocation2 + $0x140] sm:$0xff] %vm681_vm4, %v1331_v53 }
 0x1f6   :  { %1396 = vst.msk [vmem:[#allocation2 + $0x148] sm:$0xff] %vm681_vm4, %v1332_v37  ;;  %1397 = vst.msk [vmem:[#allocation2 + $0x150] sm:$0xff] %vm681_vm4, %v1333_v56 }
 0x1f7   :  { %1398 = vst.msk [vmem:[#allocation2 + $0x158] sm:$0xff] %vm681_vm4, %v1334_v28  ;;  %1399 = vst.msk [vmem:[#allocation2 + $0x160] sm:$0xff] %vm681_vm4, %v1335_v14 }
 0x1f8   :  { %1400 = vst.msk [vmem:[#allocation2 + $0x168] sm:$0xff] %vm681_vm4, %v1336_v3  ;;  %1401 = vst.msk [vmem:[#allocation2 + $0x170] sm:$0xff] %vm681_vm4, %v1337_v10 }
 0x1f9   :  { %1402 = vst.msk [vmem:[#allocation2 + $0x178] sm:$0xff] %vm681_vm4, %v1338_v16  ;;  %1403 = vst.msk [vmem:[#allocation2 + $0x180] sm:$0xff] %vm681_vm4, %v1339_v30 }
 0x1fa   :  { %1404 = vst.msk [vmem:[#allocation2 + $0x188] sm:$0xff] %vm681_vm4, %v1340_v4  ;;  %1405 = vst.msk [vmem:[#allocation2 + $0x190] sm:$0xff] %vm681_vm4, %v1341_v0 }
 0x1fb   :  { %1406 = vst.msk [vmem:[#allocation2 + $0x198] sm:$0xff] %vm681_vm4, %v1342_v6  ;;  %1407 = vst.msk [vmem:[#allocation2 + $0x1a0] sm:$0xff] %vm681_vm4, %v1343_v8 }
 0x1fc   :  { %1408 = vst.msk [vmem:[#allocation2 + $0x1a8] sm:$0xff] %vm681_vm4, %v1344_v55  ;;  %1409 = vst.msk [vmem:[#allocation2 + $0x1b0] sm:$0xff] %vm681_vm4, %v1345_v49 }
 0x1fd   :  { %1410 = vst.msk [vmem:[#allocation2 + $0x1b8] sm:$0xff] %vm681_vm4, %v1346_v17  ;;  %1411 = vst.msk [vmem:[#allocation2 + $0x1c0] sm:$0xff] %vm681_vm4, %v1347_v62 }
 0x1fe   :  { %1412 = vst.msk [vmem:[#allocation2 + $0x1c8] sm:$0xff] %vm681_vm4, %v1348_v45  ;;  %1413 = vst.msk [vmem:[#allocation2 + $0x1d0] sm:$0xff] %vm681_vm4, %v1349_v57 }
 0x1ff   :  { %1414 = vst.msk [vmem:[#allocation2 + $0x1d8] sm:$0xff] %vm681_vm4, %v1350_v40  ;;  %1415 = vst.msk [vmem:[#allocation2 + $0x1e0] sm:$0xff] %vm681_vm4, %v1351_v12 }
 0x200   :  { %1416 = vst.msk [vmem:[#allocation2 + $0x1e8] sm:$0xff] %vm681_vm4, %v1352_v60  ;;  %1418 = vst.msk [vmem:[#allocation2 + $0x1f8] sm:$0xff] %vm681_vm4, %v1354_v19 }
 0x201   :  { %1763 = shalt.err (!%p1760_p4)
}
 0x202   :  { %s1764_s10 = scalar_lea.hbm %s3605_s5, 8192 }
 0x203   :  { %p1765_p5 = scmp.ne.s32.totalorder %s3605_s5, %s1764_s10  ;;  %p1768_p6 = scmp.lt.u32.totalorder %s1764_s10, %s3605_s5 }
 0x205   :  { %p1770_p7 = pnand %p1768_p6, %p1765_p5 }
 0x207   :  { %1773 = shalt.err (!%p1770_p7)
}
 0x208   :  { %s1778_s15 = smov 128   ;;  %s1779_s16 = smov 8  }
 0x209   :  { %1430 = dma.vmem_to_hbm [thread:$0]  %s3569_s6, 8192, %s3605_s5, [#allocation3], %s1778_s15, %s1778_s15, %s1779_s16  }
 0x20a   :  { %1774 = dma.done.wait [#allocation3], 8192  }
 0x20b   :  { %1775 = vsyncadd [#allocation3], 4294959104 }
 0x20c   :  { %1434 = vsyncpa [#allocation3], 1 }

</bundles_post_ra>
